<compile_context>
chip_gen: v6e
topology: v6e:2x2x1
jax: 0.10.0
libtpu: 0.0.40
codegen_flags: <defaults>
</compile_context>

<pallas_src>
import functools

import jax
import jax.numpy as jnp
from jax.experimental import pallas as pl
from jax.experimental.pallas import tpu as pltpu


def _round_up(x, m):
  return ((x + m - 1) // m) * m


def _param_layout(E, H, V_pad):
  """Row layout of the single packed f32 parameter blob (8-aligned offsets)."""
  H2, G = 2 * H, 6 * H
  order = (('enc_wih', 2 * E, G),        # fused fwd/bwd encoder input->gate weight
           ('enc_whh', H2, G),           # fused block-diagonal encoder hidden->gate weight
           ('dec_wih_e', E, G),          # decoder input->gate weight, embedding half
           ('dec_wih_c', H2, G),         # decoder input->gate weight, context half
           ('dec_hfused', H2, H2 + G),   # [attn_wh | dec_whh] fused h_dec weight
           ('attn_we', H2, H2),          # encoder-output half of attention projection
           ('attn_vT', H2, 1),           # attention score vector (matmul RHS, col 0)
           ('fc_w', 2 * H2, V_pad))      # output projection (lane padded)
  layout = {}
  r = 8                                   # rows 0..7 hold the bias vectors
  for name, nr, nc in order:
    layout[name] = (r, nr, nc)
    r = _round_up(r + nr, 8)
  return layout, r


def _gru_step(x, h, wih, whh, bih, bhh, hs):
  """PyTorch-semantics GRU cell (f32, used by the pure-JAX reference)."""
  gi = jnp.dot(x, wih, preferred_element_type=jnp.float32) + bih
  gh = jnp.dot(h, whh, preferred_element_type=jnp.float32) + bhh
  r = jax.nn.sigmoid(gi[:, 0 * hs:1 * hs] + gh[:, 0 * hs:1 * hs])
  z = jax.nn.sigmoid(gi[:, 1 * hs:2 * hs] + gh[:, 1 * hs:2 * hs])
  n = jnp.tanh(gi[:, 2 * hs:3 * hs] + r * gh[:, 2 * hs:3 * hs])
  return (1.0 - z) * n + z * h


def _gru_gates(gi, gh, h, bhh_n, hs):
  """GRU update from pre-computed projections.

  gi = x @ W_ih + b_ih (+ b_hh folded for r/z); gh = h @ W_hh.
  The r/z sigmoids are fused into one launch (both gates fit in one vreg).
  """
  rz = jax.nn.sigmoid(gi[:, 0:2 * hs] + gh[:, 0:2 * hs])
  r = rz[:, 0:hs]
  z = rz[:, hs:2 * hs]
  n = jnp.tanh(gi[:, 2 * hs:3 * hs] + r * (gh[:, 2 * hs:3 * hs] + bhh_n))
  return (1.0 - z) * n + z * h


def seq2seq_kernel(src_enc_ref, dec_emb_ref, p_ref, out_ref,
                   enc_f_scratch, enc_b_scratch, hc_scratch,
                   *, B, S, T_dec, T_pad, E, H, V_pad, layout):
  f32 = jnp.float32
  H2 = 2 * H
  G = 6 * H          # encoder fused gate width == decoder gate width (3 * 2H)

  def wload(name, full_width=False):
    r0, nr, nc = layout[name]
    w = p_ref[r0:r0 + nr, :]
    if full_width or nc == w.shape[1]:
      return w
    return w[:, 0:nc]

  bias = p_ref[0:8, :]
  enc_bfold = bias[0:1, 0:G]
  enc_bhhn = bias[1:2, 0:H2]
  dec_bfold = bias[2:3, 0:G]
  dec_bhhn = bias[3:4, 0:H2]
  attn_b = bias[4:5, 0:H2]
  fc_b = bias[5:6, 0:V_pad]

  enc_wih = wload('enc_wih')
  enc_whh = wload('enc_whh')
  dec_wih_e = wload('dec_wih_e')
  dec_wih_c = wload('dec_wih_c')
  dec_hfused = wload('dec_hfused')
  attn_we = wload('attn_we')
  attn_vmat = wload('attn_vT', full_width=True)   # col 0 holds v, rest zero
  fc_w = wload('fc_w')

  # -------- hoisted input->gate projections (off the serial recurrences) -----
  # Encoder fwd/bwd are fused: src_enc[t] = [src[t] | src[S-1-t]] and enc_wih is
  # the per-gate block-diagonal of the two directions' input weights.
  src2 = src_enc_ref[...].reshape(S * B, 2 * E)
  gi_enc = (jnp.dot(src2, enc_wih, preferred_element_type=f32)
            + enc_bfold).reshape(S, B, G)
  dec2 = dec_emb_ref[...].reshape(T_pad * B, E)
  gi_dec = (jnp.dot(dec2, dec_wih_e, preferred_element_type=f32)
            + dec_bfold).reshape(T_pad, B, G)

  # -------- encoder: fused fwd+bwd recurrence, one matmul per step -----------
  h_enc = jnp.zeros((B, H2), f32)                 # [h_fwd | h_bwd]
  for t in range(S):
    gh = jnp.dot(h_enc, enc_whh, preferred_element_type=f32)
    h_enc = _gru_gates(gi_enc[t], gh, h_enc, enc_bhhn, H2)
    enc_f_scratch[t] = h_enc[:, 0:H]              # forward state of source pos t
    enc_b_scratch[S - 1 - t] = h_enc[:, H:H2]     # backward state of source pos S-1-t
  h_dec = h_enc   # == cat(fwd[S-1], bwd[0]) == cat(h_n[-2], h_n[-1])

  # one-time relayout: time-major encoder states -> batch-major (S in sublanes)
  enc_out = pltpu.einshape(
      "sbd->bsd",
      jnp.concatenate([enc_f_scratch[...], enc_b_scratch[...]], axis=-1))  # (B,S,2H)

  # hoisted encoder half of the additive-attention projection
  enc_proj = (jnp.dot(enc_out.reshape(B * S, H2), attn_we,
                      preferred_element_type=f32) + attn_b).reshape(B, S, H2)

  # zero so padded time rows produce finite (discarded) logits
  hc_scratch[...] = jnp.zeros((T_pad, B, 2 * H2), f32)

  # -------- decoder loop (unrolled, teacher forcing ratio = 1.0) --------------
  for t in range(T_dec):
    # single fused matmul for both h_dec-sourced projections:
    #   [:, :2H] = h_dec @ attn_wh (attention hidden half)
    #   [:, 2H:] = h_dec @ dec_whh (GRU hidden->gate projection)
    hp = jnp.dot(h_dec, dec_hfused, preferred_element_type=f32)       # (B, 2H+6H)
    h_proj = hp[:, 0:H2]
    gh = hp[:, H2:H2 + G]

    energy = jnp.tanh(enc_proj + h_proj[:, None, :])                   # (B, S, 2H)
    # scores via MXU; S stays in the sublane axis -> no per-step transpose
    scores = jnp.dot(energy.reshape(B * S, H2), attn_vmat,
                     preferred_element_type=f32)[:, 0:1].reshape(B, S, 1)
    scores = scores - jnp.max(scores, axis=1, keepdims=True)           # softmax(dim=1)
    p = jnp.exp(scores)
    attn = p * pl.reciprocal(jnp.sum(p, axis=1, keepdims=True), approx=True)
    context = jnp.sum(attn * enc_out, axis=1)                          # (B, 2H)

    # decoder GRU: embedding half hoisted, context half here
    gi = gi_dec[t] + jnp.dot(context, dec_wih_c, preferred_element_type=f32)
    h_dec = _gru_gates(gi, gh, h_dec, dec_bhhn, H2)

    hc_scratch[t] = jnp.concatenate([h_dec, context], axis=1)          # (B, 4H)

  # -------- batched fc projection + single lane-dense time-major store --------
  hc = hc_scratch[...].reshape(T_pad * B, 2 * H2)
  logits = jnp.dot(hc, fc_w, preferred_element_type=f32) + fc_b
  out_ref[...] = logits.reshape(T_pad, B, V_pad)


def seq2seq_forward(params, src_emb, dec_emb, *, B, S, T_dec, E, H, V):
  f32 = jnp.float32
  H2, G = 2 * H, 6 * H
  T_pad = _round_up(max(T_dec, 1), 8)
  V_pad = max(_round_up(V, 128), 128)
  PW = max(128, V_pad, H2 + G)               # param blob lane width

  # ---- time-major activations (plain XLA glue, free at these sizes) ---------
  src_tm = jnp.transpose(src_emb.astype(f32), (1, 0, 2))               # (S, B, E)
  src_enc = jnp.concatenate([src_tm, src_tm[::-1]], axis=-1)           # (S, B, 2E)
  dec_tm = jnp.transpose(dec_emb.astype(f32), (1, 0, 2))               # (T_dec, B, E)
  dec_tm = jnp.pad(dec_tm, ((0, T_pad - T_dec), (0, 0), (0, 0)))

  # ---- pack every weight/bias into ONE f32 blob (single input DMA) ----------
  def fold_bias(bih, bhh, hs):
    # fold b_ih (all gates) + b_hh (r, z gates only) into the input projection
    return jnp.concatenate([bih[:, :2 * hs] + bhh[:, :2 * hs], bih[:, 2 * hs:]], axis=1)

  def gate_interleave(wf, wb, h):
    # [r_f, r_b, z_f, z_b, n_f, n_b] column layout
    return jnp.concatenate([wf[..., 0:h], wb[..., 0:h],
                            wf[..., h:2 * h], wb[..., h:2 * h],
                            wf[..., 2 * h:3 * h], wb[..., 2 * h:3 * h]], axis=-1)

  def blockdiag_gates(wf, wb, h):
    zf, zb = jnp.zeros_like(wf), jnp.zeros_like(wb)
    return jnp.concatenate([gate_interleave(wf, zf, h),
                            gate_interleave(zb, wb, h)], axis=0)

  weights = {
      'enc_wih': blockdiag_gates(params['enc_f_wih'], params['enc_b_wih'], H),
      'enc_whh': blockdiag_gates(params['enc_f_whh'], params['enc_b_whh'], H),
      'dec_wih_e': params['dec_wih'][:E, :],
      'dec_wih_c': params['dec_wih'][E:, :],
      'dec_hfused': jnp.concatenate([params['attn_w'][:H2, :], params['dec_whh']],
                                    axis=1),
      'attn_we': params['attn_w'][H2:, :],
      'attn_vT': params['attn_v'].reshape(H2, 1),
      'fc_w': jnp.pad(params['fc_w'], ((0, 0), (0, V_pad - V))),
  }
  biases = [
      (0, gate_interleave(fold_bias(params['enc_f_bih'], params['enc_f_bhh'], H),
                          fold_bias(params['enc_b_bih'], params['enc_b_bhh'], H), H)),
      (1, jnp.concatenate([params['enc_f_bhh'][:, 2 * H:],
                           params['enc_b_bhh'][:, 2 * H:]], axis=1)),
      (2, fold_bias(params['dec_bih'], params['dec_bhh'], H2)),
      (3, params['dec_bhh'][:, 2 * H2:]),
      (4, params['attn_b']),
      (5, jnp.pad(params['fc_b'], ((0, 0), (0, V_pad - V)))),
  ]
  layout, total_rows = _param_layout(E, H, V_pad)
  blob = jnp.zeros((total_rows, PW), f32)
  for r, v in biases:
    blob = blob.at[r:r + 1, 0:v.shape[1]].set(v.astype(f32))
  for name, (r0, nr, nc) in layout.items():
    blob = blob.at[r0:r0 + nr, 0:nc].set(weights[name].astype(f32))

  kernel = functools.partial(
      seq2seq_kernel, B=B, S=S, T_dec=T_dec, T_pad=T_pad, E=E, H=H,
      V_pad=V_pad, layout=layout)
  vmem = pl.BlockSpec(memory_space=pltpu.MemorySpace.VMEM)
  out = pl.pallas_call(
      kernel,
      out_shape=jax.ShapeDtypeStruct((T_pad, B, V_pad), f32),
      in_specs=[vmem, vmem, vmem],
      out_specs=vmem,
      scratch_shapes=[pltpu.VMEM((S, B, H), f32),            # encoder fwd states
                      pltpu.VMEM((S, B, H), f32),            # encoder bwd states
                      pltpu.VMEM((T_pad, B, 2 * H2), f32)],  # (h_dec, context) per step
  )(src_enc, dec_tm, blob)
  return jnp.transpose(out, (1, 0, 2))[:, :T_dec, :V]


def reference_forward(params, src_emb, dec_emb, *, B, S, T_dec, E, H, V):
  """Pure-JAX f32 mirror of the PyTorch forward (sanity check only)."""
  h_f = jnp.zeros((B, H), jnp.float32)
  fwd = []
  for t in range(S):
    h_f = _gru_step(src_emb[:, t, :], h_f, params['enc_f_wih'],
                    params['enc_f_whh'], params['enc_f_bih'],
                    params['enc_f_bhh'], H)
    fwd.append(h_f)
  h_b = jnp.zeros((B, H), jnp.float32)
  bwd = [None] * S
  for t in range(S - 1, -1, -1):
    h_b = _gru_step(src_emb[:, t, :], h_b, params['enc_b_wih'],
                    params['enc_b_whh'], params['enc_b_bih'],
                    params['enc_b_bhh'], H)
    bwd[t] = h_b
  enc_out = jnp.stack(
      [jnp.concatenate([fwd[t], bwd[t]], axis=1) for t in range(S)], axis=1)
  h_dec = jnp.concatenate([fwd[S - 1], bwd[0]], axis=1)

  outs = []
  for t in range(T_dec):
    emb_t = dec_emb[:, t, :]
    hid_rep = jnp.broadcast_to(h_dec[:, None, :], (B, S, 2 * H))
    cat_hs = jnp.concatenate([hid_rep, enc_out], axis=2)
    energy = jnp.tanh(
        jnp.dot(cat_hs.reshape(B * S, 4 * H), params['attn_w'])
        + params['attn_b']).reshape(B, S, 2 * H)
    scores = jnp.sum(energy * params['attn_v'], axis=-1)
    attn = jax.nn.softmax(scores, axis=1)
    context = jnp.sum(attn[:, :, None] * enc_out, axis=1)
    rnn_in = jnp.concatenate([emb_t, context], axis=1)
    h_dec = _gru_step(rnn_in, h_dec, params['dec_wih'], params['dec_whh'],
                      params['dec_bih'], params['dec_bhh'], 2 * H)
    logits = jnp.dot(jnp.concatenate([h_dec, context], axis=1),
                     params['fc_w']) + params['fc_b']
    outs.append(logits[:, None, :])
  return jnp.concatenate(outs, axis=1)


def make_params(key, in_vocab, out_vocab, E, H, V):
  ks = jax.random.split(key, 20)
  u = lambda k, shape, lo=-0.1, hi=0.1: jax.random.uniform(
      k, shape, jnp.float32, lo, hi)
  p = {
      'enc_emb':   jax.random.normal(ks[0], (in_vocab, E), jnp.float32),
      'dec_emb':   jax.random.normal(ks[1], (out_vocab, E), jnp.float32),
      # encoder, forward direction (pre-transposed: (in, 3H))
      'enc_f_wih': u(ks[2], (E, 3 * H)), 'enc_f_whh': u(ks[3], (H, 3 * H)),
      'enc_f_bih': u(ks[4], (1, 3 * H)), 'enc_f_bhh': u(ks[5], (1, 3 * H)),
      # encoder, backward direction
      'enc_b_wih': u(ks[6], (E, 3 * H)), 'enc_b_whh': u(ks[7], (H, 3 * H)),
      'enc_b_bih': u(ks[8], (1, 3 * H)), 'enc_b_bhh': u(ks[9], (1, 3 * H)),
      # decoder GRU: input = E + 2H, hidden = 2H
      'dec_wih':   u(ks[10], (E + 2 * H, 6 * H)),
      'dec_whh':   u(ks[11], (2 * H, 6 * H)),
      'dec_bih':   u(ks[12], (1, 6 * H)), 'dec_bhh': u(ks[13], (1, 6 * H)),
      # attention: Linear(4H -> 2H), v ~ U[0,1) like torch.rand
      'attn_w':    u(ks[14], (4 * H, 2 * H)),
      'attn_b':    u(ks[15], (1, 2 * H)),
      'attn_v':    jax.random.uniform(ks[16], (1, 2 * H), jnp.float32),
      # fc: Linear(4H -> V)
      'fc_w':      u(ks[17], (4 * H, V)),
      'fc_b':      u(ks[18], (1, V)),
  }
  return p


if __name__ == "__main__":
  B, S, T = 2, 8, 7           # batch, src len, tgt len
  E, H = 16, 16               # embed_size, hidden_size
  IN_VOCAB, OUT_VOCAB = 20, 24
  T_DEC = T - 1

  key = jax.random.PRNGKey(0)
  k_src, k_tgt, k_param = jax.random.split(key, 3)
  src = jax.random.randint(k_src, (B, S), 0, IN_VOCAB)
  tgt = jax.random.randint(k_tgt, (B, T), 0, OUT_VOCAB)

  params = make_params(k_param, IN_VOCAB, OUT_VOCAB, E, H, OUT_VOCAB)

  # embedding lookups (gather glue in plain JAX; dropout = identity in eval mode)
  src_emb = jnp.take(params['enc_emb'], src, axis=0).astype(jnp.float32)
  dec_emb = jnp.take(params['dec_emb'], tgt[:, :-1], axis=0).astype(jnp.float32)

  out = seq2seq_forward(params, src_emb, dec_emb,
                        B=B, S=S, T_dec=T_DEC, E=E, H=H, V=OUT_VOCAB)
  out = jax.block_until_ready(out)

  ref = reference_forward(params, src_emb, dec_emb,
                          B=B, S=S, T_dec=T_DEC, E=E, H=H, V=OUT_VOCAB)

  assert out.shape == (B, T_DEC, OUT_VOCAB)
  assert bool(jnp.isfinite(out).all())
  assert bool(jnp.allclose(out, ref, rtol=5e-2, atol=5e-2))
  print("KERNEL_OK")
</pallas_src>

<mosaic_0001>
module attributes {stable_mosaic.version = 11 : i64} {
  func.func @seq2seq_kernel(%arg0: memref<8x2x32xf32, #tpu.memory_space<vmem>>, %arg1: memref<8x2x16xf32, #tpu.memory_space<vmem>>, %arg2: memref<280x128xf32, #tpu.memory_space<vmem>>, %arg3: memref<8x2x128xf32, #tpu.memory_space<vmem>>, %arg4: memref<8x2x16xf32, #tpu.memory_space<vmem>>, %arg5: memref<8x2x16xf32, #tpu.memory_space<vmem>>, %arg6: memref<8x2x64xf32, #tpu.memory_space<vmem>>) attributes {dimension_semantics = [], scalar_prefetch = 0 : i64, scratch_operands = 3 : i64, tpu.core_type = #tpu.core_type<tc>} {
    %c0 = arith.constant 0 : index
    %c0_0 = arith.constant 0 : index
    %0 = vector.load %arg2[%c0, %c0_0] : memref<280x128xf32, #tpu.memory_space<vmem>>, vector<8x128xf32>
    %1 = vector.extract_strided_slice %0 {offsets = [0, 0], sizes = [1, 96], strides = [1, 1]} : vector<8x128xf32> to vector<1x96xf32>
    %2 = vector.extract_strided_slice %0 {offsets = [1, 0], sizes = [1, 32], strides = [1, 1]} : vector<8x128xf32> to vector<1x32xf32>
    %3 = vector.extract_strided_slice %0 {offsets = [2, 0], sizes = [1, 96], strides = [1, 1]} : vector<8x128xf32> to vector<1x96xf32>
    %4 = vector.extract_strided_slice %0 {offsets = [3, 0], sizes = [1, 32], strides = [1, 1]} : vector<8x128xf32> to vector<1x32xf32>
    %5 = vector.extract_strided_slice %0 {offsets = [4, 0], sizes = [1, 32], strides = [1, 1]} : vector<8x128xf32> to vector<1x32xf32>
    %6 = vector.extract_strided_slice %0 {offsets = [5, 0], sizes = [1, 128], strides = [1, 1]} : vector<8x128xf32> to vector<1x128xf32>
    %c8 = arith.constant 8 : index
    %c0_1 = arith.constant 0 : index
    %7 = vector.load %arg2[%c8, %c0_1] : memref<280x128xf32, #tpu.memory_space<vmem>>, vector<32x128xf32>
    %8 = vector.extract_strided_slice %7 {offsets = [0, 0], sizes = [32, 96], strides = [1, 1]} : vector<32x128xf32> to vector<32x96xf32>
    %c40 = arith.constant 40 : index
    %c0_2 = arith.constant 0 : index
    %9 = vector.load %arg2[%c40, %c0_2] : memref<280x128xf32, #tpu.memory_space<vmem>>, vector<32x128xf32>
    %10 = vector.extract_strided_slice %9 {offsets = [0, 0], sizes = [32, 96], strides = [1, 1]} : vector<32x128xf32> to vector<32x96xf32>
    %c72 = arith.constant 72 : index
    %c0_3 = arith.constant 0 : index
    %11 = vector.load %arg2[%c72, %c0_3] : memref<280x128xf32, #tpu.memory_space<vmem>>, vector<16x128xf32>
    %12 = vector.extract_strided_slice %11 {offsets = [0, 0], sizes = [16, 96], strides = [1, 1]} : vector<16x128xf32> to vector<16x96xf32>
    %c88 = arith.constant 88 : index
    %c0_4 = arith.constant 0 : index
    %13 = vector.load %arg2[%c88, %c0_4] : memref<280x128xf32, #tpu.memory_space<vmem>>, vector<32x128xf32>
    %14 = vector.extract_strided_slice %13 {offsets = [0, 0], sizes = [32, 96], strides = [1, 1]} : vector<32x128xf32> to vector<32x96xf32>
    %c120 = arith.constant 120 : index
    %c0_5 = arith.constant 0 : index
    %15 = vector.load %arg2[%c120, %c0_5] : memref<280x128xf32, #tpu.memory_space<vmem>>, vector<32x128xf32>
    %c152 = arith.constant 152 : index
    %c0_6 = arith.constant 0 : index
    %16 = vector.load %arg2[%c152, %c0_6] : memref<280x128xf32, #tpu.memory_space<vmem>>, vector<32x128xf32>
    %17 = vector.extract_strided_slice %16 {offsets = [0, 0], sizes = [32, 32], strides = [1, 1]} : vector<32x128xf32> to vector<32x32xf32>
    %c184 = arith.constant 184 : index
    %c0_7 = arith.constant 0 : index
    %18 = vector.load %arg2[%c184, %c0_7] : memref<280x128xf32, #tpu.memory_space<vmem>>, vector<32x128xf32>
    %c216 = arith.constant 216 : index
    %c0_8 = arith.constant 0 : index
    %19 = vector.load %arg2[%c216, %c0_8] : memref<280x128xf32, #tpu.memory_space<vmem>>, vector<64x128xf32>
    %c0_9 = arith.constant 0 : index
    %c0_10 = arith.constant 0 : index
    %c0_11 = arith.constant 0 : index
    %20 = vector.load %arg0[%c0_9, %c0_10, %c0_11] : memref<8x2x32xf32, #tpu.memory_space<vmem>>, vector<8x2x32xf32>
    %21 = vector.shape_cast %20 : vector<8x2x32xf32> to vector<16x32xf32>
    %cst = arith.constant dense<0.000000e+00> : vector<16x96xf32>
    %22 = tpu.matmul %21, %8, %cst {dimension_numbers = #tpu.dot_dimension_numbers<[1], [0], [0], [1], [0, 0, 1, 1], [], []>} : vector<16x32xf32>, vector<32x96xf32>, vector<16x96xf32> -> vector<16x96xf32>
    %23 = vector.broadcast %1 : vector<1x96xf32> to vector<16x96xf32>
    %24 = arith.addf %22, %23 : vector<16x96xf32>
    %25 = vector.shape_cast %24 : vector<16x96xf32> to vector<8x2x96xf32>
    %c0_12 = arith.constant 0 : index
    %c0_13 = arith.constant 0 : index
    %c0_14 = arith.constant 0 : index
    %26 = vector.load %arg1[%c0_12, %c0_13, %c0_14] : memref<8x2x16xf32, #tpu.memory_space<vmem>>, vector<8x2x16xf32>
    %27 = vector.shape_cast %26 : vector<8x2x16xf32> to vector<16x16xf32>
    %cst_15 = arith.constant dense<0.000000e+00> : vector<16x96xf32>
    %28 = tpu.matmul %27, %12, %cst_15 {dimension_numbers = #tpu.dot_dimension_numbers<[1], [0], [0], [1], [0, 0, 1, 1], [], []>} : vector<16x16xf32>, vector<16x96xf32>, vector<16x96xf32> -> vector<16x96xf32>
    %29 = vector.broadcast %3 : vector<1x96xf32> to vector<16x96xf32>
    %30 = arith.addf %28, %29 : vector<16x96xf32>
    %31 = vector.shape_cast %30 : vector<16x96xf32> to vector<8x2x96xf32>
    %cst_16 = arith.constant 0.000000e+00 : f32
    %32 = vector.broadcast %cst_16 : f32 to vector<2x32xf32>
    %cst_17 = arith.constant dense<0.000000e+00> : vector<2x96xf32>
    %33 = tpu.matmul %32, %10, %cst_17 {dimension_numbers = #tpu.dot_dimension_numbers<[1], [0], [0], [1], [0, 0, 1, 1], [], []>} : vector<2x32xf32>, vector<32x96xf32>, vector<2x96xf32> -> vector<2x96xf32>
    %34 = vector.extract_strided_slice %25 {offsets = [0, 0, 0], sizes = [1, 2, 96], strides = [1, 1, 1]} : vector<8x2x96xf32> to vector<1x2x96xf32>
    %35 = vector.shape_cast %34 : vector<1x2x96xf32> to vector<2x96xf32>
    %36 = vector.extract_strided_slice %35 {offsets = [0, 0], sizes = [2, 64], strides = [1, 1]} : vector<2x96xf32> to vector<2x64xf32>
    %37 = vector.extract_strided_slice %33 {offsets = [0, 0], sizes = [2, 64], strides = [1, 1]} : vector<2x96xf32> to vector<2x64xf32>
    %38 = arith.addf %36, %37 : vector<2x64xf32>
    %39 = arith.negf %38 : vector<2x64xf32>
    %40 = math.exp %39 : vector<2x64xf32>
    %cst_18 = arith.constant 1.000000e+00 : f32
    %41 = vector.broadcast %cst_18 : f32 to vector<2x64xf32>
    %42 = arith.addf %41, %40 : vector<2x64xf32>
    %43 = arith.divf %41, %42 : vector<2x64xf32>
    %44 = vector.extract_strided_slice %43 {offsets = [0, 0], sizes = [2, 32], strides = [1, 1]} : vector<2x64xf32> to vector<2x32xf32>
    %45 = vector.extract_strided_slice %43 {offsets = [0, 32], sizes = [2, 32], strides = [1, 1]} : vector<2x64xf32> to vector<2x32xf32>
    %46 = vector.extract_strided_slice %35 {offsets = [0, 64], sizes = [2, 32], strides = [1, 1]} : vector<2x96xf32> to vector<2x32xf32>
    %47 = vector.extract_strided_slice %33 {offsets = [0, 64], sizes = [2, 32], strides = [1, 1]} : vector<2x96xf32> to vector<2x32xf32>
    %48 = vector.broadcast %2 : vector<1x32xf32> to vector<2x32xf32>
    %49 = arith.addf %47, %48 : vector<2x32xf32>
    %50 = arith.mulf %44, %49 : vector<2x32xf32>
    %51 = arith.addf %46, %50 : vector<2x32xf32>
    %52 = math.tanh %51 : vector<2x32xf32>
    %cst_19 = arith.constant 1.000000e+00 : f32
    %53 = vector.broadcast %cst_19 : f32 to vector<2x32xf32>
    %54 = arith.subf %53, %45 : vector<2x32xf32>
    %55 = arith.mulf %54, %52 : vector<2x32xf32>
    %56 = arith.mulf %45, %32 : vector<2x32xf32>
    %57 = arith.addf %55, %56 : vector<2x32xf32>
    %58 = vector.extract_strided_slice %57 {offsets = [0, 0], sizes = [2, 16], strides = [1, 1]} : vector<2x32xf32> to vector<2x16xf32>
    %c0_20 = arith.constant 0 : index
    %c0_21 = arith.constant 0 : index
    %c0_22 = arith.constant 0 : index
    %59 = vector.load %arg4[%c0_20, %c0_21, %c0_22] : memref<8x2x16xf32, #tpu.memory_space<vmem>>, vector<1x2x16xf32>
    %60 = vector.shape_cast %59 : vector<1x2x16xf32> to vector<2x16xf32>
    %61 = vector.shape_cast %58 : vector<2x16xf32> to vector<1x2x16xf32>
    tpu.vector_store %arg4[%c0_20, %c0_21, %c0_22], %61 {strides = array<i32>} : memref<8x2x16xf32, #tpu.memory_space<vmem>>, vector<1x2x16xf32>,
    %62 = vector.extract_strided_slice %57 {offsets = [0, 16], sizes = [2, 16], strides = [1, 1]} : vector<2x32xf32> to vector<2x16xf32>
    %c7 = arith.constant 7 : index
    %c0_23 = arith.constant 0 : index
    %c0_24 = arith.constant 0 : index
    %63 = vector.load %arg5[%c7, %c0_23, %c0_24] : memref<8x2x16xf32, #tpu.memory_space<vmem>>, vector<1x2x16xf32>
    %64 = vector.shape_cast %63 : vector<1x2x16xf32> to vector<2x16xf32>
    %65 = vector.shape_cast %62 : vector<2x16xf32> to vector<1x2x16xf32>
    tpu.vector_store %arg5[%c7, %c0_23, %c0_24], %65 {strides = array<i32>} : memref<8x2x16xf32, #tpu.memory_space<vmem>>, vector<1x2x16xf32>,
    %cst_25 = arith.constant dense<0.000000e+00> : vector<2x96xf32>
    %66 = tpu.matmul %57, %10, %cst_25 {dimension_numbers = #tpu.dot_dimension_numbers<[1], [0], [0], [1], [0, 0, 1, 1], [], []>} : vector<2x32xf32>, vector<32x96xf32>, vector<2x96xf32> -> vector<2x96xf32>
    %67 = vector.extract_strided_slice %25 {offsets = [1, 0, 0], sizes = [1, 2, 96], strides = [1, 1, 1]} : vector<8x2x96xf32> to vector<1x2x96xf32>
    %68 = vector.shape_cast %67 : vector<1x2x96xf32> to vector<2x96xf32>
    %69 = vector.extract_strided_slice %68 {offsets = [0, 0], sizes = [2, 64], strides = [1, 1]} : vector<2x96xf32> to vector<2x64xf32>
    %70 = vector.extract_strided_slice %66 {offsets = [0, 0], sizes = [2, 64], strides = [1, 1]} : vector<2x96xf32> to vector<2x64xf32>
    %71 = arith.addf %69, %70 : vector<2x64xf32>
    %72 = arith.negf %71 : vector<2x64xf32>
    %73 = math.exp %72 : vector<2x64xf32>
    %cst_26 = arith.constant 1.000000e+00 : f32
    %74 = vector.broadcast %cst_26 : f32 to vector<2x64xf32>
    %75 = arith.addf %74, %73 : vector<2x64xf32>
    %76 = arith.divf %74, %75 : vector<2x64xf32>
    %77 = vector.extract_strided_slice %76 {offsets = [0, 0], sizes = [2, 32], strides = [1, 1]} : vector<2x64xf32> to vector<2x32xf32>
    %78 = vector.extract_strided_slice %76 {offsets = [0, 32], sizes = [2, 32], strides = [1, 1]} : vector<2x64xf32> to vector<2x32xf32>
    %79 = vector.extract_strided_slice %68 {offsets = [0, 64], sizes = [2, 32], strides = [1, 1]} : vector<2x96xf32> to vector<2x32xf32>
    %80 = vector.extract_strided_slice %66 {offsets = [0, 64], sizes = [2, 32], strides = [1, 1]} : vector<2x96xf32> to vector<2x32xf32>
    %81 = vector.broadcast %2 : vector<1x32xf32> to vector<2x32xf32>
    %82 = arith.addf %80, %81 : vector<2x32xf32>
    %83 = arith.mulf %77, %82 : vector<2x32xf32>
    %84 = arith.addf %79, %83 : vector<2x32xf32>
    %85 = math.tanh %84 : vector<2x32xf32>
    %cst_27 = arith.constant 1.000000e+00 : f32
    %86 = vector.broadcast %cst_27 : f32 to vector<2x32xf32>
    %87 = arith.subf %86, %78 : vector<2x32xf32>
    %88 = arith.mulf %87, %85 : vector<2x32xf32>
    %89 = arith.mulf %78, %57 : vector<2x32xf32>
    %90 = arith.addf %88, %89 : vector<2x32xf32>
    %91 = vector.extract_strided_slice %90 {offsets = [0, 0], sizes = [2, 16], strides = [1, 1]} : vector<2x32xf32> to vector<2x16xf32>
    %c1 = arith.constant 1 : index
    %c0_28 = arith.constant 0 : index
    %c0_29 = arith.constant 0 : index
    %92 = vector.load %arg4[%c1, %c0_28, %c0_29] : memref<8x2x16xf32, #tpu.memory_space<vmem>>, vector<1x2x16xf32>
    %93 = vector.shape_cast %92 : vector<1x2x16xf32> to vector<2x16xf32>
    %94 = vector.shape_cast %91 : vector<2x16xf32> to vector<1x2x16xf32>
    tpu.vector_store %arg4[%c1, %c0_28, %c0_29], %94 {strides = array<i32>} : memref<8x2x16xf32, #tpu.memory_space<vmem>>, vector<1x2x16xf32>,
    %95 = vector.extract_strided_slice %90 {offsets = [0, 16], sizes = [2, 16], strides = [1, 1]} : vector<2x32xf32> to vector<2x16xf32>
    %c6 = arith.constant 6 : index
    %c0_30 = arith.constant 0 : index
    %c0_31 = arith.constant 0 : index
    %96 = vector.load %arg5[%c6, %c0_30, %c0_31] : memref<8x2x16xf32, #tpu.memory_space<vmem>>, vector<1x2x16xf32>
    %97 = vector.shape_cast %96 : vector<1x2x16xf32> to vector<2x16xf32>
    %98 = vector.shape_cast %95 : vector<2x16xf32> to vector<1x2x16xf32>
    tpu.vector_store %arg5[%c6, %c0_30, %c0_31], %98 {strides = array<i32>} : memref<8x2x16xf32, #tpu.memory_space<vmem>>, vector<1x2x16xf32>,
    %cst_32 = arith.constant dense<0.000000e+00> : vector<2x96xf32>
    %99 = tpu.matmul %90, %10, %cst_32 {dimension_numbers = #tpu.dot_dimension_numbers<[1], [0], [0], [1], [0, 0, 1, 1], [], []>} : vector<2x32xf32>, vector<32x96xf32>, vector<2x96xf32> -> vector<2x96xf32>
    %100 = vector.extract_strided_slice %25 {offsets = [2, 0, 0], sizes = [1, 2, 96], strides = [1, 1, 1]} : vector<8x2x96xf32> to vector<1x2x96xf32>
    %101 = vector.shape_cast %100 : vector<1x2x96xf32> to vector<2x96xf32>
    %102 = vector.extract_strided_slice %101 {offsets = [0, 0], sizes = [2, 64], strides = [1, 1]} : vector<2x96xf32> to vector<2x64xf32>
    %103 = vector.extract_strided_slice %99 {offsets = [0, 0], sizes = [2, 64], strides = [1, 1]} : vector<2x96xf32> to vector<2x64xf32>
    %104 = arith.addf %102, %103 : vector<2x64xf32>
    %105 = arith.negf %104 : vector<2x64xf32>
    %106 = math.exp %105 : vector<2x64xf32>
    %cst_33 = arith.constant 1.000000e+00 : f32
    %107 = vector.broadcast %cst_33 : f32 to vector<2x64xf32>
    %108 = arith.addf %107, %106 : vector<2x64xf32>
    %109 = arith.divf %107, %108 : vector<2x64xf32>
    %110 = vector.extract_strided_slice %109 {offsets = [0, 0], sizes = [2, 32], strides = [1, 1]} : vector<2x64xf32> to vector<2x32xf32>
    %111 = vector.extract_strided_slice %109 {offsets = [0, 32], sizes = [2, 32], strides = [1, 1]} : vector<2x64xf32> to vector<2x32xf32>
    %112 = vector.extract_strided_slice %101 {offsets = [0, 64], sizes = [2, 32], strides = [1, 1]} : vector<2x96xf32> to vector<2x32xf32>
    %113 = vector.extract_strided_slice %99 {offsets = [0, 64], sizes = [2, 32], strides = [1, 1]} : vector<2x96xf32> to vector<2x32xf32>
    %114 = vector.broadcast %2 : vector<1x32xf32> to vector<2x32xf32>
    %115 = arith.addf %113, %114 : vector<2x32xf32>
    %116 = arith.mulf %110, %115 : vector<2x32xf32>
    %117 = arith.addf %112, %116 : vector<2x32xf32>
    %118 = math.tanh %117 : vector<2x32xf32>
    %cst_34 = arith.constant 1.000000e+00 : f32
    %119 = vector.broadcast %cst_34 : f32 to vector<2x32xf32>
    %120 = arith.subf %119, %111 : vector<2x32xf32>
    %121 = arith.mulf %120, %118 : vector<2x32xf32>
    %122 = arith.mulf %111, %90 : vector<2x32xf32>
    %123 = arith.addf %121, %122 : vector<2x32xf32>
    %124 = vector.extract_strided_slice %123 {offsets = [0, 0], sizes = [2, 16], strides = [1, 1]} : vector<2x32xf32> to vector<2x16xf32>
    %c2 = arith.constant 2 : index
    %c0_35 = arith.constant 0 : index
    %c0_36 = arith.constant 0 : index
    %125 = vector.load %arg4[%c2, %c0_35, %c0_36] : memref<8x2x16xf32, #tpu.memory_space<vmem>>, vector<1x2x16xf32>
    %126 = vector.shape_cast %125 : vector<1x2x16xf32> to vector<2x16xf32>
    %127 = vector.shape_cast %124 : vector<2x16xf32> to vector<1x2x16xf32>
    tpu.vector_store %arg4[%c2, %c0_35, %c0_36], %127 {strides = array<i32>} : memref<8x2x16xf32, #tpu.memory_space<vmem>>, vector<1x2x16xf32>,
    %128 = vector.extract_strided_slice %123 {offsets = [0, 16], sizes = [2, 16], strides = [1, 1]} : vector<2x32xf32> to vector<2x16xf32>
    %c5 = arith.constant 5 : index
    %c0_37 = arith.constant 0 : index
    %c0_38 = arith.constant 0 : index
    %129 = vector.load %arg5[%c5, %c0_37, %c0_38] : memref<8x2x16xf32, #tpu.memory_space<vmem>>, vector<1x2x16xf32>
    %130 = vector.shape_cast %129 : vector<1x2x16xf32> to vector<2x16xf32>
    %131 = vector.shape_cast %128 : vector<2x16xf32> to vector<1x2x16xf32>
    tpu.vector_store %arg5[%c5, %c0_37, %c0_38], %131 {strides = array<i32>} : memref<8x2x16xf32, #tpu.memory_space<vmem>>, vector<1x2x16xf32>,
    %cst_39 = arith.constant dense<0.000000e+00> : vector<2x96xf32>
    %132 = tpu.matmul %123, %10, %cst_39 {dimension_numbers = #tpu.dot_dimension_numbers<[1], [0], [0], [1], [0, 0, 1, 1], [], []>} : vector<2x32xf32>, vector<32x96xf32>, vector<2x96xf32> -> vector<2x96xf32>
    %133 = vector.extract_strided_slice %25 {offsets = [3, 0, 0], sizes = [1, 2, 96], strides = [1, 1, 1]} : vector<8x2x96xf32> to vector<1x2x96xf32>
    %134 = vector.shape_cast %133 : vector<1x2x96xf32> to vector<2x96xf32>
    %135 = vector.extract_strided_slice %134 {offsets = [0, 0], sizes = [2, 64], strides = [1, 1]} : vector<2x96xf32> to vector<2x64xf32>
    %136 = vector.extract_strided_slice %132 {offsets = [0, 0], sizes = [2, 64], strides = [1, 1]} : vector<2x96xf32> to vector<2x64xf32>
    %137 = arith.addf %135, %136 : vector<2x64xf32>
    %138 = arith.negf %137 : vector<2x64xf32>
    %139 = math.exp %138 : vector<2x64xf32>
    %cst_40 = arith.constant 1.000000e+00 : f32
    %140 = vector.broadcast %cst_40 : f32 to vector<2x64xf32>
    %141 = arith.addf %140, %139 : vector<2x64xf32>
    %142 = arith.divf %140, %141 : vector<2x64xf32>
    %143 = vector.extract_strided_slice %142 {offsets = [0, 0], sizes = [2, 32], strides = [1, 1]} : vector<2x64xf32> to vector<2x32xf32>
    %144 = vector.extract_strided_slice %142 {offsets = [0, 32], sizes = [2, 32], strides = [1, 1]} : vector<2x64xf32> to vector<2x32xf32>
    %145 = vector.extract_strided_slice %134 {offsets = [0, 64], sizes = [2, 32], strides = [1, 1]} : vector<2x96xf32> to vector<2x32xf32>
    %146 = vector.extract_strided_slice %132 {offsets = [0, 64], sizes = [2, 32], strides = [1, 1]} : vector<2x96xf32> to vector<2x32xf32>
    %147 = vector.broadcast %2 : vector<1x32xf32> to vector<2x32xf32>
    %148 = arith.addf %146, %147 : vector<2x32xf32>
    %149 = arith.mulf %143, %148 : vector<2x32xf32>
    %150 = arith.addf %145, %149 : vector<2x32xf32>
    %151 = math.tanh %150 : vector<2x32xf32>
    %cst_41 = arith.constant 1.000000e+00 : f32
    %152 = vector.broadcast %cst_41 : f32 to vector<2x32xf32>
    %153 = arith.subf %152, %144 : vector<2x32xf32>
    %154 = arith.mulf %153, %151 : vector<2x32xf32>
    %155 = arith.mulf %144, %123 : vector<2x32xf32>
    %156 = arith.addf %154, %155 : vector<2x32xf32>
    %157 = vector.extract_strided_slice %156 {offsets = [0, 0], sizes = [2, 16], strides = [1, 1]} : vector<2x32xf32> to vector<2x16xf32>
    %c3 = arith.constant 3 : index
    %c0_42 = arith.constant 0 : index
    %c0_43 = arith.constant 0 : index
    %158 = vector.load %arg4[%c3, %c0_42, %c0_43] : memref<8x2x16xf32, #tpu.memory_space<vmem>>, vector<1x2x16xf32>
    %159 = vector.shape_cast %158 : vector<1x2x16xf32> to vector<2x16xf32>
    %160 = vector.shape_cast %157 : vector<2x16xf32> to vector<1x2x16xf32>
    tpu.vector_store %arg4[%c3, %c0_42, %c0_43], %160 {strides = array<i32>} : memref<8x2x16xf32, #tpu.memory_space<vmem>>, vector<1x2x16xf32>,
    %161 = vector.extract_strided_slice %156 {offsets = [0, 16], sizes = [2, 16], strides = [1, 1]} : vector<2x32xf32> to vector<2x16xf32>
    %c4 = arith.constant 4 : index
    %c0_44 = arith.constant 0 : index
    %c0_45 = arith.constant 0 : index
    %162 = vector.load %arg5[%c4, %c0_44, %c0_45] : memref<8x2x16xf32, #tpu.memory_space<vmem>>, vector<1x2x16xf32>
    %163 = vector.shape_cast %162 : vector<1x2x16xf32> to vector<2x16xf32>
    %164 = vector.shape_cast %161 : vector<2x16xf32> to vector<1x2x16xf32>
    tpu.vector_store %arg5[%c4, %c0_44, %c0_45], %164 {strides = array<i32>} : memref<8x2x16xf32, #tpu.memory_space<vmem>>, vector<1x2x16xf32>,
    %cst_46 = arith.constant dense<0.000000e+00> : vector<2x96xf32>
    %165 = tpu.matmul %156, %10, %cst_46 {dimension_numbers = #tpu.dot_dimension_numbers<[1], [0], [0], [1], [0, 0, 1, 1], [], []>} : vector<2x32xf32>, vector<32x96xf32>, vector<2x96xf32> -> vector<2x96xf32>
    %166 = vector.extract_strided_slice %25 {offsets = [4, 0, 0], sizes = [1, 2, 96], strides = [1, 1, 1]} : vector<8x2x96xf32> to vector<1x2x96xf32>
    %167 = vector.shape_cast %166 : vector<1x2x96xf32> to vector<2x96xf32>
    %168 = vector.extract_strided_slice %167 {offsets = [0, 0], sizes = [2, 64], strides = [1, 1]} : vector<2x96xf32> to vector<2x64xf32>
    %169 = vector.extract_strided_slice %165 {offsets = [0, 0], sizes = [2, 64], strides = [1, 1]} : vector<2x96xf32> to vector<2x64xf32>
    %170 = arith.addf %168, %169 : vector<2x64xf32>
    %171 = arith.negf %170 : vector<2x64xf32>
    %172 = math.exp %171 : vector<2x64xf32>
    %cst_47 = arith.constant 1.000000e+00 : f32
    %173 = vector.broadcast %cst_47 : f32 to vector<2x64xf32>
    %174 = arith.addf %173, %172 : vector<2x64xf32>
    %175 = arith.divf %173, %174 : vector<2x64xf32>
    %176 = vector.extract_strided_slice %175 {offsets = [0, 0], sizes = [2, 32], strides = [1, 1]} : vector<2x64xf32> to vector<2x32xf32>
    %177 = vector.extract_strided_slice %175 {offsets = [0, 32], sizes = [2, 32], strides = [1, 1]} : vector<2x64xf32> to vector<2x32xf32>
    %178 = vector.extract_strided_slice %167 {offsets = [0, 64], sizes = [2, 32], strides = [1, 1]} : vector<2x96xf32> to vector<2x32xf32>
    %179 = vector.extract_strided_slice %165 {offsets = [0, 64], sizes = [2, 32], strides = [1, 1]} : vector<2x96xf32> to vector<2x32xf32>
    %180 = vector.broadcast %2 : vector<1x32xf32> to vector<2x32xf32>
    %181 = arith.addf %179, %180 : vector<2x32xf32>
    %182 = arith.mulf %176, %181 : vector<2x32xf32>
    %183 = arith.addf %178, %182 : vector<2x32xf32>
    %184 = math.tanh %183 : vector<2x32xf32>
    %cst_48 = arith.constant 1.000000e+00 : f32
    %185 = vector.broadcast %cst_48 : f32 to vector<2x32xf32>
    %186 = arith.subf %185, %177 : vector<2x32xf32>
    %187 = arith.mulf %186, %184 : vector<2x32xf32>
    %188 = arith.mulf %177, %156 : vector<2x32xf32>
    %189 = arith.addf %187, %188 : vector<2x32xf32>
    %190 = vector.extract_strided_slice %189 {offsets = [0, 0], sizes = [2, 16], strides = [1, 1]} : vector<2x32xf32> to vector<2x16xf32>
    %c4_49 = arith.constant 4 : index
    %c0_50 = arith.constant 0 : index
    %c0_51 = arith.constant 0 : index
    %191 = vector.load %arg4[%c4_49, %c0_50, %c0_51] : memref<8x2x16xf32, #tpu.memory_space<vmem>>, vector<1x2x16xf32>
    %192 = vector.shape_cast %191 : vector<1x2x16xf32> to vector<2x16xf32>
    %193 = vector.shape_cast %190 : vector<2x16xf32> to vector<1x2x16xf32>
    tpu.vector_store %arg4[%c4_49, %c0_50, %c0_51], %193 {strides = array<i32>} : memref<8x2x16xf32, #tpu.memory_space<vmem>>, vector<1x2x16xf32>,
    %194 = vector.extract_strided_slice %189 {offsets = [0, 16], sizes = [2, 16], strides = [1, 1]} : vector<2x32xf32> to vector<2x16xf32>
    %c3_52 = arith.constant 3 : index
    %c0_53 = arith.constant 0 : index
    %c0_54 = arith.constant 0 : index
    %195 = vector.load %arg5[%c3_52, %c0_53, %c0_54] : memref<8x2x16xf32, #tpu.memory_space<vmem>>, vector<1x2x16xf32>
    %196 = vector.shape_cast %195 : vector<1x2x16xf32> to vector<2x16xf32>
    %197 = vector.shape_cast %194 : vector<2x16xf32> to vector<1x2x16xf32>
    tpu.vector_store %arg5[%c3_52, %c0_53, %c0_54], %197 {strides = array<i32>} : memref<8x2x16xf32, #tpu.memory_space<vmem>>, vector<1x2x16xf32>,
    %cst_55 = arith.constant dense<0.000000e+00> : vector<2x96xf32>
    %198 = tpu.matmul %189, %10, %cst_55 {dimension_numbers = #tpu.dot_dimension_numbers<[1], [0], [0], [1], [0, 0, 1, 1], [], []>} : vector<2x32xf32>, vector<32x96xf32>, vector<2x96xf32> -> vector<2x96xf32>
    %199 = vector.extract_strided_slice %25 {offsets = [5, 0, 0], sizes = [1, 2, 96], strides = [1, 1, 1]} : vector<8x2x96xf32> to vector<1x2x96xf32>
    %200 = vector.shape_cast %199 : vector<1x2x96xf32> to vector<2x96xf32>
    %201 = vector.extract_strided_slice %200 {offsets = [0, 0], sizes = [2, 64], strides = [1, 1]} : vector<2x96xf32> to vector<2x64xf32>
    %202 = vector.extract_strided_slice %198 {offsets = [0, 0], sizes = [2, 64], strides = [1, 1]} : vector<2x96xf32> to vector<2x64xf32>
    %203 = arith.addf %201, %202 : vector<2x64xf32>
    %204 = arith.negf %203 : vector<2x64xf32>
    %205 = math.exp %204 : vector<2x64xf32>
    %cst_56 = arith.constant 1.000000e+00 : f32
    %206 = vector.broadcast %cst_56 : f32 to vector<2x64xf32>
    %207 = arith.addf %206, %205 : vector<2x64xf32>
    %208 = arith.divf %206, %207 : vector<2x64xf32>
    %209 = vector.extract_strided_slice %208 {offsets = [0, 0], sizes = [2, 32], strides = [1, 1]} : vector<2x64xf32> to vector<2x32xf32>
    %210 = vector.extract_strided_slice %208 {offsets = [0, 32], sizes = [2, 32], strides = [1, 1]} : vector<2x64xf32> to vector<2x32xf32>
    %211 = vector.extract_strided_slice %200 {offsets = [0, 64], sizes = [2, 32], strides = [1, 1]} : vector<2x96xf32> to vector<2x32xf32>
    %212 = vector.extract_strided_slice %198 {offsets = [0, 64], sizes = [2, 32], strides = [1, 1]} : vector<2x96xf32> to vector<2x32xf32>
    %213 = vector.broadcast %2 : vector<1x32xf32> to vector<2x32xf32>
    %214 = arith.addf %212, %213 : vector<2x32xf32>
    %215 = arith.mulf %209, %214 : vector<2x32xf32>
    %216 = arith.addf %211, %215 : vector<2x32xf32>
    %217 = math.tanh %216 : vector<2x32xf32>
    %cst_57 = arith.constant 1.000000e+00 : f32
    %218 = vector.broadcast %cst_57 : f32 to vector<2x32xf32>
    %219 = arith.subf %218, %210 : vector<2x32xf32>
    %220 = arith.mulf %219, %217 : vector<2x32xf32>
    %221 = arith.mulf %210, %189 : vector<2x32xf32>
    %222 = arith.addf %220, %221 : vector<2x32xf32>
    %223 = vector.extract_strided_slice %222 {offsets = [0, 0], sizes = [2, 16], strides = [1, 1]} : vector<2x32xf32> to vector<2x16xf32>
    %c5_58 = arith.constant 5 : index
    %c0_59 = arith.constant 0 : index
    %c0_60 = arith.constant 0 : index
    %224 = vector.load %arg4[%c5_58, %c0_59, %c0_60] : memref<8x2x16xf32, #tpu.memory_space<vmem>>, vector<1x2x16xf32>
    %225 = vector.shape_cast %224 : vector<1x2x16xf32> to vector<2x16xf32>
    %226 = vector.shape_cast %223 : vector<2x16xf32> to vector<1x2x16xf32>
    tpu.vector_store %arg4[%c5_58, %c0_59, %c0_60], %226 {strides = array<i32>} : memref<8x2x16xf32, #tpu.memory_space<vmem>>, vector<1x2x16xf32>,
    %227 = vector.extract_strided_slice %222 {offsets = [0, 16], sizes = [2, 16], strides = [1, 1]} : vector<2x32xf32> to vector<2x16xf32>
    %c2_61 = arith.constant 2 : index
    %c0_62 = arith.constant 0 : index
    %c0_63 = arith.constant 0 : index
    %228 = vector.load %arg5[%c2_61, %c0_62, %c0_63] : memref<8x2x16xf32, #tpu.memory_space<vmem>>, vector<1x2x16xf32>
    %229 = vector.shape_cast %228 : vector<1x2x16xf32> to vector<2x16xf32>
    %230 = vector.shape_cast %227 : vector<2x16xf32> to vector<1x2x16xf32>
    tpu.vector_store %arg5[%c2_61, %c0_62, %c0_63], %230 {strides = array<i32>} : memref<8x2x16xf32, #tpu.memory_space<vmem>>, vector<1x2x16xf32>,
    %cst_64 = arith.constant dense<0.000000e+00> : vector<2x96xf32>
    %231 = tpu.matmul %222, %10, %cst_64 {dimension_numbers = #tpu.dot_dimension_numbers<[1], [0], [0], [1], [0, 0, 1, 1], [], []>} : vector<2x32xf32>, vector<32x96xf32>, vector<2x96xf32> -> vector<2x96xf32>
    %232 = vector.extract_strided_slice %25 {offsets = [6, 0, 0], sizes = [1, 2, 96], strides = [1, 1, 1]} : vector<8x2x96xf32> to vector<1x2x96xf32>
    %233 = vector.shape_cast %232 : vector<1x2x96xf32> to vector<2x96xf32>
    %234 = vector.extract_strided_slice %233 {offsets = [0, 0], sizes = [2, 64], strides = [1, 1]} : vector<2x96xf32> to vector<2x64xf32>
    %235 = vector.extract_strided_slice %231 {offsets = [0, 0], sizes = [2, 64], strides = [1, 1]} : vector<2x96xf32> to vector<2x64xf32>
    %236 = arith.addf %234, %235 : vector<2x64xf32>
    %237 = arith.negf %236 : vector<2x64xf32>
    %238 = math.exp %237 : vector<2x64xf32>
    %cst_65 = arith.constant 1.000000e+00 : f32
    %239 = vector.broadcast %cst_65 : f32 to vector<2x64xf32>
    %240 = arith.addf %239, %238 : vector<2x64xf32>
    %241 = arith.divf %239, %240 : vector<2x64xf32>
    %242 = vector.extract_strided_slice %241 {offsets = [0, 0], sizes = [2, 32], strides = [1, 1]} : vector<2x64xf32> to vector<2x32xf32>
    %243 = vector.extract_strided_slice %241 {offsets = [0, 32], sizes = [2, 32], strides = [1, 1]} : vector<2x64xf32> to vector<2x32xf32>
    %244 = vector.extract_strided_slice %233 {offsets = [0, 64], sizes = [2, 32], strides = [1, 1]} : vector<2x96xf32> to vector<2x32xf32>
    %245 = vector.extract_strided_slice %231 {offsets = [0, 64], sizes = [2, 32], strides = [1, 1]} : vector<2x96xf32> to vector<2x32xf32>
    %246 = vector.broadcast %2 : vector<1x32xf32> to vector<2x32xf32>
    %247 = arith.addf %245, %246 : vector<2x32xf32>
    %248 = arith.mulf %242, %247 : vector<2x32xf32>
    %249 = arith.addf %244, %248 : vector<2x32xf32>
    %250 = math.tanh %249 : vector<2x32xf32>
    %cst_66 = arith.constant 1.000000e+00 : f32
    %251 = vector.broadcast %cst_66 : f32 to vector<2x32xf32>
    %252 = arith.subf %251, %243 : vector<2x32xf32>
    %253 = arith.mulf %252, %250 : vector<2x32xf32>
    %254 = arith.mulf %243, %222 : vector<2x32xf32>
    %255 = arith.addf %253, %254 : vector<2x32xf32>
    %256 = vector.extract_strided_slice %255 {offsets = [0, 0], sizes = [2, 16], strides = [1, 1]} : vector<2x32xf32> to vector<2x16xf32>
    %c6_67 = arith.constant 6 : index
    %c0_68 = arith.constant 0 : index
    %c0_69 = arith.constant 0 : index
    %257 = vector.load %arg4[%c6_67, %c0_68, %c0_69] : memref<8x2x16xf32, #tpu.memory_space<vmem>>, vector<1x2x16xf32>
    %258 = vector.shape_cast %257 : vector<1x2x16xf32> to vector<2x16xf32>
    %259 = vector.shape_cast %256 : vector<2x16xf32> to vector<1x2x16xf32>
    tpu.vector_store %arg4[%c6_67, %c0_68, %c0_69], %259 {strides = array<i32>} : memref<8x2x16xf32, #tpu.memory_space<vmem>>, vector<1x2x16xf32>,
    %260 = vector.extract_strided_slice %255 {offsets = [0, 16], sizes = [2, 16], strides = [1, 1]} : vector<2x32xf32> to vector<2x16xf32>
    %c1_70 = arith.constant 1 : index
    %c0_71 = arith.constant 0 : index
    %c0_72 = arith.constant 0 : index
    %261 = vector.load %arg5[%c1_70, %c0_71, %c0_72] : memref<8x2x16xf32, #tpu.memory_space<vmem>>, vector<1x2x16xf32>
    %262 = vector.shape_cast %261 : vector<1x2x16xf32> to vector<2x16xf32>
    %263 = vector.shape_cast %260 : vector<2x16xf32> to vector<1x2x16xf32>
    tpu.vector_store %arg5[%c1_70, %c0_71, %c0_72], %263 {strides = array<i32>} : memref<8x2x16xf32, #tpu.memory_space<vmem>>, vector<1x2x16xf32>,
    %cst_73 = arith.constant dense<0.000000e+00> : vector<2x96xf32>
    %264 = tpu.matmul %255, %10, %cst_73 {dimension_numbers = #tpu.dot_dimension_numbers<[1], [0], [0], [1], [0, 0, 1, 1], [], []>} : vector<2x32xf32>, vector<32x96xf32>, vector<2x96xf32> -> vector<2x96xf32>
    %265 = vector.extract_strided_slice %25 {offsets = [7, 0, 0], sizes = [1, 2, 96], strides = [1, 1, 1]} : vector<8x2x96xf32> to vector<1x2x96xf32>
    %266 = vector.shape_cast %265 : vector<1x2x96xf32> to vector<2x96xf32>
    %267 = vector.extract_strided_slice %266 {offsets = [0, 0], sizes = [2, 64], strides = [1, 1]} : vector<2x96xf32> to vector<2x64xf32>
    %268 = vector.extract_strided_slice %264 {offsets = [0, 0], sizes = [2, 64], strides = [1, 1]} : vector<2x96xf32> to vector<2x64xf32>
    %269 = arith.addf %267, %268 : vector<2x64xf32>
    %270 = arith.negf %269 : vector<2x64xf32>
    %271 = math.exp %270 : vector<2x64xf32>
    %cst_74 = arith.constant 1.000000e+00 : f32
    %272 = vector.broadcast %cst_74 : f32 to vector<2x64xf32>
    %273 = arith.addf %272, %271 : vector<2x64xf32>
    %274 = arith.divf %272, %273 : vector<2x64xf32>
    %275 = vector.extract_strided_slice %274 {offsets = [0, 0], sizes = [2, 32], strides = [1, 1]} : vector<2x64xf32> to vector<2x32xf32>
    %276 = vector.extract_strided_slice %274 {offsets = [0, 32], sizes = [2, 32], strides = [1, 1]} : vector<2x64xf32> to vector<2x32xf32>
    %277 = vector.extract_strided_slice %266 {offsets = [0, 64], sizes = [2, 32], strides = [1, 1]} : vector<2x96xf32> to vector<2x32xf32>
    %278 = vector.extract_strided_slice %264 {offsets = [0, 64], sizes = [2, 32], strides = [1, 1]} : vector<2x96xf32> to vector<2x32xf32>
    %279 = vector.broadcast %2 : vector<1x32xf32> to vector<2x32xf32>
    %280 = arith.addf %278, %279 : vector<2x32xf32>
    %281 = arith.mulf %275, %280 : vector<2x32xf32>
    %282 = arith.addf %277, %281 : vector<2x32xf32>
    %283 = math.tanh %282 : vector<2x32xf32>
    %cst_75 = arith.constant 1.000000e+00 : f32
    %284 = vector.broadcast %cst_75 : f32 to vector<2x32xf32>
    %285 = arith.subf %284, %276 : vector<2x32xf32>
    %286 = arith.mulf %285, %283 : vector<2x32xf32>
    %287 = arith.mulf %276, %255 : vector<2x32xf32>
    %288 = arith.addf %286, %287 : vector<2x32xf32>
    %289 = vector.extract_strided_slice %288 {offsets = [0, 0], sizes = [2, 16], strides = [1, 1]} : vector<2x32xf32> to vector<2x16xf32>
    %c7_76 = arith.constant 7 : index
    %c0_77 = arith.constant 0 : index
    %c0_78 = arith.constant 0 : index
    %290 = vector.load %arg4[%c7_76, %c0_77, %c0_78] : memref<8x2x16xf32, #tpu.memory_space<vmem>>, vector<1x2x16xf32>
    %291 = vector.shape_cast %290 : vector<1x2x16xf32> to vector<2x16xf32>
    %292 = vector.shape_cast %289 : vector<2x16xf32> to vector<1x2x16xf32>
    tpu.vector_store %arg4[%c7_76, %c0_77, %c0_78], %292 {strides = array<i32>} : memref<8x2x16xf32, #tpu.memory_space<vmem>>, vector<1x2x16xf32>,
    %293 = vector.extract_strided_slice %288 {offsets = [0, 16], sizes = [2, 16], strides = [1, 1]} : vector<2x32xf32> to vector<2x16xf32>
    %c0_79 = arith.constant 0 : index
    %c0_80 = arith.constant 0 : index
    %c0_81 = arith.constant 0 : index
    %294 = vector.load %arg5[%c0_79, %c0_80, %c0_81] : memref<8x2x16xf32, #tpu.memory_space<vmem>>, vector<1x2x16xf32>
    %295 = vector.shape_cast %294 : vector<1x2x16xf32> to vector<2x16xf32>
    %296 = vector.shape_cast %293 : vector<2x16xf32> to vector<1x2x16xf32>
    tpu.vector_store %arg5[%c0_79, %c0_80, %c0_81], %296 {strides = array<i32>} : memref<8x2x16xf32, #tpu.memory_space<vmem>>, vector<1x2x16xf32>,
    %c0_82 = arith.constant 0 : index
    %c0_83 = arith.constant 0 : index
    %c0_84 = arith.constant 0 : index
    %297 = vector.load %arg4[%c0_82, %c0_83, %c0_84] : memref<8x2x16xf32, #tpu.memory_space<vmem>>, vector<8x2x16xf32>
    %c0_85 = arith.constant 0 : index
    %c0_86 = arith.constant 0 : index
    %c0_87 = arith.constant 0 : index
    %298 = vector.load %arg5[%c0_85, %c0_86, %c0_87] : memref<8x2x16xf32, #tpu.memory_space<vmem>>, vector<8x2x16xf32>
    %299 = tpu.concatenate %297, %298 in 2 : vector<8x2x16xf32>, vector<8x2x16xf32> -> vector<8x2x32xf32>
    %300 = tpu.transpose %299, [1, 0, 2] : vector<8x2x32xf32> -> vector<2x8x32xf32>
    %301 = vector.shape_cast %300 : vector<2x8x32xf32> to vector<16x32xf32>
    %cst_88 = arith.constant dense<0.000000e+00> : vector<16x32xf32>
    %302 = tpu.matmul %301, %17, %cst_88 {dimension_numbers = #tpu.dot_dimension_numbers<[1], [0], [0], [1], [0, 0, 1, 1], [], []>} : vector<16x32xf32>, vector<32x32xf32>, vector<16x32xf32> -> vector<16x32xf32>
    %303 = vector.broadcast %5 : vector<1x32xf32> to vector<16x32xf32>
    %304 = arith.addf %302, %303 : vector<16x32xf32>
    %305 = vector.shape_cast %304 : vector<16x32xf32> to vector<2x8x32xf32>
    %cst_89 = arith.constant 0.000000e+00 : f32
    %306 = vector.broadcast %cst_89 : f32 to vector<8x2x64xf32>
    %c0_90 = arith.constant 0 : index
    %c0_91 = arith.constant 0 : index
    %c0_92 = arith.constant 0 : index
    %307 = vector.load %arg6[%c0_90, %c0_91, %c0_92] : memref<8x2x64xf32, #tpu.memory_space<vmem>>, vector<8x2x64xf32>
    tpu.vector_store %arg6[%c0_90, %c0_91, %c0_92], %306 {strides = array<i32>} : memref<8x2x64xf32, #tpu.memory_space<vmem>>, vector<8x2x64xf32>,
    %cst_93 = arith.constant dense<0.000000e+00> : vector<2x128xf32>
    %308 = tpu.matmul %288, %15, %cst_93 {dimension_numbers = #tpu.dot_dimension_numbers<[1], [0], [0], [1], [0, 0, 1, 1], [], []>} : vector<2x32xf32>, vector<32x128xf32>, vector<2x128xf32> -> vector<2x128xf32>
    %309 = vector.extract_strided_slice %308 {offsets = [0, 0], sizes = [2, 32], strides = [1, 1]} : vector<2x128xf32> to vector<2x32xf32>
    %310 = vector.extract_strided_slice %308 {offsets = [0, 32], sizes = [2, 96], strides = [1, 1]} : vector<2x128xf32> to vector<2x96xf32>
    %311 = vector.shape_cast %309 : vector<2x32xf32> to vector<2x1x32xf32>
    %312 = vector.broadcast %311 : vector<2x1x32xf32> to vector<2x8x32xf32>
    %313 = arith.addf %305, %312 : vector<2x8x32xf32>
    %314 = math.tanh %313 : vector<2x8x32xf32>
    %315 = vector.shape_cast %314 : vector<2x8x32xf32> to vector<16x32xf32>
    %cst_94 = arith.constant dense<0.000000e+00> : vector<16x128xf32>
    %316 = tpu.matmul %315, %18, %cst_94 {dimension_numbers = #tpu.dot_dimension_numbers<[1], [0], [0], [1], [0, 0, 1, 1], [], []>} : vector<16x32xf32>, vector<32x128xf32>, vector<16x128xf32> -> vector<16x128xf32>
    %317 = vector.extract_strided_slice %316 {offsets = [0, 0], sizes = [16, 1], strides = [1, 1]} : vector<16x128xf32> to vector<16x1xf32>
    %318 = vector.shape_cast %317 : vector<16x1xf32> to vector<2x8x1xf32>
    %cst_95 = arith.constant dense<0xFF800000> : vector<2x1xf32>
    %319 = vector.multi_reduction <maximumf>, %318, %cst_95 [1] : vector<2x8x1xf32> to vector<2x1xf32>
    %320 = vector.shape_cast %319 : vector<2x1xf32> to vector<2x1x1xf32>
    %321 = vector.broadcast %320 : vector<2x1x1xf32> to vector<2x8x1xf32>
    %322 = arith.subf %318, %321 : vector<2x8x1xf32>
    %323 = math.exp %322 : vector<2x8x1xf32>
    %cst_96 = arith.constant dense<0.000000e+00> : vector<2x1xf32>
    %324 = vector.multi_reduction <add>, %323, %cst_96 [1] : vector<2x8x1xf32> to vector<2x1xf32>
    %325 = vector.shape_cast %324 : vector<2x1xf32> to vector<2x1x1xf32>
    %326 = tpu.reciprocal %325 {approx = true} : vector<2x1x1xf32> -> vector<2x1x1xf32>
    %327 = vector.broadcast %326 : vector<2x1x1xf32> to vector<2x8x1xf32>
    %328 = arith.mulf %323, %327 : vector<2x8x1xf32>
    %329 = vector.broadcast %328 : vector<2x8x1xf32> to vector<2x8x32xf32>
    %330 = arith.mulf %329, %300 : vector<2x8x32xf32>
    %cst_97 = arith.constant dense<0.000000e+00> : vector<2x32xf32>
    %331 = vector.multi_reduction <add>, %330, %cst_97 [1] : vector<2x8x32xf32> to vector<2x32xf32>
    %332 = vector.extract_strided_slice %31 {offsets = [0, 0, 0], sizes = [1, 2, 96], strides = [1, 1, 1]} : vector<8x2x96xf32> to vector<1x2x96xf32>
    %333 = vector.shape_cast %332 : vector<1x2x96xf32> to vector<2x96xf32>
    %cst_98 = arith.constant dense<0.000000e+00> : vector<2x96xf32>
    %334 = tpu.matmul %331, %14, %cst_98 {dimension_numbers = #tpu.dot_dimension_numbers<[1], [0], [0], [1], [0, 0, 1, 1], [], []>} : vector<2x32xf32>, vector<32x96xf32>, vector<2x96xf32> -> vector<2x96xf32>
    %335 = arith.addf %333, %334 : vector<2x96xf32>
    %336 = vector.extract_strided_slice %335 {offsets = [0, 0], sizes = [2, 64], strides = [1, 1]} : vector<2x96xf32> to vector<2x64xf32>
    %337 = vector.extract_strided_slice %310 {offsets = [0, 0], sizes = [2, 64], strides = [1, 1]} : vector<2x96xf32> to vector<2x64xf32>
    %338 = arith.addf %336, %337 : vector<2x64xf32>
    %339 = arith.negf %338 : vector<2x64xf32>
    %340 = math.exp %339 : vector<2x64xf32>
    %cst_99 = arith.constant 1.000000e+00 : f32
    %341 = vector.broadcast %cst_99 : f32 to vector<2x64xf32>
    %342 = arith.addf %341, %340 : vector<2x64xf32>
    %343 = arith.divf %341, %342 : vector<2x64xf32>
    %344 = vector.extract_strided_slice %343 {offsets = [0, 0], sizes = [2, 32], strides = [1, 1]} : vector<2x64xf32> to vector<2x32xf32>
    %345 = vector.extract_strided_slice %343 {offsets = [0, 32], sizes = [2, 32], strides = [1, 1]} : vector<2x64xf32> to vector<2x32xf32>
    %346 = vector.extract_strided_slice %335 {offsets = [0, 64], sizes = [2, 32], strides = [1, 1]} : vector<2x96xf32> to vector<2x32xf32>
    %347 = vector.extract_strided_slice %310 {offsets = [0, 64], sizes = [2, 32], strides = [1, 1]} : vector<2x96xf32> to vector<2x32xf32>
    %348 = vector.broadcast %4 : vector<1x32xf32> to vector<2x32xf32>
    %349 = arith.addf %347, %348 : vector<2x32xf32>
    %350 = arith.mulf %344, %349 : vector<2x32xf32>
    %351 = arith.addf %346, %350 : vector<2x32xf32>
    %352 = math.tanh %351 : vector<2x32xf32>
    %cst_100 = arith.constant 1.000000e+00 : f32
    %353 = vector.broadcast %cst_100 : f32 to vector<2x32xf32>
    %354 = arith.subf %353, %345 : vector<2x32xf32>
    %355 = arith.mulf %354, %352 : vector<2x32xf32>
    %356 = arith.mulf %345, %288 : vector<2x32xf32>
    %357 = arith.addf %355, %356 : vector<2x32xf32>
    %358 = tpu.concatenate %357, %331 in 1 : vector<2x32xf32>, vector<2x32xf32> -> vector<2x64xf32>
    %c0_101 = arith.constant 0 : index
    %c0_102 = arith.constant 0 : index
    %c0_103 = arith.constant 0 : index
    %359 = vector.load %arg6[%c0_101, %c0_102, %c0_103] : memref<8x2x64xf32, #tpu.memory_space<vmem>>, vector<1x2x64xf32>
    %360 = vector.shape_cast %359 : vector<1x2x64xf32> to vector<2x64xf32>
    %361 = vector.shape_cast %358 : vector<2x64xf32> to vector<1x2x64xf32>
    tpu.vector_store %arg6[%c0_101, %c0_102, %c0_103], %361 {strides = array<i32>} : memref<8x2x64xf32, #tpu.memory_space<vmem>>, vector<1x2x64xf32>,
    %cst_104 = arith.constant dense<0.000000e+00> : vector<2x128xf32>
    %362 = tpu.matmul %357, %15, %cst_104 {dimension_numbers = #tpu.dot_dimension_numbers<[1], [0], [0], [1], [0, 0, 1, 1], [], []>} : vector<2x32xf32>, vector<32x128xf32>, vector<2x128xf32> -> vector<2x128xf32>
    %363 = vector.extract_strided_slice %362 {offsets = [0, 0], sizes = [2, 32], strides = [1, 1]} : vector<2x128xf32> to vector<2x32xf32>
    %364 = vector.extract_strided_slice %362 {offsets = [0, 32], sizes = [2, 96], strides = [1, 1]} : vector<2x128xf32> to vector<2x96xf32>
    %365 = vector.shape_cast %363 : vector<2x32xf32> to vector<2x1x32xf32>
    %366 = vector.broadcast %365 : vector<2x1x32xf32> to vector<2x8x32xf32>
    %367 = arith.addf %305, %366 : vector<2x8x32xf32>
    %368 = math.tanh %367 : vector<2x8x32xf32>
    %369 = vector.shape_cast %368 : vector<2x8x32xf32> to vector<16x32xf32>
    %cst_105 = arith.constant dense<0.000000e+00> : vector<16x128xf32>
    %370 = tpu.matmul %369, %18, %cst_105 {dimension_numbers = #tpu.dot_dimension_numbers<[1], [0], [0], [1], [0, 0, 1, 1], [], []>} : vector<16x32xf32>, vector<32x128xf32>, vector<16x128xf32> -> vector<16x128xf32>
    %371 = vector.extract_strided_slice %370 {offsets = [0, 0], sizes = [16, 1], strides = [1, 1]} : vector<16x128xf32> to vector<16x1xf32>
    %372 = vector.shape_cast %371 : vector<16x1xf32> to vector<2x8x1xf32>
    %cst_106 = arith.constant dense<0xFF800000> : vector<2x1xf32>
    %373 = vector.multi_reduction <maximumf>, %372, %cst_106 [1] : vector<2x8x1xf32> to vector<2x1xf32>
    %374 = vector.shape_cast %373 : vector<2x1xf32> to vector<2x1x1xf32>
    %375 = vector.broadcast %374 : vector<2x1x1xf32> to vector<2x8x1xf32>
    %376 = arith.subf %372, %375 : vector<2x8x1xf32>
    %377 = math.exp %376 : vector<2x8x1xf32>
    %cst_107 = arith.constant dense<0.000000e+00> : vector<2x1xf32>
    %378 = vector.multi_reduction <add>, %377, %cst_107 [1] : vector<2x8x1xf32> to vector<2x1xf32>
    %379 = vector.shape_cast %378 : vector<2x1xf32> to vector<2x1x1xf32>
    %380 = tpu.reciprocal %379 {approx = true} : vector<2x1x1xf32> -> vector<2x1x1xf32>
    %381 = vector.broadcast %380 : vector<2x1x1xf32> to vector<2x8x1xf32>
    %382 = arith.mulf %377, %381 : vector<2x8x1xf32>
    %383 = vector.broadcast %382 : vector<2x8x1xf32> to vector<2x8x32xf32>
    %384 = arith.mulf %383, %300 : vector<2x8x32xf32>
    %cst_108 = arith.constant dense<0.000000e+00> : vector<2x32xf32>
    %385 = vector.multi_reduction <add>, %384, %cst_108 [1] : vector<2x8x32xf32> to vector<2x32xf32>
    %386 = vector.extract_strided_slice %31 {offsets = [1, 0, 0], sizes = [1, 2, 96], strides = [1, 1, 1]} : vector<8x2x96xf32> to vector<1x2x96xf32>
    %387 = vector.shape_cast %386 : vector<1x2x96xf32> to vector<2x96xf32>
    %cst_109 = arith.constant dense<0.000000e+00> : vector<2x96xf32>
    %388 = tpu.matmul %385, %14, %cst_109 {dimension_numbers = #tpu.dot_dimension_numbers<[1], [0], [0], [1], [0, 0, 1, 1], [], []>} : vector<2x32xf32>, vector<32x96xf32>, vector<2x96xf32> -> vector<2x96xf32>
    %389 = arith.addf %387, %388 : vector<2x96xf32>
    %390 = vector.extract_strided_slice %389 {offsets = [0, 0], sizes = [2, 64], strides = [1, 1]} : vector<2x96xf32> to vector<2x64xf32>
    %391 = vector.extract_strided_slice %364 {offsets = [0, 0], sizes = [2, 64], strides = [1, 1]} : vector<2x96xf32> to vector<2x64xf32>
    %392 = arith.addf %390, %391 : vector<2x64xf32>
    %393 = arith.negf %392 : vector<2x64xf32>
    %394 = math.exp %393 : vector<2x64xf32>
    %cst_110 = arith.constant 1.000000e+00 : f32
    %395 = vector.broadcast %cst_110 : f32 to vector<2x64xf32>
    %396 = arith.addf %395, %394 : vector<2x64xf32>
    %397 = arith.divf %395, %396 : vector<2x64xf32>
    %398 = vector.extract_strided_slice %397 {offsets = [0, 0], sizes = [2, 32], strides = [1, 1]} : vector<2x64xf32> to vector<2x32xf32>
    %399 = vector.extract_strided_slice %397 {offsets = [0, 32], sizes = [2, 32], strides = [1, 1]} : vector<2x64xf32> to vector<2x32xf32>
    %400 = vector.extract_strided_slice %389 {offsets = [0, 64], sizes = [2, 32], strides = [1, 1]} : vector<2x96xf32> to vector<2x32xf32>
    %401 = vector.extract_strided_slice %364 {offsets = [0, 64], sizes = [2, 32], strides = [1, 1]} : vector<2x96xf32> to vector<2x32xf32>
    %402 = vector.broadcast %4 : vector<1x32xf32> to vector<2x32xf32>
    %403 = arith.addf %401, %402 : vector<2x32xf32>
    %404 = arith.mulf %398, %403 : vector<2x32xf32>
    %405 = arith.addf %400, %404 : vector<2x32xf32>
    %406 = math.tanh %405 : vector<2x32xf32>
    %cst_111 = arith.constant 1.000000e+00 : f32
    %407 = vector.broadcast %cst_111 : f32 to vector<2x32xf32>
    %408 = arith.subf %407, %399 : vector<2x32xf32>
    %409 = arith.mulf %408, %406 : vector<2x32xf32>
    %410 = arith.mulf %399, %357 : vector<2x32xf32>
    %411 = arith.addf %409, %410 : vector<2x32xf32>
    %412 = tpu.concatenate %411, %385 in 1 : vector<2x32xf32>, vector<2x32xf32> -> vector<2x64xf32>
    %c1_112 = arith.constant 1 : index
    %c0_113 = arith.constant 0 : index
    %c0_114 = arith.constant 0 : index
    %413 = vector.load %arg6[%c1_112, %c0_113, %c0_114] : memref<8x2x64xf32, #tpu.memory_space<vmem>>, vector<1x2x64xf32>
    %414 = vector.shape_cast %413 : vector<1x2x64xf32> to vector<2x64xf32>
    %415 = vector.shape_cast %412 : vector<2x64xf32> to vector<1x2x64xf32>
    tpu.vector_store %arg6[%c1_112, %c0_113, %c0_114], %415 {strides = array<i32>} : memref<8x2x64xf32, #tpu.memory_space<vmem>>, vector<1x2x64xf32>,
    %cst_115 = arith.constant dense<0.000000e+00> : vector<2x128xf32>
    %416 = tpu.matmul %411, %15, %cst_115 {dimension_numbers = #tpu.dot_dimension_numbers<[1], [0], [0], [1], [0, 0, 1, 1], [], []>} : vector<2x32xf32>, vector<32x128xf32>, vector<2x128xf32> -> vector<2x128xf32>
    %417 = vector.extract_strided_slice %416 {offsets = [0, 0], sizes = [2, 32], strides = [1, 1]} : vector<2x128xf32> to vector<2x32xf32>
    %418 = vector.extract_strided_slice %416 {offsets = [0, 32], sizes = [2, 96], strides = [1, 1]} : vector<2x128xf32> to vector<2x96xf32>
    %419 = vector.shape_cast %417 : vector<2x32xf32> to vector<2x1x32xf32>
    %420 = vector.broadcast %419 : vector<2x1x32xf32> to vector<2x8x32xf32>
    %421 = arith.addf %305, %420 : vector<2x8x32xf32>
    %422 = math.tanh %421 : vector<2x8x32xf32>
    %423 = vector.shape_cast %422 : vector<2x8x32xf32> to vector<16x32xf32>
    %cst_116 = arith.constant dense<0.000000e+00> : vector<16x128xf32>
    %424 = tpu.matmul %423, %18, %cst_116 {dimension_numbers = #tpu.dot_dimension_numbers<[1], [0], [0], [1], [0, 0, 1, 1], [], []>} : vector<16x32xf32>, vector<32x128xf32>, vector<16x128xf32> -> vector<16x128xf32>
    %425 = vector.extract_strided_slice %424 {offsets = [0, 0], sizes = [16, 1], strides = [1, 1]} : vector<16x128xf32> to vector<16x1xf32>
    %426 = vector.shape_cast %425 : vector<16x1xf32> to vector<2x8x1xf32>
    %cst_117 = arith.constant dense<0xFF800000> : vector<2x1xf32>
    %427 = vector.multi_reduction <maximumf>, %426, %cst_117 [1] : vector<2x8x1xf32> to vector<2x1xf32>
    %428 = vector.shape_cast %427 : vector<2x1xf32> to vector<2x1x1xf32>
    %429 = vector.broadcast %428 : vector<2x1x1xf32> to vector<2x8x1xf32>
    %430 = arith.subf %426, %429 : vector<2x8x1xf32>
    %431 = math.exp %430 : vector<2x8x1xf32>
    %cst_118 = arith.constant dense<0.000000e+00> : vector<2x1xf32>
    %432 = vector.multi_reduction <add>, %431, %cst_118 [1] : vector<2x8x1xf32> to vector<2x1xf32>
    %433 = vector.shape_cast %432 : vector<2x1xf32> to vector<2x1x1xf32>
    %434 = tpu.reciprocal %433 {approx = true} : vector<2x1x1xf32> -> vector<2x1x1xf32>
    %435 = vector.broadcast %434 : vector<2x1x1xf32> to vector<2x8x1xf32>
    %436 = arith.mulf %431, %435 : vector<2x8x1xf32>
    %437 = vector.broadcast %436 : vector<2x8x1xf32> to vector<2x8x32xf32>
    %438 = arith.mulf %437, %300 : vector<2x8x32xf32>
    %cst_119 = arith.constant dense<0.000000e+00> : vector<2x32xf32>
    %439 = vector.multi_reduction <add>, %438, %cst_119 [1] : vector<2x8x32xf32> to vector<2x32xf32>
    %440 = vector.extract_strided_slice %31 {offsets = [2, 0, 0], sizes = [1, 2, 96], strides = [1, 1, 1]} : vector<8x2x96xf32> to vector<1x2x96xf32>
    %441 = vector.shape_cast %440 : vector<1x2x96xf32> to vector<2x96xf32>
    %cst_120 = arith.constant dense<0.000000e+00> : vector<2x96xf32>
    %442 = tpu.matmul %439, %14, %cst_120 {dimension_numbers = #tpu.dot_dimension_numbers<[1], [0], [0], [1], [0, 0, 1, 1], [], []>} : vector<2x32xf32>, vector<32x96xf32>, vector<2x96xf32> -> vector<2x96xf32>
    %443 = arith.addf %441, %442 : vector<2x96xf32>
    %444 = vector.extract_strided_slice %443 {offsets = [0, 0], sizes = [2, 64], strides = [1, 1]} : vector<2x96xf32> to vector<2x64xf32>
    %445 = vector.extract_strided_slice %418 {offsets = [0, 0], sizes = [2, 64], strides = [1, 1]} : vector<2x96xf32> to vector<2x64xf32>
    %446 = arith.addf %444, %445 : vector<2x64xf32>
    %447 = arith.negf %446 : vector<2x64xf32>
    %448 = math.exp %447 : vector<2x64xf32>
    %cst_121 = arith.constant 1.000000e+00 : f32
    %449 = vector.broadcast %cst_121 : f32 to vector<2x64xf32>
    %450 = arith.addf %449, %448 : vector<2x64xf32>
    %451 = arith.divf %449, %450 : vector<2x64xf32>
    %452 = vector.extract_strided_slice %451 {offsets = [0, 0], sizes = [2, 32], strides = [1, 1]} : vector<2x64xf32> to vector<2x32xf32>
    %453 = vector.extract_strided_slice %451 {offsets = [0, 32], sizes = [2, 32], strides = [1, 1]} : vector<2x64xf32> to vector<2x32xf32>
    %454 = vector.extract_strided_slice %443 {offsets = [0, 64], sizes = [2, 32], strides = [1, 1]} : vector<2x96xf32> to vector<2x32xf32>
    %455 = vector.extract_strided_slice %418 {offsets = [0, 64], sizes = [2, 32], strides = [1, 1]} : vector<2x96xf32> to vector<2x32xf32>
    %456 = vector.broadcast %4 : vector<1x32xf32> to vector<2x32xf32>
    %457 = arith.addf %455, %456 : vector<2x32xf32>
    %458 = arith.mulf %452, %457 : vector<2x32xf32>
    %459 = arith.addf %454, %458 : vector<2x32xf32>
    %460 = math.tanh %459 : vector<2x32xf32>
    %cst_122 = arith.constant 1.000000e+00 : f32
    %461 = vector.broadcast %cst_122 : f32 to vector<2x32xf32>
    %462 = arith.subf %461, %453 : vector<2x32xf32>
    %463 = arith.mulf %462, %460 : vector<2x32xf32>
    %464 = arith.mulf %453, %411 : vector<2x32xf32>
    %465 = arith.addf %463, %464 : vector<2x32xf32>
    %466 = tpu.concatenate %465, %439 in 1 : vector<2x32xf32>, vector<2x32xf32> -> vector<2x64xf32>
    %c2_123 = arith.constant 2 : index
    %c0_124 = arith.constant 0 : index
    %c0_125 = arith.constant 0 : index
    %467 = vector.load %arg6[%c2_123, %c0_124, %c0_125] : memref<8x2x64xf32, #tpu.memory_space<vmem>>, vector<1x2x64xf32>
    %468 = vector.shape_cast %467 : vector<1x2x64xf32> to vector<2x64xf32>
    %469 = vector.shape_cast %466 : vector<2x64xf32> to vector<1x2x64xf32>
    tpu.vector_store %arg6[%c2_123, %c0_124, %c0_125], %469 {strides = array<i32>} : memref<8x2x64xf32, #tpu.memory_space<vmem>>, vector<1x2x64xf32>,
    %cst_126 = arith.constant dense<0.000000e+00> : vector<2x128xf32>
    %470 = tpu.matmul %465, %15, %cst_126 {dimension_numbers = #tpu.dot_dimension_numbers<[1], [0], [0], [1], [0, 0, 1, 1], [], []>} : vector<2x32xf32>, vector<32x128xf32>, vector<2x128xf32> -> vector<2x128xf32>
    %471 = vector.extract_strided_slice %470 {offsets = [0, 0], sizes = [2, 32], strides = [1, 1]} : vector<2x128xf32> to vector<2x32xf32>
    %472 = vector.extract_strided_slice %470 {offsets = [0, 32], sizes = [2, 96], strides = [1, 1]} : vector<2x128xf32> to vector<2x96xf32>
    %473 = vector.shape_cast %471 : vector<2x32xf32> to vector<2x1x32xf32>
    %474 = vector.broadcast %473 : vector<2x1x32xf32> to vector<2x8x32xf32>
    %475 = arith.addf %305, %474 : vector<2x8x32xf32>
    %476 = math.tanh %475 : vector<2x8x32xf32>
    %477 = vector.shape_cast %476 : vector<2x8x32xf32> to vector<16x32xf32>
    %cst_127 = arith.constant dense<0.000000e+00> : vector<16x128xf32>
    %478 = tpu.matmul %477, %18, %cst_127 {dimension_numbers = #tpu.dot_dimension_numbers<[1], [0], [0], [1], [0, 0, 1, 1], [], []>} : vector<16x32xf32>, vector<32x128xf32>, vector<16x128xf32> -> vector<16x128xf32>
    %479 = vector.extract_strided_slice %478 {offsets = [0, 0], sizes = [16, 1], strides = [1, 1]} : vector<16x128xf32> to vector<16x1xf32>
    %480 = vector.shape_cast %479 : vector<16x1xf32> to vector<2x8x1xf32>
    %cst_128 = arith.constant dense<0xFF800000> : vector<2x1xf32>
    %481 = vector.multi_reduction <maximumf>, %480, %cst_128 [1] : vector<2x8x1xf32> to vector<2x1xf32>
    %482 = vector.shape_cast %481 : vector<2x1xf32> to vector<2x1x1xf32>
    %483 = vector.broadcast %482 : vector<2x1x1xf32> to vector<2x8x1xf32>
    %484 = arith.subf %480, %483 : vector<2x8x1xf32>
    %485 = math.exp %484 : vector<2x8x1xf32>
    %cst_129 = arith.constant dense<0.000000e+00> : vector<2x1xf32>
    %486 = vector.multi_reduction <add>, %485, %cst_129 [1] : vector<2x8x1xf32> to vector<2x1xf32>
    %487 = vector.shape_cast %486 : vector<2x1xf32> to vector<2x1x1xf32>
    %488 = tpu.reciprocal %487 {approx = true} : vector<2x1x1xf32> -> vector<2x1x1xf32>
    %489 = vector.broadcast %488 : vector<2x1x1xf32> to vector<2x8x1xf32>
    %490 = arith.mulf %485, %489 : vector<2x8x1xf32>
    %491 = vector.broadcast %490 : vector<2x8x1xf32> to vector<2x8x32xf32>
    %492 = arith.mulf %491, %300 : vector<2x8x32xf32>
    %cst_130 = arith.constant dense<0.000000e+00> : vector<2x32xf32>
    %493 = vector.multi_reduction <add>, %492, %cst_130 [1] : vector<2x8x32xf32> to vector<2x32xf32>
    %494 = vector.extract_strided_slice %31 {offsets = [3, 0, 0], sizes = [1, 2, 96], strides = [1, 1, 1]} : vector<8x2x96xf32> to vector<1x2x96xf32>
    %495 = vector.shape_cast %494 : vector<1x2x96xf32> to vector<2x96xf32>
    %cst_131 = arith.constant dense<0.000000e+00> : vector<2x96xf32>
    %496 = tpu.matmul %493, %14, %cst_131 {dimension_numbers = #tpu.dot_dimension_numbers<[1], [0], [0], [1], [0, 0, 1, 1], [], []>} : vector<2x32xf32>, vector<32x96xf32>, vector<2x96xf32> -> vector<2x96xf32>
    %497 = arith.addf %495, %496 : vector<2x96xf32>
    %498 = vector.extract_strided_slice %497 {offsets = [0, 0], sizes = [2, 64], strides = [1, 1]} : vector<2x96xf32> to vector<2x64xf32>
    %499 = vector.extract_strided_slice %472 {offsets = [0, 0], sizes = [2, 64], strides = [1, 1]} : vector<2x96xf32> to vector<2x64xf32>
    %500 = arith.addf %498, %499 : vector<2x64xf32>
    %501 = arith.negf %500 : vector<2x64xf32>
    %502 = math.exp %501 : vector<2x64xf32>
    %cst_132 = arith.constant 1.000000e+00 : f32
    %503 = vector.broadcast %cst_132 : f32 to vector<2x64xf32>
    %504 = arith.addf %503, %502 : vector<2x64xf32>
    %505 = arith.divf %503, %504 : vector<2x64xf32>
    %506 = vector.extract_strided_slice %505 {offsets = [0, 0], sizes = [2, 32], strides = [1, 1]} : vector<2x64xf32> to vector<2x32xf32>
    %507 = vector.extract_strided_slice %505 {offsets = [0, 32], sizes = [2, 32], strides = [1, 1]} : vector<2x64xf32> to vector<2x32xf32>
    %508 = vector.extract_strided_slice %497 {offsets = [0, 64], sizes = [2, 32], strides = [1, 1]} : vector<2x96xf32> to vector<2x32xf32>
    %509 = vector.extract_strided_slice %472 {offsets = [0, 64], sizes = [2, 32], strides = [1, 1]} : vector<2x96xf32> to vector<2x32xf32>
    %510 = vector.broadcast %4 : vector<1x32xf32> to vector<2x32xf32>
    %511 = arith.addf %509, %510 : vector<2x32xf32>
    %512 = arith.mulf %506, %511 : vector<2x32xf32>
    %513 = arith.addf %508, %512 : vector<2x32xf32>
    %514 = math.tanh %513 : vector<2x32xf32>
    %cst_133 = arith.constant 1.000000e+00 : f32
    %515 = vector.broadcast %cst_133 : f32 to vector<2x32xf32>
    %516 = arith.subf %515, %507 : vector<2x32xf32>
    %517 = arith.mulf %516, %514 : vector<2x32xf32>
    %518 = arith.mulf %507, %465 : vector<2x32xf32>
    %519 = arith.addf %517, %518 : vector<2x32xf32>
    %520 = tpu.concatenate %519, %493 in 1 : vector<2x32xf32>, vector<2x32xf32> -> vector<2x64xf32>
    %c3_134 = arith.constant 3 : index
    %c0_135 = arith.constant 0 : index
    %c0_136 = arith.constant 0 : index
    %521 = vector.load %arg6[%c3_134, %c0_135, %c0_136] : memref<8x2x64xf32, #tpu.memory_space<vmem>>, vector<1x2x64xf32>
    %522 = vector.shape_cast %521 : vector<1x2x64xf32> to vector<2x64xf32>
    %523 = vector.shape_cast %520 : vector<2x64xf32> to vector<1x2x64xf32>
    tpu.vector_store %arg6[%c3_134, %c0_135, %c0_136], %523 {strides = array<i32>} : memref<8x2x64xf32, #tpu.memory_space<vmem>>, vector<1x2x64xf32>,
    %cst_137 = arith.constant dense<0.000000e+00> : vector<2x128xf32>
    %524 = tpu.matmul %519, %15, %cst_137 {dimension_numbers = #tpu.dot_dimension_numbers<[1], [0], [0], [1], [0, 0, 1, 1], [], []>} : vector<2x32xf32>, vector<32x128xf32>, vector<2x128xf32> -> vector<2x128xf32>
    %525 = vector.extract_strided_slice %524 {offsets = [0, 0], sizes = [2, 32], strides = [1, 1]} : vector<2x128xf32> to vector<2x32xf32>
    %526 = vector.extract_strided_slice %524 {offsets = [0, 32], sizes = [2, 96], strides = [1, 1]} : vector<2x128xf32> to vector<2x96xf32>
    %527 = vector.shape_cast %525 : vector<2x32xf32> to vector<2x1x32xf32>
    %528 = vector.broadcast %527 : vector<2x1x32xf32> to vector<2x8x32xf32>
    %529 = arith.addf %305, %528 : vector<2x8x32xf32>
    %530 = math.tanh %529 : vector<2x8x32xf32>
    %531 = vector.shape_cast %530 : vector<2x8x32xf32> to vector<16x32xf32>
    %cst_138 = arith.constant dense<0.000000e+00> : vector<16x128xf32>
    %532 = tpu.matmul %531, %18, %cst_138 {dimension_numbers = #tpu.dot_dimension_numbers<[1], [0], [0], [1], [0, 0, 1, 1], [], []>} : vector<16x32xf32>, vector<32x128xf32>, vector<16x128xf32> -> vector<16x128xf32>
    %533 = vector.extract_strided_slice %532 {offsets = [0, 0], sizes = [16, 1], strides = [1, 1]} : vector<16x128xf32> to vector<16x1xf32>
    %534 = vector.shape_cast %533 : vector<16x1xf32> to vector<2x8x1xf32>
    %cst_139 = arith.constant dense<0xFF800000> : vector<2x1xf32>
    %535 = vector.multi_reduction <maximumf>, %534, %cst_139 [1] : vector<2x8x1xf32> to vector<2x1xf32>
    %536 = vector.shape_cast %535 : vector<2x1xf32> to vector<2x1x1xf32>
    %537 = vector.broadcast %536 : vector<2x1x1xf32> to vector<2x8x1xf32>
    %538 = arith.subf %534, %537 : vector<2x8x1xf32>
    %539 = math.exp %538 : vector<2x8x1xf32>
    %cst_140 = arith.constant dense<0.000000e+00> : vector<2x1xf32>
    %540 = vector.multi_reduction <add>, %539, %cst_140 [1] : vector<2x8x1xf32> to vector<2x1xf32>
    %541 = vector.shape_cast %540 : vector<2x1xf32> to vector<2x1x1xf32>
    %542 = tpu.reciprocal %541 {approx = true} : vector<2x1x1xf32> -> vector<2x1x1xf32>
    %543 = vector.broadcast %542 : vector<2x1x1xf32> to vector<2x8x1xf32>
    %544 = arith.mulf %539, %543 : vector<2x8x1xf32>
    %545 = vector.broadcast %544 : vector<2x8x1xf32> to vector<2x8x32xf32>
    %546 = arith.mulf %545, %300 : vector<2x8x32xf32>
    %cst_141 = arith.constant dense<0.000000e+00> : vector<2x32xf32>
    %547 = vector.multi_reduction <add>, %546, %cst_141 [1] : vector<2x8x32xf32> to vector<2x32xf32>
    %548 = vector.extract_strided_slice %31 {offsets = [4, 0, 0], sizes = [1, 2, 96], strides = [1, 1, 1]} : vector<8x2x96xf32> to vector<1x2x96xf32>
    %549 = vector.shape_cast %548 : vector<1x2x96xf32> to vector<2x96xf32>
    %cst_142 = arith.constant dense<0.000000e+00> : vector<2x96xf32>
    %550 = tpu.matmul %547, %14, %cst_142 {dimension_numbers = #tpu.dot_dimension_numbers<[1], [0], [0], [1], [0, 0, 1, 1], [], []>} : vector<2x32xf32>, vector<32x96xf32>, vector<2x96xf32> -> vector<2x96xf32>
    %551 = arith.addf %549, %550 : vector<2x96xf32>
    %552 = vector.extract_strided_slice %551 {offsets = [0, 0], sizes = [2, 64], strides = [1, 1]} : vector<2x96xf32> to vector<2x64xf32>
    %553 = vector.extract_strided_slice %526 {offsets = [0, 0], sizes = [2, 64], strides = [1, 1]} : vector<2x96xf32> to vector<2x64xf32>
    %554 = arith.addf %552, %553 : vector<2x64xf32>
    %555 = arith.negf %554 : vector<2x64xf32>
    %556 = math.exp %555 : vector<2x64xf32>
    %cst_143 = arith.constant 1.000000e+00 : f32
    %557 = vector.broadcast %cst_143 : f32 to vector<2x64xf32>
    %558 = arith.addf %557, %556 : vector<2x64xf32>
    %559 = arith.divf %557, %558 : vector<2x64xf32>
    %560 = vector.extract_strided_slice %559 {offsets = [0, 0], sizes = [2, 32], strides = [1, 1]} : vector<2x64xf32> to vector<2x32xf32>
    %561 = vector.extract_strided_slice %559 {offsets = [0, 32], sizes = [2, 32], strides = [1, 1]} : vector<2x64xf32> to vector<2x32xf32>
    %562 = vector.extract_strided_slice %551 {offsets = [0, 64], sizes = [2, 32], strides = [1, 1]} : vector<2x96xf32> to vector<2x32xf32>
    %563 = vector.extract_strided_slice %526 {offsets = [0, 64], sizes = [2, 32], strides = [1, 1]} : vector<2x96xf32> to vector<2x32xf32>
    %564 = vector.broadcast %4 : vector<1x32xf32> to vector<2x32xf32>
    %565 = arith.addf %563, %564 : vector<2x32xf32>
    %566 = arith.mulf %560, %565 : vector<2x32xf32>
    %567 = arith.addf %562, %566 : vector<2x32xf32>
    %568 = math.tanh %567 : vector<2x32xf32>
    %cst_144 = arith.constant 1.000000e+00 : f32
    %569 = vector.broadcast %cst_144 : f32 to vector<2x32xf32>
    %570 = arith.subf %569, %561 : vector<2x32xf32>
    %571 = arith.mulf %570, %568 : vector<2x32xf32>
    %572 = arith.mulf %561, %519 : vector<2x32xf32>
    %573 = arith.addf %571, %572 : vector<2x32xf32>
    %574 = tpu.concatenate %573, %547 in 1 : vector<2x32xf32>, vector<2x32xf32> -> vector<2x64xf32>
    %c4_145 = arith.constant 4 : index
    %c0_146 = arith.constant 0 : index
    %c0_147 = arith.constant 0 : index
    %575 = vector.load %arg6[%c4_145, %c0_146, %c0_147] : memref<8x2x64xf32, #tpu.memory_space<vmem>>, vector<1x2x64xf32>
    %576 = vector.shape_cast %575 : vector<1x2x64xf32> to vector<2x64xf32>
    %577 = vector.shape_cast %574 : vector<2x64xf32> to vector<1x2x64xf32>
    tpu.vector_store %arg6[%c4_145, %c0_146, %c0_147], %577 {strides = array<i32>} : memref<8x2x64xf32, #tpu.memory_space<vmem>>, vector<1x2x64xf32>,
    %cst_148 = arith.constant dense<0.000000e+00> : vector<2x128xf32>
    %578 = tpu.matmul %573, %15, %cst_148 {dimension_numbers = #tpu.dot_dimension_numbers<[1], [0], [0], [1], [0, 0, 1, 1], [], []>} : vector<2x32xf32>, vector<32x128xf32>, vector<2x128xf32> -> vector<2x128xf32>
    %579 = vector.extract_strided_slice %578 {offsets = [0, 0], sizes = [2, 32], strides = [1, 1]} : vector<2x128xf32> to vector<2x32xf32>
    %580 = vector.extract_strided_slice %578 {offsets = [0, 32], sizes = [2, 96], strides = [1, 1]} : vector<2x128xf32> to vector<2x96xf32>
    %581 = vector.shape_cast %579 : vector<2x32xf32> to vector<2x1x32xf32>
    %582 = vector.broadcast %581 : vector<2x1x32xf32> to vector<2x8x32xf32>
    %583 = arith.addf %305, %582 : vector<2x8x32xf32>
    %584 = math.tanh %583 : vector<2x8x32xf32>
    %585 = vector.shape_cast %584 : vector<2x8x32xf32> to vector<16x32xf32>
    %cst_149 = arith.constant dense<0.000000e+00> : vector<16x128xf32>
    %586 = tpu.matmul %585, %18, %cst_149 {dimension_numbers = #tpu.dot_dimension_numbers<[1], [0], [0], [1], [0, 0, 1, 1], [], []>} : vector<16x32xf32>, vector<32x128xf32>, vector<16x128xf32> -> vector<16x128xf32>
    %587 = vector.extract_strided_slice %586 {offsets = [0, 0], sizes = [16, 1], strides = [1, 1]} : vector<16x128xf32> to vector<16x1xf32>
    %588 = vector.shape_cast %587 : vector<16x1xf32> to vector<2x8x1xf32>
    %cst_150 = arith.constant dense<0xFF800000> : vector<2x1xf32>
    %589 = vector.multi_reduction <maximumf>, %588, %cst_150 [1] : vector<2x8x1xf32> to vector<2x1xf32>
    %590 = vector.shape_cast %589 : vector<2x1xf32> to vector<2x1x1xf32>
    %591 = vector.broadcast %590 : vector<2x1x1xf32> to vector<2x8x1xf32>
    %592 = arith.subf %588, %591 : vector<2x8x1xf32>
    %593 = math.exp %592 : vector<2x8x1xf32>
    %cst_151 = arith.constant dense<0.000000e+00> : vector<2x1xf32>
    %594 = vector.multi_reduction <add>, %593, %cst_151 [1] : vector<2x8x1xf32> to vector<2x1xf32>
    %595 = vector.shape_cast %594 : vector<2x1xf32> to vector<2x1x1xf32>
    %596 = tpu.reciprocal %595 {approx = true} : vector<2x1x1xf32> -> vector<2x1x1xf32>
    %597 = vector.broadcast %596 : vector<2x1x1xf32> to vector<2x8x1xf32>
    %598 = arith.mulf %593, %597 : vector<2x8x1xf32>
    %599 = vector.broadcast %598 : vector<2x8x1xf32> to vector<2x8x32xf32>
    %600 = arith.mulf %599, %300 : vector<2x8x32xf32>
    %cst_152 = arith.constant dense<0.000000e+00> : vector<2x32xf32>
    %601 = vector.multi_reduction <add>, %600, %cst_152 [1] : vector<2x8x32xf32> to vector<2x32xf32>
    %602 = vector.extract_strided_slice %31 {offsets = [5, 0, 0], sizes = [1, 2, 96], strides = [1, 1, 1]} : vector<8x2x96xf32> to vector<1x2x96xf32>
    %603 = vector.shape_cast %602 : vector<1x2x96xf32> to vector<2x96xf32>
    %cst_153 = arith.constant dense<0.000000e+00> : vector<2x96xf32>
    %604 = tpu.matmul %601, %14, %cst_153 {dimension_numbers = #tpu.dot_dimension_numbers<[1], [0], [0], [1], [0, 0, 1, 1], [], []>} : vector<2x32xf32>, vector<32x96xf32>, vector<2x96xf32> -> vector<2x96xf32>
    %605 = arith.addf %603, %604 : vector<2x96xf32>
    %606 = vector.extract_strided_slice %605 {offsets = [0, 0], sizes = [2, 64], strides = [1, 1]} : vector<2x96xf32> to vector<2x64xf32>
    %607 = vector.extract_strided_slice %580 {offsets = [0, 0], sizes = [2, 64], strides = [1, 1]} : vector<2x96xf32> to vector<2x64xf32>
    %608 = arith.addf %606, %607 : vector<2x64xf32>
    %609 = arith.negf %608 : vector<2x64xf32>
    %610 = math.exp %609 : vector<2x64xf32>
    %cst_154 = arith.constant 1.000000e+00 : f32
    %611 = vector.broadcast %cst_154 : f32 to vector<2x64xf32>
    %612 = arith.addf %611, %610 : vector<2x64xf32>
    %613 = arith.divf %611, %612 : vector<2x64xf32>
    %614 = vector.extract_strided_slice %613 {offsets = [0, 0], sizes = [2, 32], strides = [1, 1]} : vector<2x64xf32> to vector<2x32xf32>
    %615 = vector.extract_strided_slice %613 {offsets = [0, 32], sizes = [2, 32], strides = [1, 1]} : vector<2x64xf32> to vector<2x32xf32>
    %616 = vector.extract_strided_slice %605 {offsets = [0, 64], sizes = [2, 32], strides = [1, 1]} : vector<2x96xf32> to vector<2x32xf32>
    %617 = vector.extract_strided_slice %580 {offsets = [0, 64], sizes = [2, 32], strides = [1, 1]} : vector<2x96xf32> to vector<2x32xf32>
    %618 = vector.broadcast %4 : vector<1x32xf32> to vector<2x32xf32>
    %619 = arith.addf %617, %618 : vector<2x32xf32>
    %620 = arith.mulf %614, %619 : vector<2x32xf32>
    %621 = arith.addf %616, %620 : vector<2x32xf32>
    %622 = math.tanh %621 : vector<2x32xf32>
    %cst_155 = arith.constant 1.000000e+00 : f32
    %623 = vector.broadcast %cst_155 : f32 to vector<2x32xf32>
    %624 = arith.subf %623, %615 : vector<2x32xf32>
    %625 = arith.mulf %624, %622 : vector<2x32xf32>
    %626 = arith.mulf %615, %573 : vector<2x32xf32>
    %627 = arith.addf %625, %626 : vector<2x32xf32>
    %628 = tpu.concatenate %627, %601 in 1 : vector<2x32xf32>, vector<2x32xf32> -> vector<2x64xf32>
    %c5_156 = arith.constant 5 : index
    %c0_157 = arith.constant 0 : index
    %c0_158 = arith.constant 0 : index
    %629 = vector.load %arg6[%c5_156, %c0_157, %c0_158] : memref<8x2x64xf32, #tpu.memory_space<vmem>>, vector<1x2x64xf32>
    %630 = vector.shape_cast %629 : vector<1x2x64xf32> to vector<2x64xf32>
    %631 = vector.shape_cast %628 : vector<2x64xf32> to vector<1x2x64xf32>
    tpu.vector_store %arg6[%c5_156, %c0_157, %c0_158], %631 {strides = array<i32>} : memref<8x2x64xf32, #tpu.memory_space<vmem>>, vector<1x2x64xf32>,
    %c0_159 = arith.constant 0 : index
    %c0_160 = arith.constant 0 : index
    %c0_161 = arith.constant 0 : index
    %632 = vector.load %arg6[%c0_159, %c0_160, %c0_161] : memref<8x2x64xf32, #tpu.memory_space<vmem>>, vector<8x2x64xf32>
    %633 = vector.shape_cast %632 : vector<8x2x64xf32> to vector<16x64xf32>
    %cst_162 = arith.constant dense<0.000000e+00> : vector<16x128xf32>
    %634 = tpu.matmul %633, %19, %cst_162 {dimension_numbers = #tpu.dot_dimension_numbers<[1], [0], [0], [1], [0, 0, 1, 1], [], []>} : vector<16x64xf32>, vector<64x128xf32>, vector<16x128xf32> -> vector<16x128xf32>
    %635 = vector.broadcast %6 : vector<1x128xf32> to vector<16x128xf32>
    %636 = arith.addf %634, %635 : vector<16x128xf32>
    %637 = vector.shape_cast %636 : vector<16x128xf32> to vector<8x2x128xf32>
    %c0_163 = arith.constant 0 : index
    %c0_164 = arith.constant 0 : index
    %c0_165 = arith.constant 0 : index
    %638 = vector.load %arg3[%c0_163, %c0_164, %c0_165] : memref<8x2x128xf32, #tpu.memory_space<vmem>>, vector<8x2x128xf32>
    tpu.vector_store %arg3[%c0_163, %c0_164, %c0_165], %637 {strides = array<i32>} : memref<8x2x128xf32, #tpu.memory_space<vmem>>, vector<8x2x128xf32>,
    return
  }
}

</mosaic_0001>

<bundles_post_ra>
// kernel: tpu_custom_call.1
= control target key start
LH: loop header
LB: loop body
LE: loop exit
PB: predicated region body
PF: predicated region fallthrough
CT: control target
= control target key end

     0   :  { %8 = vsyncpa [#allocation6], 0  ;;  %s5924_s0 = inlined_call_operand.hbm [shape: f32[8,2,32], index: 0, kind: input, shape index: {}]   ;;  %s5925_s1 = inlined_call_operand.hbm [shape: f32[8,2,16], index: 1, kind: input, shape index: {}]   ;;  %s5926_s2 = inlined_call_operand.hbm [shape: f32[280,128], index: 2, kind: input, shape index: {}]   ;;  %s5927_s3 = inlined_call_operand.hbm [shape: f32[8,2,128], index: 3, kind: output, shape index: {}]  }
   0x1   :  { %9 = vsyncpa [#allocation9], 0 }
   0x2   :  { %10 = vsyncpa [#allocation7], 0  ;;  %s5024_s12 = smov [#allocation8]   ;;  %s5025_s14 = smov [#allocation5]  }
   0x3   :  { %s28_s13 = sshll.u32 %s5024_s12, 4  ;;  %s16_s15 = sshll.u32 %s5025_s14, 4  ;;  %s29_s13 = int_to_ptr.vmem [resolvable:$true] %s28_s13  ;;  %s17_s15 = int_to_ptr.vmem [resolvable:$true] %s16_s15 }
   0x4   :  { %s4946_s16 = scalar_lea.vmem %s29_s13, 256  ;;  %p4951_p1 = scmp.lt.s32.totalorder %s29_s13, %s29_s13 }
   0x5   :  { %p4947_p0 = scmp.ne.s32.totalorder %s29_s13, %s4946_s16  ;;  %p4952_p2 = scmp.lt.s32.totalorder %s4946_s16, %s4946_s16 }
   0x7   :  { %p4953_p3 = por %p4952_p2, %p4951_p1 }
   0x9   :  { %p4954_p4 = pnand %p4953_p3, %p4947_p0 }
   0xb   :  { %4957 = shalt.err (!%p4954_p4)
}
   0xc   :  { %s5026_s17 = smov 32   ;;  %s5027_s18 = smov 2  }
   0xd   :  { %34 = dma.hbm_to_vmem [thread:$0]  %s5925_s1, 256, %s29_s13, [#allocation9], %s5026_s17, %s5026_s17, %s5027_s18  }
   0xe   :  { %s4966_s21 = scalar_lea.vmem %s17_s15, 256  ;;  %p4971_p6 = scmp.lt.s32.totalorder %s17_s15, %s17_s15 }
   0xf   :  { %p4967_p5 = scmp.ne.s32.totalorder %s17_s15, %s4966_s21  ;;  %p4972_p7 = scmp.lt.s32.totalorder %s4966_s21, %s4966_s21 }
  0x11   :  { %p4973_p8 = por %p4972_p7, %p4971_p6 }
  0x13   :  { %p4974_p9 = pnand %p4973_p8, %p4967_p5 }
  0x15   :  { %4977 = shalt.err (!%p4974_p9)
}
  0x16   :  { %22 = dma.hbm_to_vmem [thread:$0]  %s5924_s0, 256, %s17_s15, [#allocation6], %s5026_s17, %s5026_s17, %s5027_s18  }
  0x17   :  { %s5028_s24 = smov [#allocation10]  }
  0x18   :  { %s40_s25 = sshll.u32 %s5028_s24, 4  ;;  %s41_s25 = int_to_ptr.vmem [resolvable:$true] %s40_s25 }
  0x19   :  { %s4986_s26 = scalar_lea.vmem %s41_s25, 4480  ;;  %p4991_p11 = scmp.lt.s32.totalorder %s41_s25, %s41_s25 }
  0x1a   :  { %p4987_p10 = scmp.ne.s32.totalorder %s41_s25, %s4986_s26  ;;  %p4992_p12 = scmp.lt.s32.totalorder %s4986_s26, %s4986_s26 }
  0x1c   :  { %p4993_p13 = por %p4992_p12, %p4991_p11 }
  0x1e   :  { %p4994_p0 = pnand %p4993_p13, %p4987_p10 }
  0x20   :  { %4997 = shalt.err (!%p4994_p0)
}
  0x21   :  { %s5029_s1 = smov 128   ;;  %s5030_s27 = smov 8  }
  0x22   :  { %46 = dma.hbm_to_vmem [thread:$0]  %s5926_s2, 4480, %s41_s25, [#allocation9], %s5029_s1, %s5029_s1, %s5030_s27  }
  0x23   :  { %5018 = dma.done.wait [#allocation6], 256  }
  0x24   :  { %5019 = vsyncadd [#allocation6], 4294967040 }
  0x25   :  { %5020 = dma.done.wait [#allocation9], 4736  }
  0x26   :  { %5021 = vsyncadd [#allocation9], 4294962560  ;;  %v99_v0 = vlaneseq  ;;  %v5031_v1 = vmov 1983009808   ;;  %v5032_v3 = vmov 0.0   ;;  %vm5033_vm0 = vmmov 0  }
  0x27   :  { %v114_v2 = vunpack.c.l.s4 %v5031_v1  ;;  %4443 = vmatprep.subr.mxu0 %v5032_v3  ;;  %4451 = vmatprep.mubr.msk.f32.mxu0 %vm5033_vm0, %v5032_v3  ;;  %v60_v6 = vld [vmem:[#allocation10 + $0x20] sm:$0xff]  ;;  %v59_v7 = vld [vmem:[#allocation10 + $0x18] sm:$0xff]  ;;  %v58_v9 = vld [vmem:[#allocation10 + $0x10] sm:$0xff]  ;;  %vm145_vm1 = vcmask 261120   ;;  %vm323_vm2 = vcmask 130048   ;;  %s5034_s0 = smov 64  }
  0x28   :  { %v5080_v4 = vshrl.u32 %v99_v0, 7  ;;  %4414 = vmatprep.subr.mxu1 %v60_v6  ;;  %v91_v10 = vld [vmem:[#allocation5] sm:$0x3]  ;;  %v92_v11 = vld [vmem:[#allocation5 + $0x2] sm:$0x3]  ;;  %v57_v20 = vld [vmem:[#allocation10 + $0x8] sm:$0xff] }
  0x29   :  { %v115_v5 = vunpack.c.0.s8 %v114_v2  ;;  %4415 = vmatpush3.msra.mxu1 %v60_v6  ;;  %v93_v12 = vld [vmem:[#allocation5 + $0x4] sm:$0x3]  ;;  %v94_v13 = vld [vmem:[#allocation5 + $0x6] sm:$0x3]  ;;  %v111_v14 = vcombine.low %v91_v10, %v92_v11  ;;  %v95_v15 = vld [vmem:[#allocation5 + $0x8] sm:$0x3] }
  0x2a   :  { %4416 = vmatprep.subr.mxu1 %v59_v7  ;;  %v112_v16 = vcombine.low %v93_v12, %v94_v13  ;;  %v96_v17 = vld [vmem:[#allocation5 + $0xa] sm:$0x3]  ;;  %v97_v18 = vld [vmem:[#allocation5 + $0xc] sm:$0x3]  ;;  %v98_v19 = vld [vmem:[#allocation5 + $0xe] sm:$0x3] }
  0x2b   :  { %v5083_v8 = vsub.s32 %v115_v5, %v5080_v4  ;;  %4417 = vmatpush3.msra.mxu1 %v59_v7  ;;  %v128_v22 = vcombine.low %v95_v15, %v96_v17  ;;  %v129_v23 = vcombine.low %v97_v18, %v98_v19  ;;  %v66_v24 = vld [vmem:[#allocation10 + $0x50] sm:$0xff]  ;;  %v518_v26 = vsub.s32 1, %v5080_v4  ;;  %v273_v35 = vld [vmem:[#allocation8 + $0x8] sm:$0x3]  ;;  %v274_v36 = vld [vmem:[#allocation8 + $0xa] sm:$0x3] }
  0x2c   :  { %v269_v25 = vld [vmem:[#allocation8] sm:$0x3]  ;;  %4418 = vmatprep.subr.mxu1 %v58_v9  ;;  %v270_v28 = vld [vmem:[#allocation8 + $0x2] sm:$0x3]  ;;  %v271_v29 = vld [vmem:[#allocation8 + $0x4] sm:$0x3]  ;;  %v306_v40 = vcombine.low %v273_v35, %v274_v36 }
  0x2d   :  { %v119_v21 = vrot.slane %v111_v14, %v5083_v8  ;;  %v126_v27 = vrot.slane %v112_v16, %v5083_v8  ;;  %v272_v30 = vld [vmem:[#allocation8 + $0x6] sm:$0x3]  ;;  %4419 = vmatpush3.msra.mxu1 %v58_v9  ;;  %v136_v31 = vrot.slane %v128_v22, %v5083_v8  ;;  %v143_v32 = vrot.slane %v129_v23, %v5083_v8  ;;  %v275_v37 = vld [vmem:[#allocation8 + $0xc] sm:$0x3]  ;;  %v276_v39 = vld [vmem:[#allocation8 + $0xe] sm:$0x3] }
  0x2e   :  { %v289_v33 = vcombine.low %v269_v25, %v270_v28  ;;  %v290_v34 = vcombine.low %v271_v29, %v272_v30  ;;  %4420 = vmatprep.subr.mxu1 %v57_v20  ;;  %v307_v44 = vcombine.low %v275_v37, %v276_v39  ;;  %v5092_v45 = vld [vmem:[#allocation10] sm:$0xff]  ;;  %v65_v46 = vld [vmem:[#allocation10 + $0x48] sm:$0xff]  ;;  %v314_v47 = vrot.slane %v306_v40, %v5083_v8  ;;  %v5107_v53 = vld [vmem:[#allocation10 + $0x38] sm:$0xff]  ;;  %s5035_s2 = smov 96   ;;  %s5036_s30 = smov 80  }
  0x2f   :  { %v127_v38 = vcombine.low %v119_v21, %v126_v27  ;;  %4421 = vmatpush3.msra.mxu1 %v57_v20  ;;  %v144_v41 = vcombine.low %v136_v31, %v143_v32  ;;  %v5096_v48 = vld [vmem:[#allocation10 + $0x40] sm:$0xff]  ;;  %v519_v49 = vrot.slane %v5092_v45, %v518_v26  ;;  %v5113_v54 = vld [vmem:[#allocation10 + $0x30] sm:$0xff]  ;;  %v5119_v55 = vld [vmem:[#allocation10 + $0x28] sm:$0xff]  ;;  %v5141_v56 = vsub.s32 0, %v5080_v4  ;;  %s5037_s4 = smov 16   ;;  %s5041_s5 = smov [#allocation11]  }
  0x30   :  { %v297_v42 = vrot.slane %v289_v33, %v5083_v8  ;;  %v304_v43 = vrot.slane %v290_v34, %v5083_v8  ;;  %4425 = vmatprep.subr.mxu1 %v66_v24  ;;  %v321_v51 = vrot.slane %v307_v44, %v5083_v8  ;;  %4444 = vmatpush3.msra.mxu0 %v5096_v48  ;;  %v279_v58 = vsub.s32 2, %v5080_v4  ;;  %s4182_s6 = sshll.u32 %s5041_s5, 4  ;;  %s4183_s6 = int_to_ptr.vmem [resolvable:$true] %s4182_s6 }
  0x31   :  { %4422 = vmatprep.mubr.msk.f32.mxu1 %vm145_vm1, %v127_v38  ;;  %521 = vrot.lane.b32.xlu0 %v519_v49, %s5034_s0  ;;  %v102_v57 = vrot.slane %v5092_v45, %v5141_v56  ;;  %vm562_vm3 = vcmask 123904   ;;  %vm1826_vm4 = vcmask 7168   ;;  %vm1893_vm5 = vcmask 1041409   ;;  %s4998_s7 = scalar_lea.vmem %s4183_s6, 256  ;;  %p5003_p2 = scmp.lt.s32.totalorder %s4183_s6, %s4183_s6 }
  0x32   :  { %4423 = vmatmul.mubr.msk.f32.vlgmr.msra.gmra.mxu1 %vm145_vm1, %v144_v41  ;;  %v305_v50 = vcombine.low %v297_v42, %v304_v43  ;;  %v322_v52 = vcombine.low %v314_v47, %v321_v51  ;;  %4445 = vmatprep.subr.mxu0 %v5032_v3  ;;  %v5149_v61 = vrot.slane %v5092_v45, %v279_v58  ;;  %vm1627_vm6 = vcmask 517120   ;;  %p4999_p1 = scmp.ne.s32.totalorder %s4183_s6, %s4998_s7  ;;  %p5004_p3 = scmp.lt.s32.totalorder %s4998_s7, %s4998_s7 }
  0x33   :  { %4426 = vmatpush3.msra.mxu1 %v66_v24  ;;  %4446 = vmatpush3.msra.mxu0 %v5107_v53  ;;  %1628 = vst.msk [vmem:[#allocation4] sm:$0x3] %vm1627_vm6, %v5032_v3  ;;  %1629 = vst.msk [vmem:[#allocation4 + $0x2] sm:$0x3] %vm1627_vm6, %v5032_v3  ;;  %vm4045_vm7 = vcmask 523264  }
  0x34   :  { %4427 = vmatprep.subr.mxu1 %v65_v46  ;;  %4429 = vmatprep.mubr.msk.f32.mxu1 %vm323_vm2, %v305_v50  ;;  %1630 = vst.msk [vmem:[#allocation4 + $0x4] sm:$0x3] %vm1627_vm6, %v5032_v3  ;;  %1631 = vst.msk [vmem:[#allocation4 + $0x6] sm:$0x3] %vm1627_vm6, %v5032_v3  ;;  %p5005_p4 = por %p5004_p3, %p5003_p2 }
  0x35   :  { %4428 = vmatpush3.msra.mxu1 %v65_v46  ;;  %4447 = vmatprep.subr.mxu0 %v5032_v3  ;;  %1632 = vst.msk [vmem:[#allocation4 + $0x8] sm:$0x3] %vm1627_vm6, %v5032_v3  ;;  %1633 = vst.msk [vmem:[#allocation4 + $0xa] sm:$0x3] %vm1627_vm6, %v5032_v3 }
  0x36   :  { %4430 = vmatmul.mubr.msk.f32.vlgmr.msra.gmra.mxu1 %vm323_vm2, %v322_v52  ;;  %4432 = vmatprep.subr.mxu1 %v5032_v3  ;;  %1634 = vst.msk [vmem:[#allocation4 + $0xc] sm:$0x3] %vm1627_vm6, %v5032_v3  ;;  %1635 = vst.msk [vmem:[#allocation4 + $0xe] sm:$0x3] %vm1627_vm6, %v5032_v3  ;;  %p5006_p5 = pnand %p5005_p4, %p4999_p1 }
  0x37   :  { %4433 = vmatpush3.msra.mxu1 %v5096_v48  ;;  %4440 = vmatprep.mubr.msk.f32.mxu1 %vm5033_vm0, %v5032_v3 }
  0x38   :  { %4434 = vmatprep.subr.mxu1 %v5032_v3  ;;  %4448 = vmatpush3.msra.mxu0 %v5113_v54 }
  0x39   :  { %4435 = vmatpush3.msra.mxu1 %v5107_v53  ;;  %4449 = vmatprep.subr.mxu0 %v5032_v3 }
  0x3a   :  { %4436 = vmatprep.subr.mxu1 %v5032_v3  ;;  %4450 = vmatpush3.msra.mxu0 %v5119_v55 }
  0x3b   :  { %4437 = vmatpush3.msra.mxu1 %v5113_v54  ;;  %4465 = vmatprep.subr.mxu0 %v5032_v3 }
  0x3c   :  { %4438 = vmatprep.subr.mxu1 %v5032_v3 }
  0x3d   :  { %4439 = vmatpush3.msra.mxu1 %v5119_v55 }
  0x3e   :  { %4441 = vmatmul.mubr.f32.vlgmr.msra.gmra.mxu1 %v5032_v3  ;;  %4454 = vmatprep.subr.mxu1 %v5032_v3 }
  0x3f   :  { %4455 = vmatpush3.msra.mxu1 %v5096_v48  ;;  %4462 = vmatprep.mubr.msk.f32.mxu1 %vm5033_vm0, %v5032_v3 }
  0x40   :  { %4456 = vmatprep.subr.mxu1 %v5032_v3 }
  0x41   :  { %4457 = vmatpush3.msra.mxu1 %v5107_v53 }
  0x42   :  { %4458 = vmatprep.subr.mxu1 %v5032_v3 }
  0x43   :  { %4459 = vmatpush3.msra.mxu1 %v5113_v54 }
  0x44   :  { %4460 = vmatprep.subr.mxu1 %v5032_v3 }
  0x45   :  { %4461 = vmatpush3.msra.mxu1 %v5119_v55 }
  0x46   :  { %4476 = vmatprep.subr.mxu1 %v5032_v3 }
  0xa3   :  { %v5156_v2 = vpop.permute.xlu0 %521 }
  0xf2   :  { %v4424_v59 = vpop.f32.mrf.mxu1 }
  0xf3   :  { %v5146_v60 = vadd.f32 %v4424_v59, %v102_v57 }
  0xf4   :  { %v216_v62 = vpop.f32.mrf.mxu1 }
  0xf5   :  { %v5161_v10 = vadd.f32 %v216_v62, %v102_v57 }
  0xf6   :  { %v4431_v63 = vpop.f32.mrf.mxu1 }
  0xf7   :  { %v5152_v0 = vadd.f32 %v4431_v63, %v5149_v61  ;;  %v234_v11 = vrot.slane %v5161_v10, %v5083_v8  ;;  %v227_v63 = vcombine.high %v5161_v10, %v5161_v10 }
  0xf8   :  { %v5154_v1 = vpop.f32.mrf.mxu1 }
  0xf9   :  { %v242_v33 = vcombine.high %v234_v11, %v234_v11 }
  0xfe   :  { %v505_v5 = vpop.f32.mrf.mxu1 }
  0xff   :  { %v524_v6 = vadd.f32 %v5156_v2, %v505_v5  ;;  %v509_v12 = vadd.f32 %v505_v5, %v234_v11  ;;  %v241_v5 = vrot.slane %v227_v63, %v5083_v8 }
 0x100   :  { %v4442_v7 = vpop.f32.mrf.mxu1 }
 0x101   :  { %v532_v9 = vrot.slane %v524_v6, %v5083_v8  ;;  %v4199_v13 = vmul.f32 -1.442695, %v509_v12 }
 0x103   :  { %533 = vrot.lane.b32.xlu0 %v532_v9, %s5034_s0  ;;  %4768 = vpow2.f32 %v4199_v13 }
 0x110   :  { %v4769_v14 = vpop.eup %4768 }
 0x111   :  { %v513_v15 = vadd.f32 1.0, %v4769_v14 }
 0x113   :  { %4770 = vrcp.f32 %v513_v15 }
 0x120   :  { %v4771_v16 = vpop.eup %4770 }
 0x121   :  { %v543_v22 = vsub.f32 1.0, %v4771_v16  ;;  %v549_v24 = vmul.f32 0.0, %v4771_v16 }
 0x175   :  { %v534_v17 = vpop.permute.xlu0 %533 }
 0x176   :  { %v536_v18 = vmul.f32 %v4771_v16, %v534_v17 }
 0x178   :  { %538 = vrot.lane.b32.xlu1 %v536_v18, %s5034_s0 }
 0x1ea   :  { %v539_v19 = vpop.permute.xlu1 %538 }
 0x1eb   :  { %v541_v20 = vadd.f32 %v539_v19, %v234_v11 }
 0x1ed   :  { %4772 = vtanh.f32 %v541_v20 }
 0x1fa   :  { %v4773_v21 = vpop.eup %4772 }
 0x1fb   :  { %545 = vrot.lane.b32.xlu1 %v4773_v21, %s5035_s2 }
 0x26d   :  { %v546_v23 = vpop.permute.xlu1 %545 }
 0x26e   :  { %v548_v25 = vmul.f32 %v546_v23, %v543_v22 }
 0x270   :  { %v550_v26 = vadd.f32 %v549_v24, %v548_v25 }
 0x272   :  { %v5168_v27 = vrot.slane %v550_v26, %v5083_v8 }
 0x274   :  { %559 = vrot.lane.b32.xlu0 %v5168_v27, %s5035_s2 }
 0x2e6   :  { %v560_v28 = vpop.permute.xlu0 %559 }
 0x2e7   :  { %563 = vst.msk [vmem:[#allocation2] sm:$0x3] %vm562_vm3, %v560_v28  ;;  %4452 = vmatmul.mubr.msk.f32.vlgmr.msra.gmra.mxu0 %vm145_vm1, %v560_v28 }
 0x2e8   :  { %4466 = vmatpush3.msra.mxu0 %v5096_v48  ;;  %4473 = vmatprep.mubr.msk.f32.mxu0 %vm5033_vm0, %v5032_v3 }
 0x2e9   :  { %4467 = vmatprep.subr.mxu0 %v5032_v3 }
 0x2ea   :  { %4468 = vmatpush3.msra.mxu0 %v5107_v53 }
 0x2eb   :  { %4469 = vmatprep.subr.mxu0 %v5032_v3 }
 0x2ec   :  { %4470 = vmatpush3.msra.mxu0 %v5113_v54 }
 0x2ed   :  { %4471 = vmatprep.subr.mxu0 %v5032_v3 }
 0x2ee   :  { %4472 = vmatpush3.msra.mxu0 %v5119_v55 }
 0x2ef   :  { %4487 = vmatprep.subr.mxu0 %v5032_v3 }
 0x3a7   :  { %v637_v29 = vpop.f32.mrf.mxu0 }
 0x3a8   :  { %v648_v30 = vadd.f32 %v637_v29, %v5156_v2  ;;  %v641_v34 = vadd.f32 %v637_v29, %v242_v33  ;;  %v243_v29 = vcombine.high %v241_v5, %v241_v5 }
 0x3a9   :  { %v4453_v31 = vpop.f32.mrf.mxu0 }
 0x3aa   :  { %v656_v32 = vrot.slane %v648_v30, %v5083_v8  ;;  %v4201_v35 = vmul.f32 -1.442695, %v641_v34 }
 0x3ac   :  { %657 = vrot.lane.b32.xlu1 %v656_v32, %s5034_s0  ;;  %4774 = vpow2.f32 %v4201_v35 }
 0x3b9   :  { %v4775_v36 = vpop.eup %4774 }
 0x3ba   :  { %v645_v37 = vadd.f32 1.0, %v4775_v36 }
 0x3bc   :  { %4776 = vrcp.f32 %v645_v37 }
 0x3c9   :  { %v4777_v38 = vpop.eup %4776 }
 0x3ca   :  { %v667_v44 = vsub.f32 1.0, %v4777_v38  ;;  %v673_v47 = vmul.f32 %v4777_v38, %v550_v26 }
 0x41e   :  { %v658_v39 = vpop.permute.xlu1 %657 }
 0x41f   :  { %v660_v40 = vmul.f32 %v4777_v38, %v658_v39 }
 0x421   :  { %662 = vrot.lane.b32.xlu0 %v660_v40, %s5034_s0 }
 0x493   :  { %v663_v41 = vpop.permute.xlu0 %662 }
 0x494   :  { %v665_v42 = vadd.f32 %v663_v41, %v242_v33 }
 0x496   :  { %4778 = vtanh.f32 %v665_v42 }
 0x4a3   :  { %v4779_v43 = vpop.eup %4778 }
 0x4a4   :  { %669 = vrot.lane.b32.xlu1 %v4779_v43, %s5035_s2 }
 0x516   :  { %v670_v46 = vpop.permute.xlu1 %669 }
 0x517   :  { %v672_v49 = vmul.f32 %v670_v46, %v667_v44 }
 0x519   :  { %v674_v50 = vadd.f32 %v673_v47, %v672_v49 }
 0x51b   :  { %v5190_v51 = vrot.slane %v674_v50, %v5083_v8 }
 0x51d   :  { %683 = vrot.lane.b32.xlu0 %v5190_v51, %s5035_s2 }
 0x58f   :  { %v684_v52 = vpop.permute.xlu0 %683 }
 0x590   :  { %687 = vst.msk [vmem:[#allocation2 + $0x2] sm:$0x3] %vm562_vm3, %v684_v52  ;;  %4463 = vmatmul.mubr.msk.f32.vlgmr.msra.gmra.mxu1 %vm145_vm1, %v684_v52 }
 0x591   :  { %4477 = vmatpush3.msra.mxu1 %v5096_v48  ;;  %4484 = vmatprep.mubr.msk.f32.mxu1 %vm5033_vm0, %v5032_v3 }
 0x592   :  { %4478 = vmatprep.subr.mxu1 %v5032_v3 }
 0x593   :  { %4479 = vmatpush3.msra.mxu1 %v5107_v53 }
 0x594   :  { %4480 = vmatprep.subr.mxu1 %v5032_v3 }
 0x595   :  { %4481 = vmatpush3.msra.mxu1 %v5113_v54 }
 0x596   :  { %4482 = vmatprep.subr.mxu1 %v5032_v3 }
 0x597   :  { %4483 = vmatpush3.msra.mxu1 %v5119_v55 }
 0x598   :  { %4498 = vmatprep.subr.mxu1 %v5032_v3 }
 0x650   :  { %v761_v57 = vpop.f32.mrf.mxu1 }
 0x651   :  { %v772_v58 = vadd.f32 %v761_v57, %v5156_v2  ;;  %v765_v6 = vadd.f32 %v761_v57, %v241_v5 }
 0x652   :  { %v4464_v59 = vpop.f32.mrf.mxu1 }
 0x653   :  { %v780_v62 = vrot.slane %v772_v58, %v5083_v8  ;;  %v4203_v7 = vmul.f32 -1.442695, %v765_v6  ;;  %v251_v58 = vrot.slane %v5146_v60, %v5083_v8 }
 0x655   :  { %781 = vrot.lane.b32.xlu1 %v780_v62, %s5034_s0  ;;  %4780 = vpow2.f32 %v4203_v7 }
 0x662   :  { %v4781_v9 = vpop.eup %4780 }
 0x663   :  { %v769_v11 = vadd.f32 1.0, %v4781_v9 }
 0x665   :  { %4782 = vrcp.f32 %v769_v11 }
 0x672   :  { %v4783_v12 = vpop.eup %4782 }
 0x673   :  { %v791_v10 = vsub.f32 1.0, %v4783_v12  ;;  %v797_v19 = vmul.f32 %v4783_v12, %v674_v50 }
 0x6c7   :  { %v782_v13 = vpop.permute.xlu1 %781 }
 0x6c8   :  { %v784_v14 = vmul.f32 %v4783_v12, %v782_v13 }
 0x6ca   :  { %786 = vrot.lane.b32.xlu0 %v784_v14, %s5034_s0 }
 0x73c   :  { %v787_v15 = vpop.permute.xlu0 %786 }
 0x73d   :  { %v789_v16 = vadd.f32 %v787_v15, %v241_v5 }
 0x73f   :  { %4784 = vtanh.f32 %v789_v16 }
 0x74c   :  { %v4785_v17 = vpop.eup %4784 }
 0x74d   :  { %793 = vrot.lane.b32.xlu1 %v4785_v17, %s5035_s2 }
 0x7bf   :  { %v794_v18 = vpop.permute.xlu1 %793 }
 0x7c0   :  { %v796_v20 = vmul.f32 %v794_v18, %v791_v10 }
 0x7c2   :  { %v798_v21 = vadd.f32 %v797_v19, %v796_v20 }
 0x7c4   :  { %v5215_v22 = vrot.slane %v798_v21, %v5083_v8 }
 0x7c6   :  { %807 = vrot.lane.b32.xlu0 %v5215_v22, %s5035_s2 }
 0x838   :  { %v808_v23 = vpop.permute.xlu0 %807 }
 0x839   :  { %811 = vst.msk [vmem:[#allocation2 + $0x4] sm:$0x3] %vm562_vm3, %v808_v23  ;;  %4474 = vmatmul.mubr.msk.f32.vlgmr.msra.gmra.mxu0 %vm145_vm1, %v808_v23 }
 0x83a   :  { %4488 = vmatpush3.msra.mxu0 %v5096_v48  ;;  %4495 = vmatprep.mubr.msk.f32.mxu0 %vm5033_vm0, %v5032_v3 }
 0x83b   :  { %4489 = vmatprep.subr.mxu0 %v5032_v3 }
 0x83c   :  { %4490 = vmatpush3.msra.mxu0 %v5107_v53 }
 0x83d   :  { %4491 = vmatprep.subr.mxu0 %v5032_v3 }
 0x83e   :  { %4492 = vmatpush3.msra.mxu0 %v5113_v54 }
 0x83f   :  { %4493 = vmatprep.subr.mxu0 %v5032_v3 }
 0x840   :  { %4494 = vmatpush3.msra.mxu0 %v5119_v55 }
 0x841   :  { %4509 = vmatprep.subr.mxu0 %v5032_v3 }
 0x8f9   :  { %v885_v24 = vpop.f32.mrf.mxu0 }
 0x8fa   :  { %v896_v25 = vadd.f32 %v885_v24, %v5156_v2  ;;  %v889_v30 = vadd.f32 %v885_v24, %v243_v29  ;;  %v259_v24 = vcombine.high %v251_v58, %v251_v58 }
 0x8fb   :  { %v4475_v26 = vpop.f32.mrf.mxu0 }
 0x8fc   :  { %v904_v28 = vrot.slane %v896_v25, %v5083_v8  ;;  %v4205_v31 = vmul.f32 -1.442695, %v889_v30 }
 0x8fe   :  { %905 = vrot.lane.b32.xlu1 %v904_v28, %s5034_s0  ;;  %4786 = vpow2.f32 %v4205_v31 }
 0x90b   :  { %v4787_v32 = vpop.eup %4786 }
 0x90c   :  { %v893_v33 = vadd.f32 1.0, %v4787_v32 }
 0x90e   :  { %4788 = vrcp.f32 %v893_v33 }
 0x91b   :  { %v4789_v34 = vpop.eup %4788 }
 0x91c   :  { %v915_v40 = vsub.f32 1.0, %v4789_v34  ;;  %v921_v42 = vmul.f32 %v4789_v34, %v798_v21 }
 0x970   :  { %v906_v35 = vpop.permute.xlu1 %905 }
 0x971   :  { %v908_v36 = vmul.f32 %v4789_v34, %v906_v35 }
 0x973   :  { %910 = vrot.lane.b32.xlu0 %v908_v36, %s5034_s0 }
 0x9e5   :  { %v911_v37 = vpop.permute.xlu0 %910 }
 0x9e6   :  { %v913_v38 = vadd.f32 %v911_v37, %v243_v29 }
 0x9e8   :  { %4790 = vtanh.f32 %v913_v38 }
 0x9f5   :  { %v4791_v39 = vpop.eup %4790 }
 0x9f6   :  { %917 = vrot.lane.b32.xlu1 %v4791_v39, %s5035_s2 }
 0xa68   :  { %v918_v41 = vpop.permute.xlu1 %917 }
 0xa69   :  { %v920_v43 = vmul.f32 %v918_v41, %v915_v40 }
 0xa6b   :  { %v922_v44 = vadd.f32 %v921_v42, %v920_v43 }
 0xa6d   :  { %v5237_v46 = vrot.slane %v922_v44, %v5083_v8 }
 0xa6f   :  { %931 = vrot.lane.b32.xlu0 %v5237_v46, %s5035_s2 }
 0xae1   :  { %v932_v47 = vpop.permute.xlu0 %931 }
 0xae2   :  { %935 = vst.msk [vmem:[#allocation2 + $0x6] sm:$0x3] %vm562_vm3, %v932_v47  ;;  %4485 = vmatmul.mubr.msk.f32.vlgmr.msra.gmra.mxu1 %vm145_vm1, %v932_v47 }
 0xae3   :  { %4499 = vmatpush3.msra.mxu1 %v5096_v48  ;;  %4506 = vmatprep.mubr.msk.f32.mxu1 %vm5033_vm0, %v5032_v3 }
 0xae4   :  { %4500 = vmatprep.subr.mxu1 %v5032_v3 }
 0xae5   :  { %4501 = vmatpush3.msra.mxu1 %v5107_v53 }
 0xae6   :  { %4502 = vmatprep.subr.mxu1 %v5032_v3 }
 0xae7   :  { %4503 = vmatpush3.msra.mxu1 %v5113_v54 }
 0xae8   :  { %4504 = vmatprep.subr.mxu1 %v5032_v3 }
 0xae9   :  { %4505 = vmatpush3.msra.mxu1 %v5119_v55 }
 0xba2   :  { %v1009_v49 = vpop.f32.mrf.mxu1 }
 0xba3   :  { %v1020_v50 = vadd.f32 %v1009_v49, %v5156_v2  ;;  %v1013_v59 = vadd.f32 %v1009_v49, %v251_v58 }
 0xba4   :  { %v4486_v52 = vpop.f32.mrf.mxu1 }
 0xba5   :  { %v1028_v57 = vrot.slane %v1020_v50, %v5083_v8  ;;  %v4207_v62 = vmul.f32 -1.442695, %v1013_v59 }
 0xba7   :  { %1029 = vrot.lane.b32.xlu1 %v1028_v57, %s5034_s0  ;;  %4792 = vpow2.f32 %v4207_v62 }
 0xbb4   :  { %v4793_v63 = vpop.eup %4792 }
 0xbb5   :  { %v1017_v5 = vadd.f32 1.0, %v4793_v63 }
 0xbb7   :  { %4794 = vrcp.f32 %v1017_v5 }
 0xbc4   :  { %v4795_v6 = vpop.eup %4794 }
 0xbc5   :  { %v1039_v14 = vsub.f32 1.0, %v4795_v6  ;;  %v1045_v16 = vmul.f32 %v4795_v6, %v922_v44  ;;  %v244_v44 = vcombine.high %v5146_v60, %v5146_v60 }
 0xbc7   :  { %v258_v47 = vrot.slane %v244_v44, %v5083_v8 }
 0xc19   :  { %v1030_v7 = vpop.permute.xlu1 %1029 }
 0xc1a   :  { %v1032_v9 = vmul.f32 %v4795_v6, %v1030_v7 }
 0xc1c   :  { %1034 = vrot.lane.b32.xlu0 %v1032_v9, %s5034_s0 }
 0xc8e   :  { %v1035_v11 = vpop.permute.xlu0 %1034 }
 0xc8f   :  { %v1037_v12 = vadd.f32 %v1035_v11, %v251_v58 }
 0xc91   :  { %4796 = vtanh.f32 %v1037_v12 }
 0xc9e   :  { %v4797_v13 = vpop.eup %4796 }
 0xc9f   :  { %1041 = vrot.lane.b32.xlu1 %v4797_v13, %s5035_s2 }
 0xd11   :  { %v1042_v15 = vpop.permute.xlu1 %1041 }
 0xd12   :  { %v1044_v17 = vmul.f32 %v1042_v15, %v1039_v14 }
 0xd14   :  { %v1046_v10 = vadd.f32 %v1045_v16, %v1044_v17 }
 0xd16   :  { %v5260_v18 = vrot.slane %v1046_v10, %v5083_v8 }
 0xd18   :  { %1055 = vrot.lane.b32.xlu0 %v5260_v18, %s5035_s2 }
 0xd8a   :  { %v1056_v19 = vpop.permute.xlu0 %1055 }
 0xd8b   :  { %1059 = vst.msk [vmem:[#allocation2 + $0x8] sm:$0x3] %vm562_vm3, %v1056_v19  ;;  %4496 = vmatmul.mubr.msk.f32.vlgmr.msra.gmra.mxu0 %vm145_vm1, %v1056_v19  ;;  %v260_v19 = vcombine.high %v258_v47, %v258_v47 }
 0xd8c   :  { %4510 = vmatpush3.msra.mxu0 %v5096_v48  ;;  %4517 = vmatprep.mubr.msk.f32.mxu0 %vm5033_vm0, %v5032_v3 }
 0xd8d   :  { %4511 = vmatprep.subr.mxu0 %v5032_v3 }
 0xd8e   :  { %4512 = vmatpush3.msra.mxu0 %v5107_v53 }
 0xd8f   :  { %4513 = vmatprep.subr.mxu0 %v5032_v3 }
 0xd90   :  { %4514 = vmatpush3.msra.mxu0 %v5113_v54 }
 0xd91   :  { %4515 = vmatprep.subr.mxu0 %v5032_v3 }
 0xd92   :  { %4516 = vmatpush3.msra.mxu0 %v5119_v55 }
 0xd93   :  { %4531 = vmatprep.subr.mxu0 %v5032_v3 }
 0xe4b   :  { %v1133_v20 = vpop.f32.mrf.mxu0 }
 0xe4c   :  { %v1144_v48 = vadd.f32 %v1133_v20, %v5156_v2  ;;  %v1137_v53 = vadd.f32 %v1133_v20, %v259_v24 }
 0xe4d   :  { %v4497_v21 = vpop.f32.mrf.mxu0 }
 0xe4e   :  { %v1152_v23 = vrot.slane %v1144_v48, %v5083_v8  ;;  %v4209_v25 = vmul.f32 -1.442695, %v1137_v53 }
 0xe50   :  { %1153 = vrot.lane.b32.xlu1 %v1152_v23, %s5034_s0  ;;  %4798 = vpow2.f32 %v4209_v25 }
 0xe5d   :  { %v4799_v26 = vpop.eup %4798 }
 0xe5e   :  { %v1141_v54 = vadd.f32 1.0, %v4799_v26 }
 0xe60   :  { %4800 = vrcp.f32 %v1141_v54 }
 0xe6d   :  { %v4801_v28 = vpop.eup %4800 }
 0xe6e   :  { %v1163_v33 = vsub.f32 1.0, %v4801_v28  ;;  %v1169_v35 = vmul.f32 %v4801_v28, %v1046_v10 }
 0xec2   :  { %v1154_v29 = vpop.permute.xlu1 %1153 }
 0xec3   :  { %v1156_v55 = vmul.f32 %v4801_v28, %v1154_v29 }
 0xec5   :  { %1158 = vrot.lane.b32.xlu0 %v1156_v55, %s5034_s0 }
 0xf37   :  { %v1159_v30 = vpop.permute.xlu0 %1158 }
 0xf38   :  { %v1161_v31 = vadd.f32 %v1159_v30, %v259_v24  ;;  %v5326_v30 = vld [vmem:[#allocation10 + $0x90] sm:$0xff] }
 0xf3a   :  { %4802 = vtanh.f32 %v1161_v31  ;;  %v5331_v31 = vld [vmem:[#allocation10 + $0x88] sm:$0xff] }
 0xf47   :  { %v4803_v32 = vpop.eup %4802 }
 0xf48   :  { %1165 = vrot.lane.b32.xlu1 %v4803_v32, %s5035_s2 }
 0xfba   :  { %v1166_v34 = vpop.permute.xlu1 %1165 }
 0xfbb   :  { %v1168_v36 = vmul.f32 %v1166_v34, %v1163_v33 }
 0xfbd   :  { %v1170_v37 = vadd.f32 %v1169_v35, %v1168_v36 }
 0xfbf   :  { %v5282_v38 = vrot.slane %v1170_v37, %v5083_v8 }
 0xfc1   :  { %1179 = vrot.lane.b32.xlu0 %v5282_v38, %s5035_s2 }
0x1033   :  { %v1180_v39 = vpop.permute.xlu0 %1179 }
0x1034   :  { %1183 = vst.msk [vmem:[#allocation2 + $0xa] sm:$0x3] %vm562_vm3, %v1180_v39  ;;  %4507 = vmatmul.mubr.msk.f32.vlgmr.msra.gmra.mxu1 %vm145_vm1, %v1180_v39 }
0x10f4   :  { %v1257_v40 = vpop.f32.mrf.mxu1 }
0x10f5   :  { %v1268_v41 = vadd.f32 %v1257_v40, %v5156_v2  ;;  %v1261_v49 = vadd.f32 %v1257_v40, %v258_v47 }
0x10f6   :  { %v4508_v42 = vpop.f32.mrf.mxu1 }
0x10f7   :  { %v1276_v43 = vrot.slane %v1268_v41, %v5083_v8  ;;  %v4211_v50 = vmul.f32 -1.442695, %v1261_v49 }
0x10f9   :  { %1277 = vrot.lane.b32.xlu1 %v1276_v43, %s5034_s0  ;;  %4804 = vpow2.f32 %v4211_v50 }
0x1106   :  { %v4805_v52 = vpop.eup %4804 }
0x1107   :  { %v1265_v57 = vadd.f32 1.0, %v4805_v52 }
0x1109   :  { %4806 = vrcp.f32 %v1265_v57  ;;  %v78_v57 = vld [vmem:[#allocation10 + $0xb0] sm:$0xff] }
0x110a   :  { %4520 = vmatprep.subr.mxu1 %v78_v57 }
0x110b   :  { %4521 = vmatpush3.msra.mxu1 %v78_v57  ;;  %v5399_v57 = vld [vmem:[#allocation10 + $0xb8] sm:$0xff] }
0x1116   :  { %v4807_v58 = vpop.eup %4806 }
0x1117   :  { %v1287_v60 = vsub.f32 1.0, %v4807_v58  ;;  %v1293_v9 = vmul.f32 %v4807_v58, %v1170_v37 }
0x116b   :  { %v1278_v59 = vpop.permute.xlu1 %1277 }
0x116c   :  { %v1280_v62 = vmul.f32 %v4807_v58, %v1278_v59  ;;  %v77_v58 = vld [vmem:[#allocation10 + $0xa8] sm:$0xff]  ;;  %v76_v59 = vld [vmem:[#allocation10 + $0xa0] sm:$0xff] }
0x116d   :  { %4522 = vmatprep.subr.mxu1 %v77_v58 }
0x116e   :  { %1282 = vrot.lane.b32.xlu0 %v1280_v62, %s5034_s0  ;;  %4523 = vmatpush3.msra.mxu1 %v77_v58  ;;  %v5039_v58 = vmov 1966171168  }
0x116f   :  { %4524 = vmatprep.subr.mxu1 %v76_v59 }
0x1170   :  { %4525 = vmatpush3.msra.mxu1 %v76_v59  ;;  %v1710_v59 = vunpack.c.l.s4 %v5039_v58 }
0x11e0   :  { %v1283_v63 = vpop.permute.xlu0 %1282 }
0x11e1   :  { %v1285_v5 = vadd.f32 %v1283_v63, %v258_v47  ;;  %v75_v63 = vld [vmem:[#allocation10 + $0x98] sm:$0xff] }
0x11e2   :  { %4526 = vmatprep.subr.mxu1 %v75_v63 }
0x11e3   :  { %4808 = vtanh.f32 %v1285_v5  ;;  %4527 = vmatpush3.msra.mxu1 %v75_v63 }
0x11f0   :  { %v4809_v6 = vpop.eup %4808 }
0x11f1   :  { %1289 = vrot.lane.b32.xlu1 %v4809_v6, %s5035_s2 }
0x1263   :  { %v1290_v7 = vpop.permute.xlu1 %1289 }
0x1264   :  { %v1292_v11 = vmul.f32 %v1290_v7, %v1287_v60 }
0x1266   :  { %v5296_v12 = vadd.f32 %v1293_v9, %v1292_v11  ;;  %v1439_v9 = vld [vmem:[#allocation2 + $0x6] sm:$0x3] }
0x1268   :  { %v1302_v13 = vrot.slane %v5296_v12, %v5083_v8 }
0x126a   :  { %1303 = vrot.lane.b32.xlu0 %v1302_v13, %s5035_s2 }
0x12dc   :  { %v1304_v14 = vpop.permute.xlu0 %1303 }
0x12dd   :  { %1307 = vst.msk [vmem:[#allocation2 + $0xc] sm:$0x3] %vm562_vm3, %v1304_v14  ;;  %4518 = vmatmul.mubr.msk.f32.vlgmr.msra.gmra.mxu0 %vm145_vm1, %v1304_v14  ;;  %v1437_v14 = vld [vmem:[#allocation2 + $0x2] sm:$0x3] }
0x12de   :  { %4539 = vmatprep.mubr.msk.f32.mxu0 %vm5033_vm0, %v5032_v3  ;;  %4532 = vmatpush3.msra.mxu0 %v5326_v30 }
0x12df   :  { %4533 = vmatprep.subr.mxu0 %v5032_v3 }
0x12e0   :  { %4534 = vmatpush3.msra.mxu0 %v5331_v31 }
0x12e1   :  { %4535 = vmatprep.subr.mxu0 %v5032_v3 }
0x139d   :  { %v1381_v15 = vpop.f32.mrf.mxu0 }
0x139e   :  { %v1392_v16 = vadd.f32 %v1381_v15, %v5156_v2  ;;  %v1385_v20 = vadd.f32 %v1381_v15, %v260_v19  ;;  %v1438_v15 = vld [vmem:[#allocation2 + $0x4] sm:$0x3] }
0x139f   :  { %v4519_v17 = vpop.f32.mrf.mxu0 }
0x13a0   :  { %v1400_v10 = vrot.slane %v1392_v16, %v5083_v8  ;;  %v4213_v48 = vmul.f32 -1.442695, %v1385_v20  ;;  %v1436_v16 = vld [vmem:[#allocation2] sm:$0x3]  ;;  %v5038_v17 = vmov 1934713408  }
0x13a2   :  { %1401 = vrot.lane.b32.xlu1 %v1400_v10, %s5034_s0  ;;  %4810 = vpow2.f32 %v4213_v48  ;;  %v1526_v10 = vunpack.c.l.s4 %v5038_v17 }
0x13af   :  { %v4811_v21 = vpop.eup %4810 }
0x13b0   :  { %v1389_v23 = vadd.f32 1.0, %v4811_v21 }
0x13b2   :  { %4812 = vrcp.f32 %v1389_v23 }
0x13bf   :  { %v4813_v24 = vpop.eup %4812 }
0x13c0   :  { %v1411_v32 = vsub.f32 1.0, %v4813_v24  ;;  %v1417_v34 = vmul.f32 %v4813_v24, %v5296_v12 }
0x1414   :  { %v1402_v53 = vpop.permute.xlu1 %1401 }
0x1415   :  { %v1404_v25 = vmul.f32 %v4813_v24, %v1402_v53  ;;  %v1441_v53 = vld [vmem:[#allocation2 + $0xa] sm:$0x3] }
0x1417   :  { %1406 = vrot.lane.b32.xlu0 %v1404_v25, %s5034_s0 }
0x141b   :  { %564 = vrot.lane.b32.xlu0 %v5168_v27, %s5036_s30 }
0x141f   :  { %812 = vrot.lane.b32.xlu0 %v5215_v22, %s5036_s30 }
0x1423   :  { %1060 = vrot.lane.b32.xlu0 %v5260_v18, %s5036_s30 }
0x1427   :  { %1308 = vrot.lane.b32.xlu0 %v1302_v13, %s5036_s30 }
0x1489   :  { %v1407_v2 = vpop.permute.xlu0 %1406 }
0x148a   :  { %v1409_v26 = vadd.f32 %v1407_v2, %v260_v19 }
0x148c   :  { %4814 = vtanh.f32 %v1409_v26 }
0x148d   :  { %v565_v54 = vpop.permute.xlu0 %564 }
0x148e   :  { %568 = vst.msk [vmem:[#allocation3 + $0xe] sm:$0x3] %vm562_vm3, %v565_v54  ;;  %v1440_v54 = vld [vmem:[#allocation2 + $0x8] sm:$0x3] }
0x1491   :  { %v813_v28 = vpop.permute.xlu0 %812 }
0x1492   :  { %816 = vst.msk [vmem:[#allocation3 + $0xa] sm:$0x3] %vm562_vm3, %v813_v28  ;;  %v1527_v28 = vunpack.c.0.s8 %v1526_v10 }
0x1495   :  { %v1061_v29 = vpop.permute.xlu0 %1060  ;;  %v1451_v42 = vld [vmem:[#allocation3 + $0xe] sm:$0x3] }
0x1496   :  { %1064 = vst.msk [vmem:[#allocation3 + $0x6] sm:$0x3] %vm562_vm3, %v1061_v29 }
0x1499   :  { %v4815_v27 = vpop.eup %4814  ;;  %v1309_v55 = vpop.permute.xlu0 %1308  ;;  %v1449_v40 = vld [vmem:[#allocation3 + $0xa] sm:$0x3] }
0x149a   :  { %1312 = vst.msk [vmem:[#allocation3 + $0x2] sm:$0x3] %vm562_vm3, %v1309_v55  ;;  %1413 = vrot.lane.b32.xlu1 %v4815_v27, %s5035_s2  ;;  %v1442_v55 = vld [vmem:[#allocation2 + $0xc] sm:$0x3] }
0x149d   :  { %v1447_v18 = vld [vmem:[#allocation3 + $0x6] sm:$0x3] }
0x149e   :  { %688 = vrot.lane.b32.xlu1 %v5190_v51, %s5036_s30  ;;  %v5335_v51 = vld [vmem:[#allocation10 + $0x80] sm:$0xff] }
0x149f   :  { %4536 = vmatpush3.msra.mxu0 %v5335_v51 }
0x14a0   :  { %4537 = vmatprep.subr.mxu0 %v5032_v3 }
0x14a1   :  { %v1445_v22 = vld [vmem:[#allocation3 + $0x2] sm:$0x3] }
0x14a2   :  { %936 = vrot.lane.b32.xlu1 %v5237_v46, %s5036_s30  ;;  %1462 = vrot.lane.b32.xlu0 %v1445_v22, %s5037_s4  ;;  %v5339_v46 = vld [vmem:[#allocation10 + $0x78] sm:$0xff] }
0x14a3   :  { %4538 = vmatpush3.msra.mxu0 %v5339_v46 }
0x14a4   :  { %4553 = vmatprep.subr.mxu0 %v5032_v3 }
0x14a6   :  { %1184 = vrot.lane.b32.xlu1 %v5282_v38, %s5036_s30  ;;  %1466 = vrot.lane.b32.xlu0 %v1447_v18, %s5037_s4 }
0x150c   :  { %v1414_v33 = vpop.permute.xlu1 %1413 }
0x150d   :  { %v1416_v35 = vmul.f32 %v1414_v33, %v1411_v32 }
0x150f   :  { %v5346_v36 = vadd.f32 %v1417_v34, %v1416_v35  ;;  %v1530_v35 = vsub.s32 %v1527_v28, %v5080_v4 }
0x1510   :  { %v689_v37 = vpop.permute.xlu1 %688 }
0x1511   :  { %692 = vst.msk [vmem:[#allocation3 + $0xc] sm:$0x3] %vm562_vm3, %v689_v37  ;;  %v1426_v38 = vrot.slane %v5346_v36, %v5083_v8 }
0x1513   :  { %1432 = vrot.lane.b32.xlu1 %v1426_v38, %s5036_s30  ;;  %1427 = vrot.lane.b32.xlu0 %v1426_v38, %s5035_s2 }
0x1514   :  { %v937_v39 = vpop.permute.xlu1 %936  ;;  %v1463_v47 = vpop.permute.xlu0 %1462 }
0x1515   :  { %940 = vst.msk [vmem:[#allocation3 + $0x8] sm:$0x3] %vm562_vm3, %v937_v39  ;;  %v1485_v20 = vsel %vm323_vm2, %v1437_v14, %v1463_v47 }
0x1517   :  { %1470 = vrot.lane.b32.xlu0 %v1449_v40, %s5037_s4 }
0x1518   :  { %v1185_v41 = vpop.permute.xlu1 %1184  ;;  %v1467_v49 = vpop.permute.xlu0 %1466  ;;  %v1450_v5 = vld [vmem:[#allocation3 + $0xc] sm:$0x3] }
0x1519   :  { %1188 = vst.msk [vmem:[#allocation3 + $0x4] sm:$0x3] %vm562_vm3, %v1185_v41  ;;  %v1487_v13 = vsel %vm323_vm2, %v1439_v9, %v1467_v49  ;;  %v5389_v49 = vld [vmem:[#allocation10 + $0xd0] sm:$0xff] }
0x151a   :  { %v1500_v24 = vcombine.low %v1485_v20, %v1487_v13  ;;  %4542 = vmatprep.subr.mxu1 %v5389_v49 }
0x151b   :  { %1474 = vrot.lane.b32.xlu0 %v1451_v42, %s5037_s4 }
0x151c   :  { %v1448_v44 = vld [vmem:[#allocation3 + $0x8] sm:$0x3]  ;;  %v1507_v32 = vrot.slane %v1500_v24, %v5083_v8 }
0x1520   :  { %v1446_v43 = vld [vmem:[#allocation3 + $0x4] sm:$0x3] }
0x1521   :  { %1464 = vrot.lane.b32.xlu1 %v1446_v43, %s5037_s4 }
0x1525   :  { %1468 = vrot.lane.b32.xlu1 %v1448_v44, %s5037_s4 }
0x1585   :  { %v1433_v50 = vpop.permute.xlu1 %1432  ;;  %v1428_v52 = vpop.permute.xlu0 %1427 }
0x1586   :  { %1435 = vst.msk [vmem:[#allocation3] sm:$0x3] %vm562_vm3, %v1433_v50  ;;  %1431 = vst.msk [vmem:[#allocation2 + $0xe] sm:$0x3] %vm562_vm3, %v1428_v52  ;;  %4540 = vmatmul.mubr.msk.f32.vlgmr.msra.gmra.mxu0 %vm145_vm1, %v1428_v52  ;;  %v5391_v50 = vld [vmem:[#allocation10 + $0xc8] sm:$0xff]  ;;  %v5395_v52 = vld [vmem:[#allocation10 + $0xc0] sm:$0xff] }
0x1587   :  { %4561 = vmatprep.mubr.msk.f32.mxu0 %vm5033_vm0, %v5032_v3 }
0x1589   :  { %v1471_v60 = vpop.permute.xlu0 %1470 }
0x158a   :  { %v1489_v2 = vsel %vm323_vm2, %v1441_v53, %v1471_v60 }
0x158d   :  { %v1444_v62 = vld [vmem:[#allocation3] sm:$0x3]  ;;  %v1443_v11 = vld [vmem:[#allocation2 + $0xe] sm:$0x3]  ;;  %v1475_v12 = vpop.permute.xlu0 %1474 }
0x158e   :  { %1460 = vrot.lane.b32.xlu1 %v1444_v62, %s5037_s4  ;;  %v1491_v48 = vsel %vm323_vm2, %v1443_v11, %v1475_v12  ;;  %v1711_v62 = vunpack.c.0.s8 %v1710_v59 }
0x158f   :  { %v1516_v26 = vcombine.low %v1489_v2, %v1491_v48  ;;  %v5040_v48 = vmov 0  }
0x1590   :  { %v5407_v63 = vsub.s32 %v1711_v62, %v5080_v4  ;;  %4767 = vset.pattern.permute.xlu0 %v5040_v48  ;;  %4766 = vset.pattern.permute.xlu1 %v5040_v48  ;;  %v4924_v48 = vld [vmem:[#allocation10] sm:$0xff] }
0x1591   :  { %v1523_v34 = vrot.slane %v1516_v26, %v5083_v8 }
0x1592   :  { %1472 = vrot.lane.b32.xlu1 %v1450_v5, %s5037_s4 }
0x1593   :  { %v1465_v6 = vpop.permute.xlu1 %1464 }
0x1594   :  { %v1486_v21 = vsel %vm323_vm2, %v1438_v15, %v1465_v6  ;;  %v1544_v6 = vsub.s32 4, %v5080_v4 }
0x1597   :  { %v1469_v7 = vpop.permute.xlu1 %1468 }
0x1598   :  { %v1488_v22 = vsel %vm323_vm2, %v1440_v54, %v1469_v7  ;;  %v1545_v7 = vrot.slane %v5092_v45, %v1544_v6 }
0x1600   :  { %v1461_v19 = vpop.permute.xlu1 %1460 }
0x1601   :  { %v1484_v23 = vsel %vm323_vm2, %v1436_v16, %v1461_v19 }
0x1602   :  { %v1492_v25 = vcombine.low %v1484_v23, %v1486_v21 }
0x1604   :  { %v1499_v29 = vrot.slane %v1492_v25, %v5083_v8  ;;  %v1473_v27 = vpop.permute.xlu1 %1472 }
0x1605   :  { %v1490_v18 = vsel %vm323_vm2, %v1442_v55, %v1473_v27 }
0x1606   :  { %v1508_v33 = vcombine.low %v1488_v22, %v1490_v18  ;;  %v1524_v37 = vcombine.low %v1499_v29, %v1507_v32 }
0x1608   :  { %v1515_v38 = vrot.slane %v1508_v33, %v5083_v8  ;;  %v1531_v40 = vrot.slane %v1524_v37, %v1530_v35 }
0x160a   :  { %v1532_v39 = vcombine.low %v1515_v38, %v1523_v34 }
0x160c   :  { %v1539_v41 = vrot.slane %v1532_v39, %v1530_v35 }
0x160e   :  { %v5379_v42 = vcombine.low %v1531_v40, %v1539_v41  ;;  %v5381_v43 = vcombine.high %v1531_v40, %v1539_v41 }
0x1610   :  { %4528 = vmatprep.mubr.msk.f32.mxu1 %vm145_vm1, %v5379_v42 }
0x1611   :  { %4529 = vmatmul.mubr.msk.f32.vlgmr.msra.gmra.mxu1 %vm145_vm1, %v5381_v43 }
0x1612   :  { %4543 = vmatpush3.msra.mxu1 %v5389_v49 }
0x1613   :  { %4544 = vmatprep.subr.mxu1 %v5391_v50 }
0x1614   :  { %4545 = vmatpush3.msra.mxu1 %v5391_v50 }
0x1615   :  { %4546 = vmatprep.subr.mxu1 %v5395_v52 }
0x1616   :  { %4547 = vmatpush3.msra.mxu1 %v5395_v52 }
0x1617   :  { %4548 = vmatprep.subr.mxu1 %v5399_v57 }
0x1618   :  { %4549 = vmatpush3.msra.mxu1 %v5399_v57 }
0x1619   :  { %4564 = vmatprep.subr.mxu1 %v5032_v3 }
0x1646   :  { %v5387_v44 = vpop.f32.mrf.mxu0 }
0x1647   :  { %v1715_v5 = vrot.slane %v5387_v44, %v5407_v63 }
0x1648   :  { %v4541_v47 = vpop.f32.mrf.mxu0 }
0x1649   :  { %v1716_v60 = vcombine.high %v1715_v5, %v1715_v5  ;;  %v1723_v11 = vrot.slane %v1715_v5, %v5407_v63 }
0x164b   :  { %v1730_v9 = vrot.slane %v1716_v60, %v5407_v63  ;;  %v1734_v16 = vrot.slane %v1723_v11, %v5141_v56 }
0x164d   :  { %v1738_v14 = vrot.slane %v1730_v9, %v5141_v56 }
0x16d1   :  { %v4530_v12 = vpop.f32.mrf.mxu1 }
0x16d2   :  { %v5415_v13 = vadd.f32 %v4530_v12, %v1545_v7 }
0x16d3   :  { %v1618_v15 = vpop.f32.mrf.mxu1 }
0x16d4   :  { %v5419_v17 = vadd.f32 %v1618_v15, %v1545_v7  ;;  %v1742_v10 = vadd.f32 %v1738_v14, %v5415_v13 }
0x16d6   :  { %v1741_v19 = vadd.f32 %v1734_v16, %v5419_v17 }
0x16d8   :  { %4816 = vtanh.f32 %v1741_v19  ;;  %v1987_v19 = vsub.s32 3, %v5080_v4 }
0x16d9   :  { %4818 = vtanh.f32 %v1742_v10 }
0x16e5   :  { %v4817_v45 = vpop.eup %4816 }
0x16e6   :  { %v4819_v20 = vpop.eup %4818  ;;  %4550 = vmatprep.mubr.msk.f32.mxu1 %vm145_vm1, %v4817_v45 }
0x16e7   :  { %4551 = vmatmul.mubr.msk.f32.vlgmr.msra.gmra.mxu1 %vm145_vm1, %v4819_v20 }
0x16e8   :  { %4565 = vmatpush3.msra.mxu1 %v5326_v30  ;;  %4572 = vmatprep.mubr.msk.f32.mxu1 %vm5033_vm0, %v5032_v3 }
0x16e9   :  { %4566 = vmatprep.subr.mxu1 %v5032_v3 }
0x16ea   :  { %4567 = vmatpush3.msra.mxu1 %v5331_v31 }
0x16eb   :  { %4568 = vmatprep.subr.mxu1 %v5032_v3 }
0x16ec   :  { %4569 = vmatpush3.msra.mxu1 %v5335_v51 }
0x16ed   :  { %4570 = vmatprep.subr.mxu1 %v5032_v3 }
0x16ee   :  { %4571 = vmatpush3.msra.mxu1 %v5339_v46 }
0x16ef   :  { %4586 = vmatprep.subr.mxu1 %v5032_v3 }
0x17a7   :  { %v4552_v21 = vpop.f32.mrf.mxu1 }
0x17a8   :  { %v1834_v23 = vsel %vm1826_vm4, %v4552_v21, -inf }
0x17a9   :  { %v1835_v24 = vrot.slane %v1834_v23, 4  ;;  %v1817_v53 = vpop.f32.mrf.mxu1 }
0x17aa   :  { %v1827_v25 = vsel %vm1826_vm4, %v1817_v53, -inf }
0x17ab   :  { %v1836_v2 = vmax.f32 %v1834_v23, %v1835_v24  ;;  %v1828_v26 = vrot.slane %v1827_v25, 4  ;;  %v5441_v23 = vld [vmem:[#allocation10 + $0x70] sm:$0xff]  ;;  %v1974_v24 = vrot.slane %v5387_v44, %v5083_v8 }
0x17ac   :  { %4554 = vmatpush3.msra.mxu0 %v5441_v23 }
0x17ad   :  { %v1837_v54 = vrot.slane %v1836_v2, 2  ;;  %v1829_v28 = vmax.f32 %v1827_v25, %v1828_v26  ;;  %4555 = vmatprep.subr.mxu0 %v5032_v3  ;;  %v5452_v25 = vld [vmem:[#allocation10 + $0x60] sm:$0xff] }
0x17af   :  { %v1838_v29 = vmax.f32 %v1836_v2, %v1837_v54  ;;  %v1830_v27 = vrot.slane %v1829_v28, 2  ;;  %v5455_v2 = vld [vmem:[#allocation10 + $0x58] sm:$0xff] }
0x17b1   :  { %v1839_v55 = vrot.slane %v1838_v29, 1  ;;  %v1831_v22 = vmax.f32 %v1829_v28, %v1830_v27 }
0x17b3   :  { %v1840_v18 = vmax.f32 %v1838_v29, %v1839_v55  ;;  %v1832_v32 = vrot.slane %v1831_v22, 1 }
0x17b5   :  { %v1842_v33 = vsub.f32 %v4552_v21, %v1840_v18  ;;  %v1833_v34 = vmax.f32 %v1831_v22, %v1832_v32  ;;  %v1988_v21 = vrot.slane %v4924_v48, %v1987_v19 }
0x17b7   :  { %v1845_v35 = vmul.f32 1.442695, %v1842_v33  ;;  %v1841_v37 = vsub.f32 %v1817_v53, %v1833_v34  ;;  %v5447_v53 = vld [vmem:[#allocation10 + $0x68] sm:$0xff] }
0x17b8   :  { %4556 = vmatpush3.msra.mxu0 %v5447_v53 }
0x17b9   :  { %4820 = vpow2.f32 %v1845_v35  ;;  %v1843_v38 = vmul.f32 1.442695, %v1841_v37  ;;  %4557 = vmatprep.subr.mxu0 %v5032_v3 }
0x17ba   :  { %4558 = vmatpush3.msra.mxu0 %v5452_v25 }
0x17bb   :  { %4822 = vpow2.f32 %v1843_v38  ;;  %4559 = vmatprep.subr.mxu0 %v5032_v3 }
0x17bc   :  { %4560 = vmatpush3.msra.mxu0 %v5455_v2 }
0x17bd   :  { %4575 = vmatprep.subr.mxu0 %v5389_v49 }
0x17c6   :  { %v4821_v39 = vpop.eup %4820 }
0x17c7   :  { %v1854_v40 = vsel %vm1826_vm4, %v4821_v39, 0.0 }
0x17c8   :  { %v4823_v41 = vpop.eup %4822  ;;  %v1855_v47 = vrot.slane %v1854_v40, 4 }
0x17c9   :  { %v1847_v58 = vsel %vm1826_vm4, %v4823_v41, 0.0 }
0x17ca   :  { %v1856_v59 = vadd.f32 %v1855_v47, %v1854_v40  ;;  %v1848_v62 = vrot.slane %v1847_v58, 4 }
0x17cc   :  { %v1857_v5 = vrot.slane %v1856_v59, 2  ;;  %v1849_v6 = vadd.f32 %v1848_v62, %v1847_v58 }
0x17ce   :  { %v1858_v60 = vadd.f32 %v1857_v5, %v1856_v59  ;;  %v1850_v7 = vrot.slane %v1849_v6, 2 }
0x17d0   :  { %v1851_v9 = vadd.f32 %v1850_v7, %v1849_v6  ;;  %v1859_v11 = vrot.slane %v1858_v60, 1 }
0x17d2   :  { %v1860_v12 = vadd.f32 %v1859_v11, %v1858_v60  ;;  %v1852_v14 = vrot.slane %v1851_v9, 1 }
0x17d4   :  { %4824 = vrcp.f32 %v1860_v12  ;;  %v1853_v15 = vadd.f32 %v1852_v14, %v1851_v9 }
0x17d6   :  { %4826 = vrcp.f32 %v1853_v15 }
0x17e1   :  { %v4825_v16 = vpop.eup %4824 }
0x17e2   :  { %v1864_v10 = vmul.f32 %v4825_v16, %v4821_v39 }
0x17e3   :  { %v4827_v45 = vpop.eup %4826 }
0x17e4   :  { %1872 = vperm.xlu0 %4767, %v1864_v10   ;;  %v1863_v20 = vmul.f32 %v4827_v45, %v4823_v41 }
0x17e6   :  { %1867 = vperm.xlu1 %4766, %v1863_v20  }
0x17ea   :  { %1990 = vrot.lane.b32.xlu1 %v1988_v21, %s5035_s2 }
0x17ee   :  { %1975 = vrot.lane.b32.xlu1 %v1974_v24, %s5035_s2 }
0x185f   :  { %v1873_v26 = vpop.permute.xlu0 %1872 }
0x1860   :  { %v1876_v54 = vmul.f32 %v1873_v26, %v5381_v43 }
0x1861   :  { %v1868_v28 = vpop.permute.xlu1 %1867 }
0x1862   :  { %v1884_v29 = vsel %vm145_vm1, %v1876_v54, 0.0  ;;  %v1875_v27 = vmul.f32 %v1868_v28, %v5379_v42 }
0x1863   :  { %v1885_v55 = vrot.slane %v1884_v29, 4 }
0x1864   :  { %v1877_v22 = vsel %vm145_vm1, %v1875_v27, 0.0 }
0x1865   :  { %v1886_v18 = vadd.f32 %v1885_v55, %v1884_v29  ;;  %v1878_v32 = vrot.slane %v1877_v22, 4  ;;  %v5464_v33 = vpop.permute.xlu1 %1990 }
0x1866   :  { %v1993_v34 = vadd.f32 %v5464_v33, %v5387_v44  ;;  %v5485_v44 = vadd.f32 %v5154_v1, %v5149_v61 }
0x1867   :  { %v1887_v35 = vrot.slane %v1886_v18, 2  ;;  %v1879_v37 = vadd.f32 %v1878_v32, %v1877_v22 }
0x1868   :  { %v2001_v38 = vrot.slane %v1993_v34, %v5083_v8  ;;  %v5489_v6 = vrot.slane %v5485_v44, %v5083_v8 }
0x1869   :  { %v1888_v39 = vadd.f32 %v1887_v35, %v1886_v18  ;;  %v1880_v40 = vrot.slane %v1879_v37, 2  ;;  %v1976_v9 = vpop.permute.xlu1 %1975 }
0x186a   :  { %2002 = vrot.lane.b32.xlu0 %v2001_v38, %s5026_s17 }
0x186b   :  { %v1889_v41 = vrot.slane %v1888_v39, 1  ;;  %v1881_v47 = vadd.f32 %v1880_v40, %v1879_v37 }
0x186d   :  { %v1882_v58 = vrot.slane %v1881_v47, 1  ;;  %v1890_v59 = vadd.f32 %v1889_v41, %v1888_v39 }
0x186f   :  { %v1883_v62 = vadd.f32 %v1882_v58, %v1881_v47 }
0x1871   :  { %v5471_v5 = vsel %vm1893_vm5, %v1890_v59, %v1883_v62 }
0x1872   :  { %4562 = vmatmul.mubr.msk.f32.vlgmr.msra.gmra.mxu0 %vm145_vm1, %v5471_v5 }
0x1873   :  { %4576 = vmatpush3.msra.mxu0 %v5389_v49 }
0x1874   :  { %4577 = vmatprep.subr.mxu0 %v5391_v50 }
0x1875   :  { %4578 = vmatpush3.msra.mxu0 %v5391_v50 }
0x1876   :  { %4579 = vmatprep.subr.mxu0 %v5395_v52 }
0x1877   :  { %4580 = vmatpush3.msra.mxu0 %v5395_v52 }
0x1878   :  { %4581 = vmatprep.subr.mxu0 %v5399_v57 }
0x1879   :  { %4582 = vmatpush3.msra.mxu0 %v5399_v57 }
0x187a   :  { %4597 = vmatprep.subr.mxu0 %v5032_v3 }
0x18dc   :  { %v2003_v19 = vpop.permute.xlu0 %2002 }
0x1932   :  { %v1963_v60 = vpop.f32.mrf.mxu0 }
0x1933   :  { %v1967_v7 = vadd.f32 %v1963_v60, %v5489_v6 }
0x1934   :  { %v4563_v11 = vpop.f32.mrf.mxu0 }
0x1935   :  { %v1978_v12 = vadd.f32 %v1976_v9, %v1967_v7 }
0x1937   :  { %v4220_v14 = vmul.f32 -1.442695, %v1978_v12 }
0x1939   :  { %4828 = vpow2.f32 %v4220_v14 }
0x1946   :  { %v4829_v15 = vpop.eup %4828 }
0x1947   :  { %v1982_v16 = vadd.f32 1.0, %v4829_v15 }
0x1949   :  { %4830 = vrcp.f32 %v1982_v16 }
0x1956   :  { %v4831_v10 = vpop.eup %4830 }
0x1957   :  { %v2005_v45 = vmul.f32 %v4831_v10, %v2003_v19  ;;  %v2012_v48 = vsub.f32 1.0, %v4831_v10  ;;  %v2018_v24 = vmul.f32 %v4831_v10, %v5346_v36 }
0x1959   :  { %2007 = vrot.lane.b32.xlu1 %v2005_v45, %s5034_s0 }
0x19cb   :  { %v2008_v61 = vpop.permute.xlu1 %2007 }
0x19cc   :  { %v2010_v1 = vadd.f32 %v2008_v61, %v1967_v7 }
0x19ce   :  { %4832 = vtanh.f32 %v2010_v1 }
0x19db   :  { %v4833_v20 = vpop.eup %4832 }
0x19dc   :  { %2014 = vrot.lane.b32.xlu0 %v4833_v20, %s5035_s2 }
0x1a4e   :  { %v2015_v21 = vpop.permute.xlu0 %2014 }
0x1a4f   :  { %v2017_v26 = vmul.f32 %v2015_v21, %v2012_v48 }
0x1a51   :  { %v5495_v54 = vadd.f32 %v2018_v24, %v2017_v26 }
0x1a53   :  { %v2027_v28 = vrot.slane %v5495_v54, %v5083_v8 }
0x1a55   :  { %2028 = vrot.lane.b32.xlu1 %v2027_v28, %s5035_s2 }
0x1ac7   :  { %v5500_v29 = vpop.permute.xlu1 %2028 }
0x1ac8   :  { %4573 = vmatmul.mubr.msk.f32.vlgmr.msra.gmra.mxu1 %vm145_vm1, %v5500_v29 }
0x1ac9   :  { %4587 = vmatpush3.msra.mxu1 %v5441_v23  ;;  %4594 = vmatprep.mubr.msk.f32.mxu1 %vm5033_vm0, %v5032_v3 }
0x1aca   :  { %4588 = vmatprep.subr.mxu1 %v5032_v3 }
0x1acb   :  { %4589 = vmatpush3.msra.mxu1 %v5447_v53 }
0x1acc   :  { %4590 = vmatprep.subr.mxu1 %v5032_v3 }
0x1acd   :  { %4591 = vmatpush3.msra.mxu1 %v5452_v25 }
0x1ace   :  { %4592 = vmatprep.subr.mxu1 %v5032_v3 }
0x1acf   :  { %4593 = vmatpush3.msra.mxu1 %v5455_v2 }
0x1ad0   :  { %4608 = vmatprep.subr.mxu1 %v5389_v49 }
0x1b88   :  { %v5514_v36 = vpop.f32.mrf.mxu1 }
0x1b89   :  { %v2115_v27 = vrot.slane %v5514_v36, %v5407_v63 }
0x1b8a   :  { %v4574_v55 = vpop.f32.mrf.mxu1 }
0x1b8b   :  { %v2116_v22 = vcombine.high %v2115_v27, %v2115_v27  ;;  %v2123_v18 = vrot.slane %v2115_v27, %v5407_v63 }
0x1b8d   :  { %v2130_v32 = vrot.slane %v2116_v22, %v5407_v63  ;;  %v2134_v34 = vrot.slane %v2123_v18, %v5141_v56 }
0x1b8f   :  { %v2138_v35 = vrot.slane %v2130_v32, %v5141_v56  ;;  %v2141_v37 = vadd.f32 %v2134_v34, %v5419_v17 }
0x1b91   :  { %v2142_v38 = vadd.f32 %v2138_v35, %v5415_v13  ;;  %4834 = vtanh.f32 %v2141_v37 }
0x1b93   :  { %4836 = vtanh.f32 %v2142_v38 }
0x1b9e   :  { %v4835_v39 = vpop.eup %4834 }
0x1b9f   :  { %4583 = vmatprep.mubr.msk.f32.mxu0 %vm145_vm1, %v4835_v39 }
0x1ba0   :  { %v4837_v40 = vpop.eup %4836 }
0x1ba1   :  { %4584 = vmatmul.mubr.msk.f32.vlgmr.msra.gmra.mxu0 %vm145_vm1, %v4837_v40 }
0x1ba2   :  { %4598 = vmatpush3.msra.mxu0 %v5326_v30  ;;  %4605 = vmatprep.mubr.msk.f32.mxu0 %vm5033_vm0, %v5032_v3 }
0x1ba3   :  { %4599 = vmatprep.subr.mxu0 %v5032_v3 }
0x1ba4   :  { %4600 = vmatpush3.msra.mxu0 %v5331_v31 }
0x1ba5   :  { %4601 = vmatprep.subr.mxu0 %v5032_v3 }
0x1ba6   :  { %4602 = vmatpush3.msra.mxu0 %v5335_v51 }
0x1ba7   :  { %4603 = vmatprep.subr.mxu0 %v5032_v3 }
0x1ba8   :  { %4604 = vmatpush3.msra.mxu0 %v5339_v46 }
0x1ba9   :  { %4619 = vmatprep.subr.mxu0 %v5032_v3 }
0x1c61   :  { %v4585_v41 = vpop.f32.mrf.mxu0 }
0x1c62   :  { %v2233_v47 = vsel %vm1826_vm4, %v4585_v41, -inf }
0x1c63   :  { %v2234_v58 = vrot.slane %v2233_v47, 4  ;;  %v2217_v59 = vpop.f32.mrf.mxu0 }
0x1c64   :  { %v2226_v62 = vsel %vm1826_vm4, %v2217_v59, -inf }
0x1c65   :  { %v2235_v60 = vmax.f32 %v2233_v47, %v2234_v58  ;;  %v2227_v7 = vrot.slane %v2226_v62, 4 }
0x1c67   :  { %v2236_v9 = vrot.slane %v2235_v60, 2  ;;  %v2228_v11 = vmax.f32 %v2226_v62, %v2227_v7 }
0x1c69   :  { %v2237_v12 = vmax.f32 %v2235_v60, %v2236_v9  ;;  %v2229_v14 = vrot.slane %v2228_v11, 2  ;;  %v2372_v9 = vrot.slane %v5514_v36, %v5083_v8 }
0x1c6b   :  { %v2238_v15 = vrot.slane %v2237_v12, 1  ;;  %v2230_v16 = vmax.f32 %v2228_v11, %v2229_v14 }
0x1c6d   :  { %v2239_v10 = vmax.f32 %v2237_v12, %v2238_v15  ;;  %v2231_v19 = vrot.slane %v2230_v16, 1 }
0x1c6f   :  { %v2241_v45 = vsub.f32 %v4585_v41, %v2239_v10  ;;  %v2232_v61 = vmax.f32 %v2230_v16, %v2231_v19 }
0x1c71   :  { %v2244_v1 = vmul.f32 1.442695, %v2241_v45  ;;  %v2240_v20 = vsub.f32 %v2217_v59, %v2232_v61  ;;  %v2383_v59 = vadd.f32 %v5514_v36, %v5464_v33 }
0x1c73   :  { %4838 = vpow2.f32 %v2244_v1  ;;  %v2242_v48 = vmul.f32 1.442695, %v2240_v20  ;;  %v2391_v7 = vrot.slane %v2383_v59, %v5083_v8 }
0x1c75   :  { %4840 = vpow2.f32 %v2242_v48 }
0x1c80   :  { %v4839_v21 = vpop.eup %4838 }
0x1c81   :  { %v2253_v24 = vsel %vm1826_vm4, %v4839_v21, 0.0 }
0x1c82   :  { %v4841_v26 = vpop.eup %4840  ;;  %v2254_v28 = vrot.slane %v2253_v24, 4 }
0x1c83   :  { %v2246_v27 = vsel %vm1826_vm4, %v4841_v26, 0.0 }
0x1c84   :  { %v2255_v55 = vadd.f32 %v2254_v28, %v2253_v24  ;;  %v2247_v22 = vrot.slane %v2246_v27, 4 }
0x1c86   :  { %v2256_v18 = vrot.slane %v2255_v55, 2  ;;  %v2248_v32 = vadd.f32 %v2247_v22, %v2246_v27  ;;  %v420_v22 = vcombine.high %v5489_v6, %v5489_v6 }
0x1c88   :  { %v2257_v34 = vadd.f32 %v2256_v18, %v2255_v55  ;;  %v2249_v35 = vrot.slane %v2248_v32, 2 }
0x1c8a   :  { %v2250_v37 = vadd.f32 %v2249_v35, %v2248_v32  ;;  %v2258_v38 = vrot.slane %v2257_v34, 1 }
0x1c8c   :  { %v2259_v39 = vadd.f32 %v2258_v38, %v2257_v34  ;;  %v2251_v40 = vrot.slane %v2250_v37, 1 }
0x1c8e   :  { %4842 = vrcp.f32 %v2259_v39  ;;  %v2252_v41 = vadd.f32 %v2251_v40, %v2250_v37 }
0x1c90   :  { %4844 = vrcp.f32 %v2252_v41 }
0x1c9b   :  { %v4843_v47 = vpop.eup %4842 }
0x1c9c   :  { %v2263_v58 = vmul.f32 %v4843_v47, %v4839_v21 }
0x1c9d   :  { %v4845_v62 = vpop.eup %4844 }
0x1c9e   :  { %2271 = vperm.xlu1 %4766, %v2263_v58   ;;  %v2262_v60 = vmul.f32 %v4845_v62, %v4841_v26 }
0x1ca0   :  { %2266 = vperm.xlu0 %4767, %v2262_v60  }
0x1ca2   :  { %2392 = vrot.lane.b32.xlu1 %v2391_v7, %s5026_s17 }
0x1ca4   :  { %2373 = vrot.lane.b32.xlu0 %v2372_v9, %s5035_s2 }
0x1d19   :  { %v2272_v11 = vpop.permute.xlu1 %2271 }
0x1d1a   :  { %v2275_v12 = vmul.f32 %v2272_v11, %v5381_v43 }
0x1d1b   :  { %v2267_v14 = vpop.permute.xlu0 %2266 }
0x1d1c   :  { %v2283_v15 = vsel %vm145_vm1, %v2275_v12, 0.0  ;;  %v2274_v16 = vmul.f32 %v2267_v14, %v5379_v42 }
0x1d1d   :  { %v2284_v10 = vrot.slane %v2283_v15, 4  ;;  %v2393_v47 = vpop.permute.xlu1 %2392 }
0x1d1e   :  { %v2276_v19 = vsel %vm145_vm1, %v2274_v16, 0.0 }
0x1d1f   :  { %v2285_v45 = vadd.f32 %v2284_v10, %v2283_v15  ;;  %v2277_v61 = vrot.slane %v2276_v19, 4  ;;  %v2374_v34 = vpop.permute.xlu0 %2373 }
0x1d21   :  { %v2286_v1 = vrot.slane %v2285_v45, 2  ;;  %v2278_v20 = vadd.f32 %v2277_v61, %v2276_v19 }
0x1d23   :  { %v2287_v36 = vadd.f32 %v2286_v1, %v2285_v45  ;;  %v2279_v48 = vrot.slane %v2278_v20, 2 }
0x1d25   :  { %v2288_v21 = vrot.slane %v2287_v36, 1  ;;  %v2280_v24 = vadd.f32 %v2279_v48, %v2278_v20 }
0x1d27   :  { %v2281_v26 = vrot.slane %v2280_v24, 1  ;;  %v2289_v28 = vadd.f32 %v2288_v21, %v2287_v36 }
0x1d29   :  { %v2282_v27 = vadd.f32 %v2281_v26, %v2280_v24 }
0x1d2b   :  { %v5552_v55 = vsel %vm1893_vm5, %v2289_v28, %v2282_v27 }
0x1d2c   :  { %4595 = vmatmul.mubr.msk.f32.vlgmr.msra.gmra.mxu1 %vm145_vm1, %v5552_v55 }
0x1d2d   :  { %4609 = vmatpush3.msra.mxu1 %v5389_v49 }
0x1d2e   :  { %4610 = vmatprep.subr.mxu1 %v5391_v50 }
0x1d2f   :  { %4611 = vmatpush3.msra.mxu1 %v5391_v50 }
0x1d30   :  { %4612 = vmatprep.subr.mxu1 %v5395_v52 }
0x1d31   :  { %4613 = vmatpush3.msra.mxu1 %v5395_v52 }
0x1d32   :  { %4614 = vmatprep.subr.mxu1 %v5399_v57 }
0x1d33   :  { %4615 = vmatpush3.msra.mxu1 %v5399_v57 }
0x1d34   :  { %4630 = vmatprep.subr.mxu1 %v5032_v3 }
0x1dec   :  { %v2361_v18 = vpop.f32.mrf.mxu1 }
0x1ded   :  { %v2365_v32 = vadd.f32 %v2361_v18, %v420_v22 }
0x1dee   :  { %v4596_v35 = vpop.f32.mrf.mxu1 }
0x1def   :  { %v2376_v37 = vadd.f32 %v2374_v34, %v2365_v32 }
0x1df1   :  { %v4225_v38 = vmul.f32 -1.442695, %v2376_v37 }
0x1df3   :  { %4846 = vpow2.f32 %v4225_v38 }
0x1e00   :  { %v4847_v39 = vpop.eup %4846 }
0x1e01   :  { %v2380_v40 = vadd.f32 1.0, %v4847_v39 }
0x1e03   :  { %4848 = vrcp.f32 %v2380_v40 }
0x1e10   :  { %v4849_v41 = vpop.eup %4848 }
0x1e11   :  { %v2395_v58 = vmul.f32 %v4849_v41, %v2393_v47  ;;  %v2402_v6 = vsub.f32 1.0, %v4849_v41  ;;  %v2408_v9 = vmul.f32 %v4849_v41, %v5495_v54 }
0x1e13   :  { %2397 = vrot.lane.b32.xlu0 %v2395_v58, %s5034_s0 }
0x1e85   :  { %v2398_v59 = vpop.permute.xlu0 %2397 }
0x1e86   :  { %v2400_v62 = vadd.f32 %v2398_v59, %v2365_v32 }
0x1e88   :  { %4850 = vtanh.f32 %v2400_v62 }
0x1e95   :  { %v4851_v60 = vpop.eup %4850 }
0x1e96   :  { %2404 = vrot.lane.b32.xlu1 %v4851_v60, %s5035_s2 }
0x1f08   :  { %v2405_v7 = vpop.permute.xlu1 %2404 }
0x1f09   :  { %v2407_v11 = vmul.f32 %v2405_v7, %v2402_v6 }
0x1f0b   :  { %v5569_v12 = vadd.f32 %v2408_v9, %v2407_v11 }
0x1f0d   :  { %v2417_v14 = vrot.slane %v5569_v12, %v5083_v8 }
0x1f0f   :  { %2418 = vrot.lane.b32.xlu0 %v2417_v14, %s5035_s2 }
0x1f81   :  { %v5574_v15 = vpop.permute.xlu0 %2418 }
0x1f82   :  { %4606 = vmatmul.mubr.msk.f32.vlgmr.msra.gmra.mxu0 %vm145_vm1, %v5574_v15 }
0x1f83   :  { %4620 = vmatpush3.msra.mxu0 %v5441_v23  ;;  %4627 = vmatprep.mubr.msk.f32.mxu0 %vm5033_vm0, %v5032_v3 }
0x1f84   :  { %4621 = vmatprep.subr.mxu0 %v5032_v3 }
0x1f85   :  { %4622 = vmatpush3.msra.mxu0 %v5447_v53 }
0x1f86   :  { %4623 = vmatprep.subr.mxu0 %v5032_v3 }
0x1f87   :  { %4624 = vmatpush3.msra.mxu0 %v5452_v25 }
0x1f88   :  { %4625 = vmatprep.subr.mxu0 %v5032_v3 }
0x1f89   :  { %4626 = vmatpush3.msra.mxu0 %v5455_v2 }
0x1f8a   :  { %4641 = vmatprep.subr.mxu0 %v5389_v49 }
0x2042   :  { %v5588_v54 = vpop.f32.mrf.mxu0 }
0x2043   :  { %v2506_v16 = vrot.slane %v5588_v54, %v5407_v63 }
0x2044   :  { %v4607_v10 = vpop.f32.mrf.mxu0 }
0x2045   :  { %v2507_v19 = vcombine.high %v2506_v16, %v2506_v16  ;;  %v2514_v45 = vrot.slane %v2506_v16, %v5407_v63 }
0x2047   :  { %v2521_v61 = vrot.slane %v2507_v19, %v5407_v63  ;;  %v2525_v1 = vrot.slane %v2514_v45, %v5141_v56 }
0x2049   :  { %v2529_v20 = vrot.slane %v2521_v61, %v5141_v56  ;;  %v2532_v36 = vadd.f32 %v2525_v1, %v5419_v17 }
0x204b   :  { %v2533_v48 = vadd.f32 %v2529_v20, %v5415_v13  ;;  %4852 = vtanh.f32 %v2532_v36 }
0x204d   :  { %4854 = vtanh.f32 %v2533_v48 }
0x2058   :  { %v4853_v21 = vpop.eup %4852 }
0x2059   :  { %4616 = vmatprep.mubr.msk.f32.mxu1 %vm145_vm1, %v4853_v21 }
0x205a   :  { %v4855_v24 = vpop.eup %4854 }
0x205b   :  { %4617 = vmatmul.mubr.msk.f32.vlgmr.msra.gmra.mxu1 %vm145_vm1, %v4855_v24 }
0x205c   :  { %4631 = vmatpush3.msra.mxu1 %v5326_v30  ;;  %4638 = vmatprep.mubr.msk.f32.mxu1 %vm5033_vm0, %v5032_v3 }
0x205d   :  { %4632 = vmatprep.subr.mxu1 %v5032_v3 }
0x205e   :  { %4633 = vmatpush3.msra.mxu1 %v5331_v31 }
0x205f   :  { %4634 = vmatprep.subr.mxu1 %v5032_v3 }
0x2060   :  { %4635 = vmatpush3.msra.mxu1 %v5335_v51 }
0x2061   :  { %4636 = vmatprep.subr.mxu1 %v5032_v3 }
0x2062   :  { %4637 = vmatpush3.msra.mxu1 %v5339_v46 }
0x2063   :  { %4652 = vmatprep.subr.mxu1 %v5032_v3 }
0x211b   :  { %v4618_v26 = vpop.f32.mrf.mxu1 }
0x211c   :  { %v2624_v30 = vsel %vm1826_vm4, %v4618_v26, -inf }
0x211d   :  { %v2625_v28 = vrot.slane %v2624_v30, 4  ;;  %v2608_v27 = vpop.f32.mrf.mxu1 }
0x211e   :  { %v2617_v22 = vsel %vm1826_vm4, %v2608_v27, -inf }
0x211f   :  { %v2626_v18 = vmax.f32 %v2624_v30, %v2625_v28  ;;  %v2618_v32 = vrot.slane %v2617_v22, 4 }
0x2121   :  { %v2627_v31 = vrot.slane %v2626_v18, 2  ;;  %v2619_v34 = vmax.f32 %v2617_v22, %v2618_v32  ;;  %v2763_v22 = vrot.slane %v5588_v54, %v5083_v8 }
0x2123   :  { %v2628_v35 = vmax.f32 %v2626_v18, %v2627_v31  ;;  %v2620_v37 = vrot.slane %v2619_v34, 2 }
0x2125   :  { %v2629_v51 = vrot.slane %v2628_v35, 1  ;;  %v2621_v38 = vmax.f32 %v2619_v34, %v2620_v37 }
0x2127   :  { %v2630_v39 = vmax.f32 %v2628_v35, %v2629_v51  ;;  %v2622_v40 = vrot.slane %v2621_v38, 1 }
0x2129   :  { %v2632_v46 = vsub.f32 %v4618_v26, %v2630_v39  ;;  %v2623_v41 = vmax.f32 %v2621_v38, %v2622_v40  ;;  %v2774_v26 = vadd.f32 %v5588_v54, %v5464_v33 }
0x212b   :  { %v2635_v47 = vmul.f32 1.442695, %v2632_v46  ;;  %v2631_v58 = vsub.f32 %v2608_v27, %v2623_v41  ;;  %v2782_v27 = vrot.slane %v2774_v26, %v5083_v8 }
0x212d   :  { %4856 = vpow2.f32 %v2635_v47  ;;  %v2633_v59 = vmul.f32 1.442695, %v2631_v58 }
0x212f   :  { %4858 = vpow2.f32 %v2633_v59 }
0x213a   :  { %v4857_v62 = vpop.eup %4856 }
0x213b   :  { %v2644_v60 = vsel %vm1826_vm4, %v4857_v62, 0.0 }
0x213c   :  { %v4859_v6 = vpop.eup %4858  ;;  %v2645_v7 = vrot.slane %v2644_v60, 4 }
0x213d   :  { %v2637_v9 = vsel %vm1826_vm4, %v4859_v6, 0.0 }
0x213e   :  { %v2646_v11 = vadd.f32 %v2645_v7, %v2644_v60  ;;  %v2638_v14 = vrot.slane %v2637_v9, 4  ;;  %v405_v7 = vcombine.high %v5485_v44, %v5485_v44 }
0x2140   :  { %v2647_v16 = vrot.slane %v2646_v11, 2  ;;  %v2639_v10 = vadd.f32 %v2638_v14, %v2637_v9  ;;  %v5641_v9 = vrot.slane %v405_v7, %v5083_v8 }
0x2142   :  { %v2648_v19 = vadd.f32 %v2647_v16, %v2646_v11  ;;  %v2640_v45 = vrot.slane %v2639_v10, 2 }
0x2144   :  { %v2641_v61 = vadd.f32 %v2640_v45, %v2639_v10  ;;  %v2649_v1 = vrot.slane %v2648_v19, 1 }
0x2146   :  { %v2650_v20 = vadd.f32 %v2649_v1, %v2648_v19  ;;  %v2642_v36 = vrot.slane %v2641_v61, 1 }
0x2148   :  { %4860 = vrcp.f32 %v2650_v20  ;;  %v2643_v48 = vadd.f32 %v2642_v36, %v2641_v61 }
0x214a   :  { %4862 = vrcp.f32 %v2643_v48 }
0x2155   :  { %v4861_v21 = vpop.eup %4860 }
0x2156   :  { %v2654_v24 = vmul.f32 %v4861_v21, %v4857_v62 }
0x2157   :  { %v4863_v30 = vpop.eup %4862 }
0x2158   :  { %2662 = vperm.xlu0 %4767, %v2654_v24   ;;  %v2653_v28 = vmul.f32 %v4863_v30, %v4859_v6 }
0x215a   :  { %2657 = vperm.xlu1 %4766, %v2653_v28  }
0x215c   :  { %2783 = vrot.lane.b32.xlu0 %v2782_v27, %s5026_s17 }
0x215e   :  { %2764 = vrot.lane.b32.xlu1 %v2763_v22, %s5035_s2 }
0x21d3   :  { %v2663_v18 = vpop.permute.xlu0 %2662 }
0x21d4   :  { %v2666_v32 = vmul.f32 %v2663_v18, %v5381_v43 }
0x21d5   :  { %v2658_v31 = vpop.permute.xlu1 %2657 }
0x21d6   :  { %v2674_v34 = vsel %vm145_vm1, %v2666_v32, 0.0  ;;  %v2665_v35 = vmul.f32 %v2658_v31, %v5379_v42 }
0x21d7   :  { %v2675_v37 = vrot.slane %v2674_v34, 4  ;;  %v2784_v61 = vpop.permute.xlu0 %2783 }
0x21d8   :  { %v2667_v51 = vsel %vm145_vm1, %v2665_v35, 0.0 }
0x21d9   :  { %v2676_v38 = vadd.f32 %v2675_v37, %v2674_v34  ;;  %v2668_v39 = vrot.slane %v2667_v51, 4 }
0x21db   :  { %v2677_v40 = vrot.slane %v2676_v38, 2  ;;  %v2669_v46 = vadd.f32 %v2668_v39, %v2667_v51 }
0x21dd   :  { %v2678_v54 = vadd.f32 %v2677_v40, %v2676_v38  ;;  %v2670_v41 = vrot.slane %v2669_v46, 2  ;;  %v5678_v40 = vld [vmem:[#allocation10 + $0x90] sm:$0xff] }
0x21df   :  { %v2679_v47 = vrot.slane %v2678_v54, 1  ;;  %v2671_v58 = vadd.f32 %v2670_v41, %v2669_v46  ;;  %v5684_v46 = vld [vmem:[#allocation10 + $0x88] sm:$0xff]  ;;  %v5692_v41 = vld [vmem:[#allocation10 + $0x78] sm:$0xff] }
0x21e1   :  { %v2672_v59 = vrot.slane %v2671_v58, 1  ;;  %v2680_v62 = vadd.f32 %v2679_v47, %v2678_v54  ;;  %v5688_v54 = vld [vmem:[#allocation10 + $0x80] sm:$0xff] }
0x21e3   :  { %v2673_v60 = vadd.f32 %v2672_v59, %v2671_v58 }
0x21e5   :  { %v5626_v6 = vsel %vm1893_vm5, %v2680_v62, %v2673_v60 }
0x21e6   :  { %4628 = vmatmul.mubr.msk.f32.vlgmr.msra.gmra.mxu0 %vm145_vm1, %v5626_v6 }
0x21e7   :  { %4642 = vmatpush3.msra.mxu0 %v5389_v49 }
0x21e8   :  { %4643 = vmatprep.subr.mxu0 %v5391_v50 }
0x21e9   :  { %4644 = vmatpush3.msra.mxu0 %v5391_v50  ;;  %v2765_v50 = vpop.permute.xlu1 %2764 }
0x21ea   :  { %4645 = vmatprep.subr.mxu0 %v5395_v52 }
0x21eb   :  { %4646 = vmatpush3.msra.mxu0 %v5395_v52 }
0x21ec   :  { %4647 = vmatprep.subr.mxu0 %v5399_v57 }
0x21ed   :  { %4648 = vmatpush3.msra.mxu0 %v5399_v57 }
0x21ee   :  { %4663 = vmatprep.subr.mxu0 %v5032_v3 }
0x22a6   :  { %v2752_v11 = vpop.f32.mrf.mxu0 }
0x22a7   :  { %v2756_v14 = vadd.f32 %v2752_v11, %v5641_v9 }
0x22a8   :  { %v4629_v16 = vpop.f32.mrf.mxu0 }
0x22a9   :  { %v2767_v10 = vadd.f32 %v2765_v50, %v2756_v14 }
0x22ab   :  { %v4230_v19 = vmul.f32 -1.442695, %v2767_v10 }
0x22ad   :  { %4864 = vpow2.f32 %v4230_v19 }
0x22ba   :  { %v4865_v52 = vpop.eup %4864 }
0x22bb   :  { %v2771_v45 = vadd.f32 1.0, %v4865_v52 }
0x22bd   :  { %4866 = vrcp.f32 %v2771_v45 }
0x22ca   :  { %v4867_v57 = vpop.eup %4866 }
0x22cb   :  { %v2786_v1 = vmul.f32 %v4867_v57, %v2784_v61  ;;  %v2793_v48 = vsub.f32 1.0, %v4867_v57  ;;  %v2799_v24 = vmul.f32 %v4867_v57, %v5569_v12 }
0x22cd   :  { %2788 = vrot.lane.b32.xlu1 %v2786_v1, %s5034_s0 }
0x233f   :  { %v2789_v44 = vpop.permute.xlu1 %2788 }
0x2340   :  { %v2791_v20 = vadd.f32 %v2789_v44, %v2756_v14 }
0x2342   :  { %4868 = vtanh.f32 %v2791_v20 }
0x234f   :  { %v4869_v36 = vpop.eup %4868 }
0x2350   :  { %2795 = vrot.lane.b32.xlu0 %v4869_v36, %s5035_s2 }
0x23c2   :  { %v2796_v21 = vpop.permute.xlu0 %2795 }
0x23c3   :  { %v2798_v26 = vmul.f32 %v2796_v21, %v2793_v48 }
0x23c5   :  { %v5647_v30 = vadd.f32 %v2799_v24, %v2798_v26 }
0x23c7   :  { %v2808_v28 = vrot.slane %v5647_v30, %v5083_v8 }
0x23c9   :  { %2809 = vrot.lane.b32.xlu1 %v2808_v28, %s5035_s2 }
0x243b   :  { %v5652_v27 = vpop.permute.xlu1 %2809 }
0x243c   :  { %4639 = vmatmul.mubr.msk.f32.vlgmr.msra.gmra.mxu1 %vm145_vm1, %v5652_v27 }
0x243d   :  { %4653 = vmatpush3.msra.mxu1 %v5441_v23  ;;  %4660 = vmatprep.mubr.msk.f32.mxu1 %vm5033_vm0, %v5032_v3 }
0x243e   :  { %4654 = vmatprep.subr.mxu1 %v5032_v3 }
0x243f   :  { %4655 = vmatpush3.msra.mxu1 %v5447_v53 }
0x2440   :  { %4656 = vmatprep.subr.mxu1 %v5032_v3 }
0x2441   :  { %4657 = vmatpush3.msra.mxu1 %v5452_v25 }
0x2442   :  { %4658 = vmatprep.subr.mxu1 %v5032_v3 }
0x2443   :  { %4659 = vmatpush3.msra.mxu1 %v5455_v2 }
0x2444   :  { %4674 = vmatprep.subr.mxu1 %v5389_v49 }
0x24fc   :  { %v5666_v12 = vpop.f32.mrf.mxu1 }
0x24fd   :  { %v2897_v22 = vrot.slane %v5666_v12, %v5407_v63 }
0x24fe   :  { %v4640_v18 = vpop.f32.mrf.mxu1 }
0x24ff   :  { %v2898_v32 = vcombine.high %v2897_v22, %v2897_v22  ;;  %v2905_v31 = vrot.slane %v2897_v22, %v5407_v63 }
0x2501   :  { %v2912_v34 = vrot.slane %v2898_v32, %v5407_v63  ;;  %v2916_v35 = vrot.slane %v2905_v31, %v5141_v56 }
0x2503   :  { %v2920_v37 = vrot.slane %v2912_v34, %v5141_v56  ;;  %v2923_v51 = vadd.f32 %v2916_v35, %v5419_v17 }
0x2505   :  { %v2924_v38 = vadd.f32 %v2920_v37, %v5415_v13  ;;  %4870 = vtanh.f32 %v2923_v51 }
0x2507   :  { %4872 = vtanh.f32 %v2924_v38 }
0x2512   :  { %v4871_v49 = vpop.eup %4870 }
0x2513   :  { %4649 = vmatprep.mubr.msk.f32.mxu0 %vm145_vm1, %v4871_v49 }
0x2514   :  { %v4873_v39 = vpop.eup %4872 }
0x2515   :  { %4650 = vmatmul.mubr.msk.f32.vlgmr.msra.gmra.mxu0 %vm145_vm1, %v4873_v39 }
0x2516   :  { %4664 = vmatpush3.msra.mxu0 %v5678_v40  ;;  %4671 = vmatprep.mubr.msk.f32.mxu0 %vm5033_vm0, %v5032_v3 }
0x2517   :  { %4665 = vmatprep.subr.mxu0 %v5032_v3 }
0x2518   :  { %4666 = vmatpush3.msra.mxu0 %v5684_v46 }
0x2519   :  { %4667 = vmatprep.subr.mxu0 %v5032_v3 }
0x251a   :  { %4668 = vmatpush3.msra.mxu0 %v5688_v54 }
0x251b   :  { %4669 = vmatprep.subr.mxu0 %v5032_v3 }
0x251c   :  { %4670 = vmatpush3.msra.mxu0 %v5692_v41 }
0x251d   :  { %4685 = vmatprep.subr.mxu0 %v5032_v3 }
0x25d5   :  { %v4651_v47 = vpop.f32.mrf.mxu0 }
0x25d6   :  { %v3015_v58 = vsel %vm1826_vm4, %v4651_v47, -inf }
0x25d7   :  { %v3016_v59 = vrot.slane %v3015_v58, 4  ;;  %v2999_v62 = vpop.f32.mrf.mxu0 }
0x25d8   :  { %v3008_v60 = vsel %vm1826_vm4, %v2999_v62, -inf }
0x25d9   :  { %v3017_v7 = vmax.f32 %v3015_v58, %v3016_v59  ;;  %v3009_v11 = vrot.slane %v3008_v60, 4  ;;  %v3165_v59 = vadd.f32 %v5666_v12, %v5464_v33 }
0x25db   :  { %v3018_v14 = vrot.slane %v3017_v7, 2  ;;  %v3010_v50 = vmax.f32 %v3008_v60, %v3009_v11  ;;  %v3154_v11 = vrot.slane %v5666_v12, %v5083_v8 }
0x25dd   :  { %v3019_v16 = vmax.f32 %v3017_v7, %v3018_v14  ;;  %v3011_v10 = vrot.slane %v3010_v50, 2  ;;  %v3173_v7 = vrot.slane %v3165_v59, %v5083_v8 }
0x25df   :  { %v3020_v19 = vrot.slane %v3019_v16, 1  ;;  %v3012_v52 = vmax.f32 %v3010_v50, %v3011_v10 }
0x25e1   :  { %v3021_v45 = vmax.f32 %v3019_v16, %v3020_v19  ;;  %v3013_v57 = vrot.slane %v3012_v52, 1 }
0x25e3   :  { %v3023_v61 = vsub.f32 %v4651_v47, %v3021_v45  ;;  %v3014_v1 = vmax.f32 %v3012_v52, %v3013_v57 }
0x25e5   :  { %v3026_v44 = vmul.f32 1.442695, %v3023_v61  ;;  %v3022_v20 = vsub.f32 %v2999_v62, %v3014_v1 }
0x25e7   :  { %4874 = vpow2.f32 %v3026_v44  ;;  %v3024_v36 = vmul.f32 1.442695, %v3022_v20 }
0x25e9   :  { %4876 = vpow2.f32 %v3024_v36 }
0x25f4   :  { %v4875_v48 = vpop.eup %4874 }
0x25f5   :  { %v3035_v21 = vsel %vm1826_vm4, %v4875_v48, 0.0 }
0x25f6   :  { %v4877_v24 = vpop.eup %4876  ;;  %v3036_v26 = vrot.slane %v3035_v21, 4 }
0x25f7   :  { %v3028_v28 = vsel %vm1826_vm4, %v4877_v24, 0.0 }
0x25f8   :  { %v3037_v22 = vadd.f32 %v3036_v26, %v3035_v21  ;;  %v3029_v18 = vrot.slane %v3028_v28, 4 }
0x25fa   :  { %v3038_v32 = vrot.slane %v3037_v22, 2  ;;  %v3030_v31 = vadd.f32 %v3029_v18, %v3028_v28  ;;  %v5719_v18 = vld [vmem:[#allocation10 + $0xc8] sm:$0xff] }
0x25fc   :  { %v3039_v34 = vadd.f32 %v3038_v32, %v3037_v22  ;;  %v3031_v35 = vrot.slane %v3030_v31, 2  ;;  %v5716_v22 = vld [vmem:[#allocation10 + $0xd0] sm:$0xff]  ;;  %v5723_v32 = vld [vmem:[#allocation10 + $0xc0] sm:$0xff] }
0x25fe   :  { %v3032_v37 = vadd.f32 %v3031_v35, %v3030_v31  ;;  %v3040_v51 = vrot.slane %v3039_v34, 1  ;;  %v5727_v31 = vld [vmem:[#allocation10 + $0xb8] sm:$0xff] }
0x2600   :  { %v3041_v38 = vadd.f32 %v3040_v51, %v3039_v34  ;;  %v3033_v49 = vrot.slane %v3032_v37, 1  ;;  %v421_v34 = vcombine.high %v5641_v9, %v5641_v9 }
0x2602   :  { %4878 = vrcp.f32 %v3041_v38  ;;  %v3034_v39 = vadd.f32 %v3033_v49, %v3032_v37 }
0x2604   :  { %4880 = vrcp.f32 %v3034_v39 }
0x260f   :  { %v4879_v47 = vpop.eup %4878 }
0x2610   :  { %v3045_v58 = vmul.f32 %v4879_v47, %v4875_v48 }
0x2611   :  { %v4881_v62 = vpop.eup %4880 }
0x2612   :  { %3053 = vperm.xlu1 %4766, %v3045_v58   ;;  %v3044_v60 = vmul.f32 %v4881_v62, %v4877_v24 }
0x2614   :  { %3048 = vperm.xlu0 %4767, %v3044_v60  }
0x2616   :  { %3174 = vrot.lane.b32.xlu1 %v3173_v7, %s5026_s17 }
0x2618   :  { %3155 = vrot.lane.b32.xlu0 %v3154_v11, %s5035_s2 }
0x268d   :  { %v3054_v14 = vpop.permute.xlu1 %3053 }
0x268e   :  { %v3057_v50 = vmul.f32 %v3054_v14, %v5381_v43 }
0x268f   :  { %v3049_v16 = vpop.permute.xlu0 %3048 }
0x2690   :  { %v3065_v10 = vsel %vm145_vm1, %v3057_v50, 0.0  ;;  %v3056_v19 = vmul.f32 %v3049_v16, %v5379_v42 }
0x2691   :  { %v3066_v52 = vrot.slane %v3065_v10, 4  ;;  %v3175_v62 = vpop.permute.xlu1 %3174 }
0x2692   :  { %v3058_v45 = vsel %vm145_vm1, %v3056_v19, 0.0 }
0x2693   :  { %v3067_v57 = vadd.f32 %v3066_v52, %v3065_v10  ;;  %v3059_v61 = vrot.slane %v3058_v45, 4  ;;  %v3156_v51 = vpop.permute.xlu0 %3155 }
0x2695   :  { %v3068_v1 = vrot.slane %v3067_v57, 2  ;;  %v3060_v44 = vadd.f32 %v3059_v61, %v3058_v45 }
0x2697   :  { %v3069_v12 = vadd.f32 %v3068_v1, %v3067_v57  ;;  %v3061_v20 = vrot.slane %v3060_v44, 2 }
0x2699   :  { %v3070_v36 = vrot.slane %v3069_v12, 1  ;;  %v3062_v48 = vadd.f32 %v3061_v20, %v3060_v44 }
0x269b   :  { %v3063_v21 = vrot.slane %v3062_v48, 1  ;;  %v3071_v24 = vadd.f32 %v3070_v36, %v3069_v12 }
0x269d   :  { %v3064_v26 = vadd.f32 %v3063_v21, %v3062_v48 }
0x269f   :  { %v5712_v28 = vsel %vm1893_vm5, %v3071_v24, %v3064_v26 }
0x26a0   :  { %4661 = vmatmul.mubr.msk.f32.vlgmr.msra.gmra.mxu1 %vm145_vm1, %v5712_v28 }
0x26a1   :  { %4675 = vmatpush3.msra.mxu1 %v5716_v22 }
0x26a2   :  { %4676 = vmatprep.subr.mxu1 %v5719_v18 }
0x26a3   :  { %4677 = vmatpush3.msra.mxu1 %v5719_v18 }
0x26a4   :  { %4678 = vmatprep.subr.mxu1 %v5723_v32 }
0x26a5   :  { %4679 = vmatpush3.msra.mxu1 %v5723_v32 }
0x26a6   :  { %4680 = vmatprep.subr.mxu1 %v5727_v31 }
0x26a7   :  { %4681 = vmatpush3.msra.mxu1 %v5727_v31 }
0x26a8   :  { %4696 = vmatprep.subr.mxu1 %v5032_v3 }
0x2760   :  { %v3143_v35 = vpop.f32.mrf.mxu1 }
0x2761   :  { %v3147_v37 = vadd.f32 %v3143_v35, %v421_v34 }
0x2762   :  { %v4662_v38 = vpop.f32.mrf.mxu1 }
0x2763   :  { %v3158_v49 = vadd.f32 %v3156_v51, %v3147_v37 }
0x2765   :  { %v4235_v39 = vmul.f32 -1.442695, %v3158_v49 }
0x2767   :  { %4882 = vpow2.f32 %v4235_v39 }
0x2774   :  { %v4883_v47 = vpop.eup %4882 }
0x2775   :  { %v3162_v58 = vadd.f32 1.0, %v4883_v47 }
0x2777   :  { %4884 = vrcp.f32 %v3162_v58 }
0x2784   :  { %v4885_v59 = vpop.eup %4884 }
0x2785   :  { %v3177_v60 = vmul.f32 %v4885_v59, %v3175_v62  ;;  %v3184_v9 = vsub.f32 1.0, %v4885_v59  ;;  %v3190_v16 = vmul.f32 %v4885_v59, %v5647_v30 }
0x2787   :  { %3179 = vrot.lane.b32.xlu0 %v3177_v60, %s5034_s0 }
0x27f9   :  { %v3180_v7 = vpop.permute.xlu0 %3179 }
0x27fa   :  { %v3182_v11 = vadd.f32 %v3180_v7, %v3147_v37 }
0x27fc   :  { %4886 = vtanh.f32 %v3182_v11 }
0x2809   :  { %v4887_v14 = vpop.eup %4886 }
0x280a   :  { %3186 = vrot.lane.b32.xlu1 %v4887_v14, %s5035_s2 }
0x287c   :  { %v3187_v50 = vpop.permute.xlu1 %3186 }
0x287d   :  { %v3189_v10 = vmul.f32 %v3187_v50, %v3184_v9 }
0x287f   :  { %v5737_v19 = vadd.f32 %v3190_v16, %v3189_v10 }
0x2881   :  { %v3199_v52 = vrot.slane %v5737_v19, %v5083_v8 }
0x2883   :  { %3200 = vrot.lane.b32.xlu0 %v3199_v52, %s5035_s2 }
0x28f5   :  { %v5742_v45 = vpop.permute.xlu0 %3200 }
0x28f6   :  { %4672 = vmatmul.mubr.msk.f32.vlgmr.msra.gmra.mxu0 %vm145_vm1, %v5742_v45 }
0x28f7   :  { %4686 = vmatpush3.msra.mxu0 %v5441_v23  ;;  %4693 = vmatprep.mubr.msk.f32.mxu0 %vm5033_vm0, %v5032_v3 }
0x28f8   :  { %4687 = vmatprep.subr.mxu0 %v5032_v3 }
0x28f9   :  { %4688 = vmatpush3.msra.mxu0 %v5447_v53 }
0x28fa   :  { %4689 = vmatprep.subr.mxu0 %v5032_v3 }
0x28fb   :  { %4690 = vmatpush3.msra.mxu0 %v5452_v25 }
0x28fc   :  { %4691 = vmatprep.subr.mxu0 %v5032_v3 }
0x28fd   :  { %4692 = vmatpush3.msra.mxu0 %v5455_v2 }
0x28fe   :  { %4707 = vmatprep.subr.mxu0 %v5716_v22 }
0x29b6   :  { %v5756_v30 = vpop.f32.mrf.mxu0 }
0x29b7   :  { %v3288_v23 = vrot.slane %v5756_v30, %v5407_v63 }
0x29b8   :  { %v4673_v57 = vpop.f32.mrf.mxu0 }
0x29b9   :  { %v3289_v61 = vcombine.high %v3288_v23, %v3288_v23  ;;  %v3296_v1 = vrot.slane %v3288_v23, %v5407_v63 }
0x29bb   :  { %v3303_v53 = vrot.slane %v3289_v61, %v5407_v63  ;;  %v3307_v44 = vrot.slane %v3296_v1, %v5141_v56 }
0x29bd   :  { %v3311_v25 = vrot.slane %v3303_v53, %v5141_v56  ;;  %v3314_v12 = vadd.f32 %v3307_v44, %v5419_v17 }
0x29bf   :  { %v3315_v2 = vadd.f32 %v3311_v25, %v5415_v13  ;;  %4888 = vtanh.f32 %v3314_v12 }
0x29c1   :  { %4890 = vtanh.f32 %v3315_v2 }
0x29cc   :  { %v4889_v20 = vpop.eup %4888 }
0x29cd   :  { %4682 = vmatprep.mubr.msk.f32.mxu1 %vm145_vm1, %v4889_v20 }
0x29ce   :  { %v4891_v36 = vpop.eup %4890 }
0x29cf   :  { %4683 = vmatmul.mubr.msk.f32.vlgmr.msra.gmra.mxu1 %vm145_vm1, %v4891_v36  ;;  %v3556_v36 = vadd.f32 %v5756_v30, %v5464_v33 }
0x29d0   :  { %4697 = vmatpush3.msra.mxu1 %v5678_v40  ;;  %4704 = vmatprep.mubr.msk.f32.mxu1 %vm5033_vm0, %v5032_v3 }
0x29d1   :  { %4698 = vmatprep.subr.mxu1 %v5032_v3 }
0x29d2   :  { %4699 = vmatpush3.msra.mxu1 %v5684_v46 }
0x29d3   :  { %4700 = vmatprep.subr.mxu1 %v5032_v3 }
0x29d4   :  { %4701 = vmatpush3.msra.mxu1 %v5688_v54 }
0x29d5   :  { %4702 = vmatprep.subr.mxu1 %v5032_v3 }
0x29d6   :  { %4703 = vmatpush3.msra.mxu1 %v5692_v41 }
0x29d7   :  { %4718 = vmatprep.subr.mxu1 %v5032_v3 }
0x2a8f   :  { %v4684_v48 = vpop.f32.mrf.mxu1 }
0x2a90   :  { %v3406_v40 = vsel %vm1826_vm4, %v4684_v48, -inf }
0x2a91   :  { %v3407_v21 = vrot.slane %v3406_v40, 4  ;;  %v3390_v24 = vpop.f32.mrf.mxu1 }
0x2a92   :  { %v3399_v26 = vsel %vm1826_vm4, %v3390_v24, -inf }
0x2a93   :  { %v3408_v34 = vmax.f32 %v3406_v40, %v3407_v21  ;;  %v3400_v35 = vrot.slane %v3399_v26, 4  ;;  %v3564_v21 = vrot.slane %v3556_v36, %v5083_v8 }
0x2a95   :  { %v3409_v46 = vrot.slane %v3408_v34, 2  ;;  %v3401_v37 = vmax.f32 %v3399_v26, %v3400_v35 }
0x2a97   :  { %v3410_v51 = vmax.f32 %v3408_v34, %v3409_v46  ;;  %v3402_v38 = vrot.slane %v3401_v37, 2 }
0x2a99   :  { %v3411_v54 = vrot.slane %v3410_v51, 1  ;;  %v3403_v49 = vmax.f32 %v3401_v37, %v3402_v38 }
0x2a9b   :  { %v3412_v39 = vmax.f32 %v3410_v51, %v3411_v54  ;;  %v3404_v47 = vrot.slane %v3403_v49, 1 }
0x2a9d   :  { %v3414_v41 = vsub.f32 %v4684_v48, %v3412_v39  ;;  %v3405_v58 = vmax.f32 %v3403_v49, %v3404_v47 }
0x2a9f   :  { %v3417_v59 = vmul.f32 1.442695, %v3414_v41  ;;  %v3413_v62 = vsub.f32 %v3390_v24, %v3405_v58  ;;  %v3545_v24 = vrot.slane %v5756_v30, %v5083_v8 }
0x2aa1   :  { %4892 = vpow2.f32 %v3417_v59  ;;  %v3415_v60 = vmul.f32 1.442695, %v3413_v62 }
0x2aa3   :  { %4894 = vpow2.f32 %v3415_v60 }
0x2aae   :  { %v4893_v7 = vpop.eup %4892 }
0x2aaf   :  { %v3426_v11 = vsel %vm1826_vm4, %v4893_v7, 0.0 }
0x2ab0   :  { %v4895_v14 = vpop.eup %4894  ;;  %v3427_v9 = vrot.slane %v3426_v11, 4 }
0x2ab1   :  { %v3419_v50 = vsel %vm1826_vm4, %v4895_v14, 0.0 }
0x2ab2   :  { %v3428_v16 = vadd.f32 %v3427_v9, %v3426_v11  ;;  %v3420_v10 = vrot.slane %v3419_v50, 4 }
0x2ab4   :  { %v3429_v52 = vrot.slane %v3428_v16, 2  ;;  %v3421_v23 = vadd.f32 %v3420_v10, %v3419_v50 }
0x2ab6   :  { %v3430_v57 = vadd.f32 %v3429_v52, %v3428_v16  ;;  %v3422_v61 = vrot.slane %v3421_v23, 2 }
0x2ab8   :  { %v3423_v1 = vadd.f32 %v3422_v61, %v3421_v23  ;;  %v3431_v53 = vrot.slane %v3430_v57, 1 }
0x2aba   :  { %v3432_v44 = vadd.f32 %v3431_v53, %v3430_v57  ;;  %v3424_v25 = vrot.slane %v3423_v1, 1 }
0x2abc   :  { %4896 = vrcp.f32 %v3432_v44  ;;  %v3425_v12 = vadd.f32 %v3424_v25, %v3423_v1 }
0x2abe   :  { %4898 = vrcp.f32 %v3425_v12 }
0x2ac9   :  { %v4897_v2 = vpop.eup %4896 }
0x2aca   :  { %v3436_v20 = vmul.f32 %v4897_v2, %v4893_v7 }
0x2acb   :  { %v4899_v48 = vpop.eup %4898 }
0x2acc   :  { %3444 = vperm.xlu0 %4767, %v3436_v20   ;;  %v3435_v40 = vmul.f32 %v4899_v48, %v4895_v14  ;;  %v5807_v14 = vrot.slane %v5152_v0, %v5083_v8  ;;  %v4933_v48 = vld [vmem:[#allocation10 + $0x70] sm:$0xff] }
0x2ace   :  { %3439 = vperm.xlu1 %4766, %v3435_v40   ;;  %v4935_v40 = vld [vmem:[#allocation10 + $0x60] sm:$0xff] }
0x2ad0   :  { %3565 = vrot.lane.b32.xlu0 %v3564_v21, %s5026_s17  ;;  %v4936_v21 = vld [vmem:[#allocation10 + $0x58] sm:$0xff] }
0x2ad2   :  { %3546 = vrot.lane.b32.xlu1 %v3545_v24, %s5035_s2 }
0x2b47   :  { %v3445_v26 = vpop.permute.xlu0 %3444 }
0x2b48   :  { %v3448_v34 = vmul.f32 %v3445_v26, %v5381_v43 }
0x2b49   :  { %v3440_v35 = vpop.permute.xlu1 %3439 }
0x2b4a   :  { %v3456_v46 = vsel %vm145_vm1, %v3448_v34, 0.0  ;;  %v3447_v37 = vmul.f32 %v3440_v35, %v5379_v42 }
0x2b4b   :  { %v3457_v51 = vrot.slane %v3456_v46, 4  ;;  %v3566_v57 = vpop.permute.xlu0 %3565 }
0x2b4c   :  { %v3449_v38 = vsel %vm145_vm1, %v3447_v37, 0.0 }
0x2b4d   :  { %v3458_v54 = vadd.f32 %v3457_v51, %v3456_v46  ;;  %v3450_v49 = vrot.slane %v3449_v38, 4 }
0x2b4f   :  { %v3459_v39 = vrot.slane %v3458_v54, 2  ;;  %v3451_v47 = vadd.f32 %v3450_v49, %v3449_v38 }
0x2b51   :  { %v3460_v30 = vadd.f32 %v3459_v39, %v3458_v54  ;;  %v3452_v41 = vrot.slane %v3451_v47, 2 }
0x2b53   :  { %v3461_v58 = vrot.slane %v3460_v30, 1  ;;  %v3453_v59 = vadd.f32 %v3452_v41, %v3451_v47 }
0x2b55   :  { %v3454_v62 = vrot.slane %v3453_v59, 1  ;;  %v3462_v60 = vadd.f32 %v3461_v58, %v3460_v30 }
0x2b57   :  { %v3455_v7 = vadd.f32 %v3454_v62, %v3453_v59 }
0x2b59   :  { %v5794_v11 = vsel %vm1893_vm5, %v3462_v60, %v3455_v7 }
0x2b5a   :  { %4694 = vmatmul.mubr.msk.f32.vlgmr.msra.gmra.mxu0 %vm145_vm1, %v5794_v11 }
0x2b5b   :  { %4708 = vmatpush3.msra.mxu0 %v5716_v22  ;;  %v3547_v22 = vpop.permute.xlu1 %3546 }
0x2b5c   :  { %4709 = vmatprep.subr.mxu0 %v5719_v18 }
0x2b5d   :  { %4710 = vmatpush3.msra.mxu0 %v5719_v18 }
0x2b5e   :  { %4711 = vmatprep.subr.mxu0 %v5723_v32 }
0x2b5f   :  { %4712 = vmatpush3.msra.mxu0 %v5723_v32 }
0x2b60   :  { %4713 = vmatprep.subr.mxu0 %v5727_v31 }
0x2b61   :  { %4714 = vmatpush3.msra.mxu0 %v5727_v31 }
0x2c1a   :  { %v3534_v9 = vpop.f32.mrf.mxu0 }
0x2c1b   :  { %v3538_v50 = vadd.f32 %v3534_v9, %v5807_v14 }
0x2c1c   :  { %v4695_v16 = vpop.f32.mrf.mxu0 }
0x2c1d   :  { %v3549_v10 = vadd.f32 %v3547_v22, %v3538_v50 }
0x2c1f   :  { %v4240_v52 = vmul.f32 -1.442695, %v3549_v10 }
0x2c21   :  { %4900 = vpow2.f32 %v4240_v52 }
0x2c2e   :  { %v4901_v18 = vpop.eup %4900 }
0x2c2f   :  { %v3553_v23 = vadd.f32 1.0, %v4901_v18 }
0x2c31   :  { %4902 = vrcp.f32 %v3553_v23 }
0x2c3e   :  { %v4903_v32 = vpop.eup %4902 }
0x2c3f   :  { %v3568_v61 = vmul.f32 %v4903_v32, %v3566_v57  ;;  %v3575_v53 = vsub.f32 1.0, %v4903_v32  ;;  %v3581_v25 = vmul.f32 %v4903_v32, %v5737_v19  ;;  %v4934_v19 = vld [vmem:[#allocation10 + $0x68] sm:$0xff] }
0x2c41   :  { %3570 = vrot.lane.b32.xlu1 %v3568_v61, %s5034_s0 }
0x2cb3   :  { %v3571_v31 = vpop.permute.xlu1 %3570 }
0x2cb4   :  { %v3573_v1 = vadd.f32 %v3571_v31, %v3538_v50 }
0x2cb6   :  { %4904 = vtanh.f32 %v3573_v1 }
0x2cc3   :  { %v4905_v0 = vpop.eup %4904 }
0x2cc4   :  { %3577 = vrot.lane.b32.xlu0 %v4905_v0, %s5035_s2 }
0x2d36   :  { %v3578_v44 = vpop.permute.xlu0 %3577 }
0x2d37   :  { %v3580_v12 = vmul.f32 %v3578_v44, %v3575_v53 }
0x2d39   :  { %v5813_v2 = vadd.f32 %v3581_v25, %v3580_v12 }
0x2d3b   :  { %v3590_v20 = vrot.slane %v5813_v2, %v5083_v8 }
0x2d3d   :  { %3591 = vrot.lane.b32.xlu1 %v3590_v20, %s5035_s2 }
0x2daf   :  { %v5818_v36 = vpop.permute.xlu1 %3591 }
0x2db0   :  { %4705 = vmatmul.mubr.msk.f32.vlgmr.msra.gmra.mxu1 %vm145_vm1, %v5818_v36 }
0x2db1   :  { %4719 = vmatpush3.msra.mxu1 %v4933_v48  ;;  %4726 = vmatprep.mubr.msk.f32.mxu1 %vm5033_vm0, %v5032_v3 }
0x2db2   :  { %4720 = vmatprep.subr.mxu1 %v5032_v3 }
0x2db3   :  { %4721 = vmatpush3.msra.mxu1 %v4934_v19 }
0x2db4   :  { %4722 = vmatprep.subr.mxu1 %v5032_v3 }
0x2db5   :  { %4723 = vmatpush3.msra.mxu1 %v4935_v40 }
0x2db6   :  { %4724 = vmatprep.subr.mxu1 %v5032_v3 }
0x2db7   :  { %4725 = vmatpush3.msra.mxu1 %v4936_v21 }
0x2e70   :  { %v5827_v24 = vpop.f32.mrf.mxu1 }
0x2e71   :  { %v3679_v26 = vrot.slane %v5827_v24, %v5407_v63 }
0x2e72   :  { %v4706_v34 = vpop.f32.mrf.mxu1 }
0x2e73   :  { %v3680_v35 = vcombine.high %v3679_v26, %v3679_v26  ;;  %v3687_v46 = vrot.slane %v3679_v26, %v5407_v63 }
0x2e75   :  { %v3694_v37 = vrot.slane %v3680_v35, %v5407_v63  ;;  %v3698_v51 = vrot.slane %v3687_v46, %v5141_v56 }
0x2e77   :  { %v3702_v38 = vrot.slane %v3694_v37, %v5141_v56  ;;  %v3705_v54 = vadd.f32 %v3698_v51, %v5419_v17  ;;  %v3947_v37 = vadd.f32 %v5827_v24, %v5464_v33 }
0x2e79   :  { %v3706_v49 = vadd.f32 %v3702_v38, %v5415_v13  ;;  %4906 = vtanh.f32 %v3705_v54  ;;  %v3955_v54 = vrot.slane %v3947_v37, %v5083_v8 }
0x2e7b   :  { %4908 = vtanh.f32 %v3706_v49  ;;  %v3936_v49 = vrot.slane %v5827_v24, %v5083_v8 }
0x2e86   :  { %v4907_v39 = vpop.eup %4906 }
0x2e87   :  { %4715 = vmatprep.mubr.msk.f32.mxu0 %vm145_vm1, %v4907_v39 }
0x2e88   :  { %v4909_v47 = vpop.eup %4908 }
0x2e89   :  { %4716 = vmatmul.mubr.msk.f32.vlgmr.msra.gmra.mxu0 %vm145_vm1, %v4909_v47 }
0x2f49   :  { %v4717_v30 = vpop.f32.mrf.mxu0 }
0x2f4a   :  { %v3797_v41 = vsel %vm1826_vm4, %v4717_v30, -inf }
0x2f4b   :  { %v3798_v63 = vrot.slane %v3797_v41, 4  ;;  %v3781_v58 = vpop.f32.mrf.mxu0 }
0x2f4c   :  { %v3790_v59 = vsel %vm1826_vm4, %v3781_v58, -inf }
0x2f4d   :  { %v3799_v56 = vmax.f32 %v3797_v41, %v3798_v63  ;;  %v3791_v62 = vrot.slane %v3790_v59, 4 }
0x2f4f   :  { %v3800_v17 = vrot.slane %v3799_v56, 2  ;;  %v3792_v60 = vmax.f32 %v3790_v59, %v3791_v62 }
0x2f51   :  { %v3801_v13 = vmax.f32 %v3799_v56, %v3800_v17  ;;  %v3793_v7 = vrot.slane %v3792_v60, 2 }
0x2f53   :  { %v3802_v9 = vrot.slane %v3801_v13, 1  ;;  %v3794_v50 = vmax.f32 %v3792_v60, %v3793_v7 }
0x2f55   :  { %v3803_v22 = vmax.f32 %v3801_v13, %v3802_v9  ;;  %v3795_v16 = vrot.slane %v3794_v50, 1 }
0x2f57   :  { %v3805_v10 = vsub.f32 %v4717_v30, %v3803_v22  ;;  %v3796_v52 = vmax.f32 %v3794_v50, %v3795_v16 }
0x2f59   :  { %v3808_v18 = vmul.f32 1.442695, %v3805_v10  ;;  %v3804_v23 = vsub.f32 %v3781_v58, %v3796_v52 }
0x2f5b   :  { %4910 = vpow2.f32 %v3808_v18  ;;  %v3806_v32 = vmul.f32 1.442695, %v3804_v23 }
0x2f5d   :  { %4912 = vpow2.f32 %v3806_v32 }
0x2f68   :  { %v4911_v57 = vpop.eup %4910 }
0x2f69   :  { %v3817_v61 = vsel %vm1826_vm4, %v4911_v57, 0.0 }
0x2f6a   :  { %v4913_v31 = vpop.eup %4912  ;;  %v3818_v1 = vrot.slane %v3817_v61, 4 }
0x2f6b   :  { %v3810_v0 = vsel %vm1826_vm4, %v4913_v31, 0.0 }
0x2f6c   :  { %v3819_v53 = vadd.f32 %v3818_v1, %v3817_v61  ;;  %v3811_v44 = vrot.slane %v3810_v0, 4 }
0x2f6e   :  { %v3820_v25 = vrot.slane %v3819_v53, 2  ;;  %v3812_v12 = vadd.f32 %v3811_v44, %v3810_v0 }
0x2f70   :  { %v3821_v20 = vadd.f32 %v3820_v25, %v3819_v53  ;;  %v3813_v48 = vrot.slane %v3812_v12, 2 }
0x2f72   :  { %v3814_v19 = vadd.f32 %v3813_v48, %v3812_v12  ;;  %v3822_v40 = vrot.slane %v3821_v20, 1  ;;  %v87_v48 = vld [vmem:[#allocation10 + $0xf8] sm:$0xff] }
0x2f74   :  { %v3823_v21 = vadd.f32 %v3822_v40, %v3821_v20  ;;  %v3815_v26 = vrot.slane %v3814_v19, 1  ;;  %v88_v20 = vld [vmem:[#allocation10 + $0x100] sm:$0xff] }
0x2f76   :  { %4914 = vrcp.f32 %v3823_v21  ;;  %v3816_v34 = vadd.f32 %v3815_v26, %v3814_v19  ;;  %v85_v21 = vld [vmem:[#allocation10 + $0xe8] sm:$0xff] }
0x2f78   :  { %4916 = vrcp.f32 %v3816_v34 }
0x2f83   :  { %v4915_v35 = vpop.eup %4914 }
0x2f84   :  { %v3827_v46 = vmul.f32 %v4915_v35, %v4911_v57 }
0x2f85   :  { %v4917_v51 = vpop.eup %4916 }
0x2f86   :  { %3835 = vperm.xlu1 %4766, %v3827_v46   ;;  %v3826_v38 = vmul.f32 %v4917_v51, %v4913_v31  ;;  %v83_v46 = vld [vmem:[#allocation10 + $0xd8] sm:$0xff] }
0x2f88   :  { %3830 = vperm.xlu0 %4767, %v3826_v38  }
0x2f8a   :  { %3956 = vrot.lane.b32.xlu1 %v3955_v54, %s5026_s17 }
0x2f8c   :  { %3937 = vrot.lane.b32.xlu0 %v3936_v49, %s5035_s2 }
0x3001   :  { %v3836_v39 = vpop.permute.xlu1 %3835 }
0x3002   :  { %v3839_v47 = vmul.f32 %v3836_v39, %v5381_v43 }
0x3003   :  { %v3831_v30 = vpop.permute.xlu0 %3830 }
0x3004   :  { %v3847_v41 = vsel %vm145_vm1, %v3839_v47, 0.0  ;;  %v3838_v33 = vmul.f32 %v3831_v30, %v5379_v42  ;;  %v429_v42 = vcombine.high %v5807_v14, %v5807_v14 }
0x3005   :  { %v3848_v63 = vrot.slane %v3847_v41, 4  ;;  %v3957_v31 = vpop.permute.xlu1 %3956 }
0x3006   :  { %v3840_v58 = vsel %vm145_vm1, %v3838_v33, 0.0 }
0x3007   :  { %v3849_v59 = vadd.f32 %v3848_v63, %v3847_v41  ;;  %v3841_v56 = vrot.slane %v3840_v58, 4  ;;  %v3938_v52 = vpop.permute.xlu0 %3937 }
0x3009   :  { %v3850_v62 = vrot.slane %v3849_v59, 2  ;;  %v3842_v17 = vadd.f32 %v3841_v56, %v3840_v58  ;;  %v3997_v56 = vld [vmem:[#allocation4 + $0xc] sm:$0x3] }
0x300b   :  { %v3851_v24 = vadd.f32 %v3850_v62, %v3849_v59  ;;  %v3843_v60 = vrot.slane %v3842_v17, 2  ;;  %v3998_v62 = vld [vmem:[#allocation4 + $0xe] sm:$0x3] }
0x300d   :  { %v3852_v13 = vrot.slane %v3851_v24, 1  ;;  %v3844_v7 = vadd.f32 %v3843_v60, %v3842_v17  ;;  %v4029_v17 = vcombine.low %v3997_v56, %v3998_v62 }
0x300f   :  { %v3845_v9 = vrot.slane %v3844_v7, 1  ;;  %v3853_v50 = vadd.f32 %v3852_v13, %v3851_v24 }
0x3011   :  { %v3846_v22 = vadd.f32 %v3845_v9, %v3844_v7  ;;  %v4043_v7 = vrot.slane %v4029_v17, %v5083_v8 }
0x3013   :  { %v3856_v43 = vsel %vm1893_vm5, %v3853_v50, %v3846_v22  ;;  %v4001_v22 = vsub.s32 5, %v5080_v4 }
0x3014   :  { %4727 = vmatmul.mubr.msk.f32.vlgmr.msra.gmra.mxu1 %vm145_vm1, %v3856_v43 }
0x30d4   :  { %v3925_v16 = vpop.f32.mrf.mxu1 }
0x30d5   :  { %v3929_v10 = vadd.f32 %v3925_v16, %v429_v42 }
0x30d6   :  { %v4728_v18 = vpop.f32.mrf.mxu1 }
0x30d7   :  { %v3940_v23 = vadd.f32 %v3938_v52, %v3929_v10 }
0x30d9   :  { %v4245_v32 = vmul.f32 -1.442695, %v3940_v23 }
0x30db   :  { %4918 = vpow2.f32 %v4245_v32 }
0x30e8   :  { %v4919_v57 = vpop.eup %4918 }
0x30e9   :  { %v3944_v61 = vadd.f32 1.0, %v4919_v57 }
0x30eb   :  { %4920 = vrcp.f32 %v3944_v61 }
0x30f8   :  { %v4921_v14 = vpop.eup %4920 }
0x30f9   :  { %v3959_v1 = vmul.f32 %v4921_v14, %v3957_v31  ;;  %v3966_v19 = vsub.f32 1.0, %v4921_v14 }
0x30fb   :  { %3961 = vrot.lane.b32.xlu0 %v3959_v1, %s5034_s0 }
0x30ff   :  { %2031 = vrot.lane.b32.xlu0 %v5471_v5, %s5026_s17 }
0x3103   :  { %2812 = vrot.lane.b32.xlu0 %v5626_v6, %s5026_s17 }
0x3107   :  { %3594 = vrot.lane.b32.xlu0 %v5794_v11, %s5026_s17 }
0x310b   :  { %3985 = vrot.lane.b32.xlu0 %v3856_v43, %s5026_s17  ;;  %v4937_v43 = vld [vmem:[#allocation10] sm:$0xff] }
0x310c   :  { %v4002_v42 = vrot.slane %v4937_v43, %v4001_v22 }
0x316d   :  { %v3962_v0 = vpop.permute.xlu0 %3961 }
0x316e   :  { %v3964_v53 = vadd.f32 %v3962_v0, %v3929_v10 }
0x3170   :  { %4922 = vtanh.f32 %v3964_v53 }
0x3171   :  { %v2032_v3 = vpop.permute.xlu0 %2031 }
0x3172   :  { %v2034_v44 = vsel %vm145_vm1, %v5500_v29, %v2032_v3  ;;  %v90_v29 = vld [vmem:[#allocation10 + $0x110] sm:$0xff] }
0x3173   :  { %2035 = vst.msk [vmem:[#allocation4] sm:$0x3] %vm1627_vm6, %v2034_v44  ;;  %4729 = vmatprep.subr.mxu0 %v90_v29 }
0x3174   :  { %4730 = vmatpush3.msra.mxu0 %v90_v29 }
0x3175   :  { %v2813_v25 = vpop.permute.xlu0 %2812 }
0x3176   :  { %v2815_v5 = vsel %vm145_vm1, %v5652_v27, %v2813_v25  ;;  %v89_v27 = vld [vmem:[#allocation10 + $0x108] sm:$0xff] }
0x3177   :  { %2817 = vst.msk [vmem:[#allocation4 + $0x4] sm:$0x3] %vm1627_vm6, %v2815_v5  ;;  %4731 = vmatprep.subr.mxu0 %v89_v27 }
0x3178   :  { %4732 = vmatpush3.msra.mxu0 %v89_v27 }
0x3179   :  { %v3595_v6 = vpop.permute.xlu0 %3594  ;;  %4733 = vmatprep.subr.mxu0 %v88_v20 }
0x317a   :  { %v3597_v11 = vsel %vm145_vm1, %v5818_v36, %v3595_v6  ;;  %4734 = vmatpush3.msra.mxu0 %v88_v20  ;;  %v86_v36 = vld [vmem:[#allocation10 + $0xf0] sm:$0xff] }
0x317b   :  { %3599 = vst.msk [vmem:[#allocation4 + $0x8] sm:$0x3] %vm1627_vm6, %v3597_v11  ;;  %4735 = vmatprep.subr.mxu0 %v87_v48  ;;  %v3991_v49 = vld [vmem:[#allocation4] sm:$0x3] }
0x317c   :  { %4736 = vmatpush3.msra.mxu0 %v87_v48 }
0x317d   :  { %v4923_v12 = vpop.eup %4922  ;;  %4737 = vmatprep.subr.mxu0 %v86_v36  ;;  %v3986_v58 = vpop.permute.xlu0 %3985 }
0x317e   :  { %3968 = vrot.lane.b32.xlu1 %v4923_v12, %s5035_s2  ;;  %4738 = vmatpush3.msra.mxu0 %v86_v36 }
0x317f   :  { %4739 = vmatprep.subr.mxu0 %v85_v21 }
0x3180   :  { %4740 = vmatpush3.msra.mxu0 %v85_v21 }
0x3182   :  { %2421 = vrot.lane.b32.xlu1 %v5552_v55, %s5026_s17  ;;  %v3972_v55 = vmul.f32 %v4921_v14, %v5813_v2  ;;  %v3995_v24 = vld [vmem:[#allocation4 + $0x8] sm:$0x3] }
0x3186   :  { %3203 = vrot.lane.b32.xlu1 %v5712_v28, %s5026_s17  ;;  %v84_v28 = vld [vmem:[#allocation10 + $0xe0] sm:$0xff] }
0x3187   :  { %4741 = vmatprep.subr.mxu0 %v84_v28 }
0x3188   :  { %4742 = vmatpush3.msra.mxu0 %v84_v28 }
0x3189   :  { %4743 = vmatprep.subr.mxu0 %v83_v46 }
0x318a   :  { %4744 = vmatpush3.msra.mxu0 %v83_v46 }
0x31f0   :  { %v3969_v40 = vpop.permute.xlu1 %3968 }
0x31f1   :  { %v3971_v26 = vmul.f32 %v3969_v40, %v3966_v19 }
0x31f3   :  { %v3973_v34 = vadd.f32 %v3972_v55, %v3971_v26 }
0x31f4   :  { %v2422_v35 = vpop.permute.xlu1 %2421 }
0x31f5   :  { %v2424_v37 = vsel %vm145_vm1, %v5574_v15, %v2422_v35  ;;  %v3981_v51 = vrot.slane %v3973_v34, %v5083_v8  ;;  %v3993_v15 = vld [vmem:[#allocation4 + $0x4] sm:$0x3] }
0x31f6   :  { %2426 = vst.msk [vmem:[#allocation4 + $0x2] sm:$0x3] %vm1627_vm6, %v2424_v37 }
0x31f7   :  { %3982 = vrot.lane.b32.xlu1 %v3981_v51, %s5035_s2 }
0x31f8   :  { %v3204_v2 = vpop.permute.xlu1 %3203 }
0x31f9   :  { %v3206_v38 = vsel %vm145_vm1, %v5742_v45, %v3204_v2 }
0x31fa   :  { %3208 = vst.msk [vmem:[#allocation4 + $0x6] sm:$0x3] %vm1627_vm6, %v3206_v38 }
0x31fd   :  { %v3992_v54 = vld [vmem:[#allocation4 + $0x2] sm:$0x3] }
0x31fe   :  { %v4011_v39 = vcombine.low %v3991_v49, %v3992_v54 }
0x3200   :  { %v4019_v41 = vrot.slane %v4011_v39, %v5083_v8 }
0x3201   :  { %v3994_v47 = vld [vmem:[#allocation4 + $0x6] sm:$0x3] }
0x3202   :  { %v4012_v30 = vcombine.low %v3993_v15, %v3994_v47 }
0x3204   :  { %v4026_v33 = vrot.slane %v4012_v30, %v5083_v8 }
0x3206   :  { %v4027_v63 = vcombine.low %v4019_v41, %v4026_v33 }
0x3208   :  { %4745 = vmatprep.mubr.msk.f32.mxu0 %vm4045_vm7, %v4027_v63 }
0x3269   :  { %v3983_v59 = vpop.permute.xlu1 %3982 }
0x326a   :  { %v3988_v45 = vsel %vm145_vm1, %v3983_v59, %v3986_v58 }
0x326b   :  { %3990 = vst.msk [vmem:[#allocation4 + $0xa] sm:$0x3] %vm1627_vm6, %v3988_v45 }
0x3272   :  { %v3996_v60 = vld [vmem:[#allocation4 + $0xa] sm:$0x3] }
0x3273   :  { %v4028_v13 = vcombine.low %v3995_v24, %v3996_v60 }
0x3275   :  { %v4036_v9 = vrot.slane %v4028_v13, %v5083_v8 }
0x3277   :  { %v4044_v50 = vcombine.low %v4036_v9, %v4043_v7 }
0x3279   :  { %4746 = vmatmul.mubr.msk.f32.vlgmr.msra.gmra.mxu0 %vm4045_vm7, %v4044_v50 }
0x3339   :  { %v4747_v16 = vpop.f32.mrf.mxu0 }
0x333a   :  { %v4122_v10 = vadd.f32 %v4747_v16, %v4002_v42 }
0x333b   :  { %v4116_v52 = vpop.f32.mrf.mxu0 }
0x333c   :  { %v4144_v18 = vcombine.high %v4122_v10, %v4122_v10  ;;  %v4151_v23 = vrot.slane %v4122_v10, %v5083_v8  ;;  %4250 = vst.sshfl [vmem:[#allocation11 + $0x8] sm:$0x3 pattern:$0x76325410] %v4122_v10  ;;  %v4117_v32 = vadd.f32 %v4116_v52, %v4002_v42 }
0x333e   :  { %v4158_v57 = vrot.slane %v4144_v18, %v5083_v8  ;;  %v4159_v61 = vcombine.high %v4151_v23, %v4151_v23  ;;  %4251 = vst.sshfl [vmem:[#allocation11 + $0xc] sm:$0x3 pattern:$0x76325410] %v4144_v18  ;;  %v4127_v14 = vcombine.high %v4117_v32, %v4117_v32  ;;  %v4134_v31 = vrot.slane %v4117_v32, %v5083_v8 }
0x333f   :  { %4248 = vst.sshfl [vmem:[#allocation11] sm:$0x3 pattern:$0x76325410] %v4117_v32 }
0x3340   :  { %v4160_v4 = vcombine.high %v4158_v57, %v4158_v57  ;;  %4174 = vst [vmem:[#allocation11 + $0xa] sm:$0x3] %v4159_v61  ;;  %v4141_v1 = vrot.slane %v4127_v14, %v5083_v8  ;;  %v4142_v0 = vcombine.high %v4134_v31, %v4134_v31  ;;  %4249 = vst.sshfl [vmem:[#allocation11 + $0x4] sm:$0x3 pattern:$0x76325410] %v4127_v14 }
0x3342   :  { %4176 = vst [vmem:[#allocation11 + $0xe] sm:$0x3] %v4160_v4  ;;  %v4143_v53 = vcombine.high %v4141_v1, %v4141_v1  ;;  %4170 = vst [vmem:[#allocation11 + $0x2] sm:$0x3] %v4142_v0 }
0x3344   :  { %4172 = vst [vmem:[#allocation11 + $0x6] sm:$0x3] %v4143_v53 }
0x3345   :  { %5009 = shalt.err (!%p5006_p5)
}
0x3346   :  { %4188 = dma.vmem_to_hbm [thread:$0]  %s4183_s6, 256, %s5927_s3, [#allocation7], %s5026_s17, %s5026_s17, %s5027_s18  }
0x3347   :  { %5022 = dma.done.wait [#allocation7], 256  }
0x3348   :  { %5023 = vsyncadd [#allocation7], 4294967040 }
0x3349   :  { %4192 = vsyncpa [#allocation6], 1 }
0x334a   :  { %4193 = vsyncpa [#allocation9], 1 }
0x334b   :  { %4194 = vsyncpa [#allocation7], 1 }

</bundles_post_ra>
